<compile_context>
chip_gen: v5e
topology: v5e:2x2
jax: 0.10.0
libtpu: 0.0.40
codegen_flags: <defaults>
</compile_context>

<pallas_src>
import functools

import jax
import jax.numpy as jnp
from jax.experimental import pallas as pl
from jax.experimental.pallas import tpu as pltpu


LANE = 128                 # pad channel-ish dims to the TPU lane width
TILE_TARGET_ROWS = 1024    # target pixel rows per grid step (fits default scoped VMEM)
BN_EPS = 1e-5              # PyTorch BatchNorm2d default


# ------------------------------ small helpers ------------------------------ #

def _round_up(v, m):
    return ((v + m - 1) // m) * m


def _pad_last(x, target):
    pad = target - x.shape[-1]
    if pad == 0:
        return x
    return jnp.pad(x, [(0, 0)] * (x.ndim - 1) + [(0, pad)])


def _pick_tile(m, target=TILE_TARGET_ROWS):
    """Largest divisor of m that is a multiple of 8 and <= target."""
    best = None
    for t in range(8, min(m, target) + 1, 8):
        if m % t == 0:
            best = t
    return best if best is not None else m   # fallback: single full-extent block


def _im2col_3x3(x_nhwc):
    """pad=1, stride=1, 3x3 patches -> (N, H, W, 9*C), K ordered (dy, dx, cin)."""
    n, h, w, c = x_nhwc.shape
    xp = jnp.pad(x_nhwc, ((0, 0), (1, 1), (1, 1), (0, 0)))
    cols = []
    for dy in range(3):
        for dx in range(3):
            cols.append(xp[:, dy:dy + h, dx:dx + w, :])
    return jnp.concatenate(cols, axis=-1)                 # (N, H, W, 9*C)


def _window_major(x_nhwf):
    """(N,H,W,F) -> (4*N*(H/2)*(W/2), F); rows grouped by 2x2-window element (plane-major)."""
    n, h, w, f = x_nhwf.shape
    xr = x_nhwf.reshape(n, h // 2, 2, w // 2, 2, f)
    xr = xr.transpose(2, 4, 0, 1, 3, 5)                   # (2, 2, N, Ho, Wo, F)
    return xr.reshape(4 * n * (h // 2) * (w // 2), f)


def _window_major_inverse(x_flat, n, h, w, f):
    """Inverse of _window_major: (4*N*Ho*Wo, F) -> (N, H, W, F)."""
    xr = x_flat.reshape(2, 2, n, h // 2, w // 2, f)
    xr = xr.transpose(2, 3, 0, 4, 1, 5)                   # (N, Ho, 2, Wo, 2, F)
    return xr.reshape(n, h, w, f)


# ----------------------------- Pallas kernels ------------------------------ #

def _conv_bias_kernel(p_ref, w_ref, b_ref, y_ref, ps_ref, pq_ref):
    # p: (TM, Kp) bf16, w: (Kp, Cp) bf16, b: (1, Cp) f32
    y = jnp.dot(p_ref[...], w_ref[...], preferred_element_type=jnp.float32)
    y = y + b_ref[...]
    y_ref[...] = y
    tm, c = y.shape
    yr = y.reshape(tm // 8, 8, c)                          # sublane-aligned regroup (free)
    ps_ref[...] = jnp.sum(yr, axis=0)                      # (8, Cp) partial sum
    pq_ref[...] = jnp.sum(yr * yr, axis=0)                 # (8, Cp) partial sum of squares


def _bn_relu_kernel(y_ref, s_ref, t_ref, o_ref):
    # y: (TM, Cp) f32, s/t: (1, Cp) pre-folded BN scale/shift
    o_ref[...] = jnp.maximum(y_ref[...] * s_ref[...] + t_ref[...], 0.0)


def _bn_relu_pool_kernel(y_ref, s_ref, t_ref, o_ref, p_ref):
    # y: (4, TM2, Cp) -- 4 planes of the 2x2 pooling window, window-plane-major rows.
    act = jnp.maximum(y_ref[...] * s_ref[...] + t_ref[...], 0.0)
    o_ref[...] = act
    p_ref[...] = jnp.maximum(jnp.maximum(act[0], act[1]),
                             jnp.maximum(act[2], act[3]))


# ------------------------ conv + BN + ReLU (+ pool) layer ------------------- #

def _conv_layer(x_nhwc, w_hwio, b, gamma, beta, *, fuse_pool):
    n, h, w, cin = x_nhwc.shape
    cout = w_hwio.shape[-1]
    c_pad = _round_up(cout, LANE)
    k = 9 * cin
    k_pad = _round_up(k, LANE)
    m = n * h * w
    assert m % 8 == 0, "N*H*W must be a multiple of 8"

    # --- im2col in the wrapper (bf16 to halve HBM traffic and hit the bf16 MXU path) ---
    patches = _im2col_3x3(x_nhwc)                          # (N, H, W, 9*Cin)
    if fuse_pool:
        assert h % 2 == 0 and w % 2 == 0, "fused 2x2 max-pool needs even H and W"
        patches = _window_major(patches)                   # (M, K) window-plane-major rows
    else:
        patches = patches.reshape(m, k)
    patches = _pad_last(patches, k_pad).astype(jnp.bfloat16)

    w2d = _pad_last(w_hwio.reshape(k, cout), c_pad)
    w2d = jnp.pad(w2d, ((0, k_pad - k), (0, 0))).astype(jnp.bfloat16)
    b2d = _pad_last(b.reshape(1, cout), c_pad).astype(jnp.float32)

    # --- phase 1: tiled conv matmul + bias; per-tile BN partial sums ---
    tile_m = _pick_tile(m)
    num_tiles = m // tile_m
    cost = pl.CostEstimate(
        flops=2 * m * k_pad * c_pad,
        transcendentals=0,
        bytes_accessed=m * k_pad * 2 + k_pad * c_pad * 2 + m * c_pad * 4)

    y, ps, pq = pl.pallas_call(
        _conv_bias_kernel,
        grid=(num_tiles,),
        out_shape=(
            jax.ShapeDtypeStruct((m, c_pad), jnp.float32),
            jax.ShapeDtypeStruct((num_tiles * 8, c_pad), jnp.float32),
            jax.ShapeDtypeStruct((num_tiles * 8, c_pad), jnp.float32),
        ),
        in_specs=[
            pl.BlockSpec((tile_m, k_pad), lambda i: (i, 0)),
            pl.BlockSpec((k_pad, c_pad), lambda i: (0, 0)),
            pl.BlockSpec((1, c_pad), lambda i: (0, 0)),
        ],
        out_specs=[
            pl.BlockSpec((tile_m, c_pad), lambda i: (i, 0)),
            pl.BlockSpec((8, c_pad), lambda i: (i, 0)),
            pl.BlockSpec((8, c_pad), lambda i: (i, 0)),
        ],
        compiler_params=pltpu.CompilerParams(dimension_semantics=("parallel",)),
        cost_estimate=cost,
    )(patches, w2d, b2d)

    # --- global train-mode BN stats (biased variance), folded to (scale, shift) ---
    s1 = jnp.sum(ps, axis=0)                               # (Cp,)
    s2 = jnp.sum(pq, axis=0)
    mean = s1 / m
    var = jnp.maximum(s2 / m - mean * mean, 0.0)
    g_p = _pad_last(gamma.reshape(1, cout), c_pad)         # padded channels: gamma=0 -> output 0
    bt_p = _pad_last(beta.reshape(1, cout), c_pad)
    scale = (g_p * jax.lax.rsqrt(var + BN_EPS)).astype(jnp.float32)        # (1, Cp)
    shift = (bt_p - mean[None, :] * scale).astype(jnp.float32)             # (1, Cp)

    # --- phase 2: finalize BN + ReLU (+ fused 2x2 max-pool for conv_b) ---
    if not fuse_pool:
        act = pl.pallas_call(
            _bn_relu_kernel,
            grid=(num_tiles,),
            out_shape=jax.ShapeDtypeStruct((m, c_pad), jnp.float32),
            in_specs=[
                pl.BlockSpec((tile_m, c_pad), lambda i: (i, 0)),
                pl.BlockSpec((1, c_pad), lambda i: (0, 0)),
                pl.BlockSpec((1, c_pad), lambda i: (0, 0)),
            ],
            out_specs=pl.BlockSpec((tile_m, c_pad), lambda i: (i, 0)),
            compiler_params=pltpu.CompilerParams(dimension_semantics=("parallel",)),
        )(y, scale, shift)
        act = act.reshape(n, h, w, c_pad)[..., :cout]
        return act, None

    m2 = m // 4
    tile_m2 = _pick_tile(m2)
    num_tiles2 = m2 // tile_m2
    y3 = y.reshape(4, m2, c_pad)
    act4, pooled = pl.pallas_call(
        _bn_relu_pool_kernel,
        grid=(num_tiles2,),
        out_shape=(
            jax.ShapeDtypeStruct((4, m2, c_pad), jnp.float32),
            jax.ShapeDtypeStruct((m2, c_pad), jnp.float32),
        ),
        in_specs=[
            pl.BlockSpec((4, tile_m2, c_pad), lambda i: (0, i, 0)),
            pl.BlockSpec((1, c_pad), lambda i: (0, 0)),
            pl.BlockSpec((1, c_pad), lambda i: (0, 0)),
        ],
        out_specs=[
            pl.BlockSpec((4, tile_m2, c_pad), lambda i: (0, i, 0)),
            pl.BlockSpec((tile_m2, c_pad), lambda i: (i, 0)),
        ],
        compiler_params=pltpu.CompilerParams(dimension_semantics=("parallel",)),
    )(y3, scale, shift)

    act = _window_major_inverse(act4.reshape(m, c_pad), n, h, w, c_pad)[..., :cout]
    pooled = pooled.reshape(n, h // 2, w // 2, c_pad)[..., :cout]
    return act, pooled


# ------------------------------ module forward ------------------------------ #

def unet_conv_block_forward(x_nchw, params):
    """Returns (conv_a, conv_b, maxpool) in NCHW, matching the PyTorch module."""
    x = jnp.transpose(x_nchw, (0, 2, 3, 1))                # NCHW -> NHWC
    conv_a, _ = _conv_layer(x, params["w_a"], params["b_a"],
                            params["gamma_a"], params["beta_a"], fuse_pool=False)
    conv_b, pooled = _conv_layer(conv_a, params["w_b"], params["b_b"],
                                 params["gamma_b"], params["beta_b"], fuse_pool=True)
    to_nchw = lambda t: jnp.transpose(t, (0, 3, 1, 2))
    return to_nchw(conv_a), to_nchw(conv_b), to_nchw(pooled)


def init_params(key, in_channels, out_channels):
    k1, k2, k3, k4 = jax.random.split(key, 4)
    return {
        # conv weights stored as (kh, kw, cin, cout) (HWIO)
        "w_a": 0.1 * jax.random.normal(k1, (3, 3, in_channels, out_channels), jnp.float32),
        "b_a": 0.05 * jax.random.normal(k2, (out_channels,), jnp.float32),
        "gamma_a": jnp.ones((out_channels,), jnp.float32),   # BatchNorm2d default init
        "beta_a": jnp.zeros((out_channels,), jnp.float32),
        "w_b": 0.1 * jax.random.normal(k3, (3, 3, out_channels, out_channels), jnp.float32),
        "b_b": 0.05 * jax.random.normal(k4, (out_channels,), jnp.float32),
        "gamma_b": jnp.ones((out_channels,), jnp.float32),
        "beta_b": jnp.zeros((out_channels,), jnp.float32),
    }


# ------------------------------ pure-JAX reference -------------------------- #

def _ref_conv_bn_relu(x_nhwc, w_hwio, b, gamma, beta):
    y = jax.lax.conv_general_dilated(
        x_nhwc, w_hwio, window_strides=(1, 1), padding=((1, 1), (1, 1)),
        dimension_numbers=("NHWC", "HWIO", "NHWC"))
    y = y + b
    mean = jnp.mean(y, axis=(0, 1, 2), keepdims=True)
    var = jnp.mean((y - mean) ** 2, axis=(0, 1, 2), keepdims=True)
    y = (y - mean) * jax.lax.rsqrt(var + BN_EPS) * gamma + beta
    return jnp.maximum(y, 0.0)


def _ref_forward(x_nchw, params):
    x = jnp.transpose(x_nchw, (0, 2, 3, 1))
    a = _ref_conv_bn_relu(x, params["w_a"], params["b_a"], params["gamma_a"], params["beta_a"])
    bb = _ref_conv_bn_relu(a, params["w_b"], params["b_b"], params["gamma_b"], params["beta_b"])
    n, h, w, c = bb.shape
    p = jnp.max(bb.reshape(n, h // 2, 2, w // 2, 2, c), axis=(2, 4))
    to_nchw = lambda t: jnp.transpose(t, (0, 3, 1, 2))
    return to_nchw(a), to_nchw(bb), to_nchw(p)


# ---------------------------------- main ------------------------------------ #

if __name__ == "__main__":
    key = jax.random.PRNGKey(0)
    kx, kp = jax.random.split(key)

    N, CIN, COUT, H, W = 2, 4, 8, 32, 32
    x = jax.random.normal(kx, (N, CIN, H, W), jnp.float32)
    params = init_params(kp, CIN, COUT)

    fwd = jax.jit(unet_conv_block_forward)
    conv_a, conv_b, pooled = fwd(x, params)
    jax.block_until_ready((conv_a, conv_b, pooled))

    assert conv_a.shape == (N, COUT, H, W)
    assert conv_b.shape == (N, COUT, H, W)
    assert pooled.shape == (N, COUT, H // 2, W // 2)

    ra, rb, rp = jax.jit(_ref_forward)(x, params)
    jax.block_until_ready((ra, rb, rp))
    # bf16 MXU operands vs. f32 reference -> loose-ish tolerance.
    assert jnp.allclose(conv_a, ra, atol=5e-2, rtol=5e-2)
    assert jnp.allclose(conv_b, rb, atol=5e-2, rtol=5e-2)
    assert jnp.allclose(pooled, rp, atol=5e-2, rtol=5e-2)

    print("KERNEL_OK")
</pallas_src>

<mosaic_0001>
module attributes {stable_mosaic.version = 11 : i64} {
  func.func @_conv_bias_kernel(%arg0: i32, %arg1: memref<1024x128xbf16, #tpu.memory_space<vmem>>, %arg2: memref<128x128xbf16, #tpu.memory_space<vmem>>, %arg3: memref<1x128xf32, #tpu.memory_space<vmem>>, %arg4: memref<1024x128xf32, #tpu.memory_space<vmem>>, %arg5: memref<8x128xf32, #tpu.memory_space<vmem>>, %arg6: memref<8x128xf32, #tpu.memory_space<vmem>>) attributes {dimension_semantics = [#tpu.dimension_semantics<parallel>], iteration_bounds = array<i64: 2>, scalar_prefetch = 0 : i64, scratch_operands = 0 : i64, tpu.core_type = #tpu.core_type<tc>, window_params = [{transform_indices = @transform_0, window_bounds = array<i64: 1024, 128>}, {pipeline_mode = #tpu.pipeline_mode<synchronous>, transform_indices = @transform_1, window_bounds = array<i64: 128, 128>}, {pipeline_mode = #tpu.pipeline_mode<synchronous>, transform_indices = @transform_2, window_bounds = array<i64: 1, 128>}, {transform_indices = @transform_3, window_bounds = array<i64: 1024, 128>}, {transform_indices = @transform_4, window_bounds = array<i64: 8, 128>}, {transform_indices = @transform_5, window_bounds = array<i64: 8, 128>}]} {
    %c0 = arith.constant 0 : index
    %c0_0 = arith.constant 0 : index
    %0 = vector.load %arg1[%c0, %c0_0] : memref<1024x128xbf16, #tpu.memory_space<vmem>>, vector<1024x128xbf16>
    %c0_1 = arith.constant 0 : index
    %c0_2 = arith.constant 0 : index
    %1 = vector.load %arg2[%c0_1, %c0_2] : memref<128x128xbf16, #tpu.memory_space<vmem>>, vector<128x128xbf16>
    %cst = arith.constant dense<0.000000e+00> : vector<1024x128xf32>
    %2 = tpu.matmul %0, %1, %cst {dimension_numbers = #tpu.dot_dimension_numbers<[1], [0], [0], [1], [0, 0, 1, 1], [], []>} : vector<1024x128xbf16>, vector<128x128xbf16>, vector<1024x128xf32> -> vector<1024x128xf32>
    %c0_3 = arith.constant 0 : index
    %c0_4 = arith.constant 0 : index
    %3 = vector.load %arg3[%c0_3, %c0_4] : memref<1x128xf32, #tpu.memory_space<vmem>>, vector<1x128xf32>
    %4 = vector.broadcast %3 : vector<1x128xf32> to vector<1024x128xf32>
    %5 = arith.addf %2, %4 : vector<1024x128xf32>
    %c0_5 = arith.constant 0 : index
    %c0_6 = arith.constant 0 : index
    %6 = vector.load %arg4[%c0_5, %c0_6] : memref<1024x128xf32, #tpu.memory_space<vmem>>, vector<1024x128xf32>
    tpu.vector_store %arg4[%c0_5, %c0_6], %5 {strides = array<i32>} : memref<1024x128xf32, #tpu.memory_space<vmem>>, vector<1024x128xf32>,
    %7 = vector.shape_cast %5 : vector<1024x128xf32> to vector<128x8x128xf32>
    %cst_7 = arith.constant dense<0.000000e+00> : vector<8x128xf32>
    %8 = vector.multi_reduction <add>, %7, %cst_7 [0] : vector<128x8x128xf32> to vector<8x128xf32>
    %c0_8 = arith.constant 0 : index
    %c0_9 = arith.constant 0 : index
    %9 = vector.load %arg5[%c0_8, %c0_9] : memref<8x128xf32, #tpu.memory_space<vmem>>, vector<8x128xf32>
    tpu.vector_store %arg5[%c0_8, %c0_9], %8 {strides = array<i32>} : memref<8x128xf32, #tpu.memory_space<vmem>>, vector<8x128xf32>,
    %10 = arith.mulf %7, %7 : vector<128x8x128xf32>
    %cst_10 = arith.constant dense<0.000000e+00> : vector<8x128xf32>
    %11 = vector.multi_reduction <add>, %10, %cst_10 [0] : vector<128x8x128xf32> to vector<8x128xf32>
    %c0_11 = arith.constant 0 : index
    %c0_12 = arith.constant 0 : index
    %12 = vector.load %arg6[%c0_11, %c0_12] : memref<8x128xf32, #tpu.memory_space<vmem>>, vector<8x128xf32>
    tpu.vector_store %arg6[%c0_11, %c0_12], %11 {strides = array<i32>} : memref<8x128xf32, #tpu.memory_space<vmem>>, vector<8x128xf32>,
    return
  }
  func.func @transform_0(%arg0: i32) -> (i32, i32) {
    %c0_i32 = arith.constant 0 : i32
    %c0_i32_0 = arith.constant 0 : i32
    return %arg0, %c0_i32 : i32, i32
  }
  func.func @transform_1(%arg0: i32) -> (i32, i32) {
    %c0_i32 = arith.constant 0 : i32
    %c0_i32_0 = arith.constant 0 : i32
    %c0_i32_1 = arith.constant 0 : i32
    return %c0_i32, %c0_i32_0 : i32, i32
  }
  func.func @transform_2(%arg0: i32) -> (i32, i32) {
    %c0_i32 = arith.constant 0 : i32
    %c0_i32_0 = arith.constant 0 : i32
    %c0_i32_1 = arith.constant 0 : i32
    return %c0_i32, %c0_i32_0 : i32, i32
  }
  func.func @transform_3(%arg0: i32) -> (i32, i32) {
    %c0_i32 = arith.constant 0 : i32
    %c0_i32_0 = arith.constant 0 : i32
    return %arg0, %c0_i32 : i32, i32
  }
  func.func @transform_4(%arg0: i32) -> (i32, i32) {
    %c0_i32 = arith.constant 0 : i32
    %c0_i32_0 = arith.constant 0 : i32
    return %arg0, %c0_i32 : i32, i32
  }
  func.func @transform_5(%arg0: i32) -> (i32, i32) {
    %c0_i32 = arith.constant 0 : i32
    %c0_i32_0 = arith.constant 0 : i32
    return %arg0, %c0_i32 : i32, i32
  }
}

module attributes {stable_mosaic.version = 11 : i64} {
  func.func @_bn_relu_kernel(%arg0: i32, %arg1: memref<1024x128xf32, #tpu.memory_space<vmem>>, %arg2: memref<1x128xf32, #tpu.memory_space<vmem>>, %arg3: memref<1x128xf32, #tpu.memory_space<vmem>>, %arg4: memref<1024x128xf32, #tpu.memory_space<vmem>>) attributes {dimension_semantics = [#tpu.dimension_semantics<parallel>], iteration_bounds = array<i64: 2>, scalar_prefetch = 0 : i64, scratch_operands = 0 : i64, tpu.core_type = #tpu.core_type<tc>, window_params = [{transform_indices = @transform_0, window_bounds = array<i64: 1024, 128>}, {pipeline_mode = #tpu.pipeline_mode<synchronous>, transform_indices = @transform_1, window_bounds = array<i64: 1, 128>}, {pipeline_mode = #tpu.pipeline_mode<synchronous>, transform_indices = @transform_2, window_bounds = array<i64: 1, 128>}, {transform_indices = @transform_3, window_bounds = array<i64: 1024, 128>}]} {
    %c0 = arith.constant 0 : index
    %c0_0 = arith.constant 0 : index
    %0 = vector.load %arg1[%c0, %c0_0] : memref<1024x128xf32, #tpu.memory_space<vmem>>, vector<1024x128xf32>
    %c0_1 = arith.constant 0 : index
    %c0_2 = arith.constant 0 : index
    %1 = vector.load %arg2[%c0_1, %c0_2] : memref<1x128xf32, #tpu.memory_space<vmem>>, vector<1x128xf32>
    %2 = vector.broadcast %1 : vector<1x128xf32> to vector<1024x128xf32>
    %3 = arith.mulf %0, %2 : vector<1024x128xf32>
    %c0_3 = arith.constant 0 : index
    %c0_4 = arith.constant 0 : index
    %4 = vector.load %arg3[%c0_3, %c0_4] : memref<1x128xf32, #tpu.memory_space<vmem>>, vector<1x128xf32>
    %5 = vector.broadcast %4 : vector<1x128xf32> to vector<1024x128xf32>
    %6 = arith.addf %3, %5 : vector<1024x128xf32>
    %cst = arith.constant 0.000000e+00 : f32
    %7 = vector.broadcast %cst : f32 to vector<1024x128xf32>
    %8 = arith.maximumf %6, %7 : vector<1024x128xf32>
    %c0_5 = arith.constant 0 : index
    %c0_6 = arith.constant 0 : index
    %9 = vector.load %arg4[%c0_5, %c0_6] : memref<1024x128xf32, #tpu.memory_space<vmem>>, vector<1024x128xf32>
    tpu.vector_store %arg4[%c0_5, %c0_6], %8 {strides = array<i32>} : memref<1024x128xf32, #tpu.memory_space<vmem>>, vector<1024x128xf32>,
    return
  }
  func.func @transform_0(%arg0: i32) -> (i32, i32) {
    %c0_i32 = arith.constant 0 : i32
    %c0_i32_0 = arith.constant 0 : i32
    return %arg0, %c0_i32 : i32, i32
  }
  func.func @transform_1(%arg0: i32) -> (i32, i32) {
    %c0_i32 = arith.constant 0 : i32
    %c0_i32_0 = arith.constant 0 : i32
    %c0_i32_1 = arith.constant 0 : i32
    return %c0_i32, %c0_i32_0 : i32, i32
  }
  func.func @transform_2(%arg0: i32) -> (i32, i32) {
    %c0_i32 = arith.constant 0 : i32
    %c0_i32_0 = arith.constant 0 : i32
    %c0_i32_1 = arith.constant 0 : i32
    return %c0_i32, %c0_i32_0 : i32, i32
  }
  func.func @transform_3(%arg0: i32) -> (i32, i32) {
    %c0_i32 = arith.constant 0 : i32
    %c0_i32_0 = arith.constant 0 : i32
    return %arg0, %c0_i32 : i32, i32
  }
}

module attributes {stable_mosaic.version = 11 : i64} {
  func.func @_bn_relu_pool_kernel(%arg0: i32, %arg1: memref<4x512x128xf32, #tpu.memory_space<vmem>>, %arg2: memref<1x128xf32, #tpu.memory_space<vmem>>, %arg3: memref<1x128xf32, #tpu.memory_space<vmem>>, %arg4: memref<4x512x128xf32, #tpu.memory_space<vmem>>, %arg5: memref<512x128xf32, #tpu.memory_space<vmem>>) attributes {dimension_semantics = [#tpu.dimension_semantics<parallel>], iteration_bounds = array<i64: 1>, scalar_prefetch = 0 : i64, scratch_operands = 0 : i64, tpu.core_type = #tpu.core_type<tc>, window_params = [{transform_indices = @transform_0, window_bounds = array<i64: 4, 512, 128>}, {pipeline_mode = #tpu.pipeline_mode<synchronous>, transform_indices = @transform_1, window_bounds = array<i64: 1, 128>}, {pipeline_mode = #tpu.pipeline_mode<synchronous>, transform_indices = @transform_2, window_bounds = array<i64: 1, 128>}, {transform_indices = @transform_3, window_bounds = array<i64: 4, 512, 128>}, {transform_indices = @transform_4, window_bounds = array<i64: 512, 128>}]} {
    %c0 = arith.constant 0 : index
    %c0_0 = arith.constant 0 : index
    %c0_1 = arith.constant 0 : index
    %0 = vector.load %arg1[%c0, %c0_0, %c0_1] : memref<4x512x128xf32, #tpu.memory_space<vmem>>, vector<4x512x128xf32>
    %c0_2 = arith.constant 0 : index
    %c0_3 = arith.constant 0 : index
    %1 = vector.load %arg2[%c0_2, %c0_3] : memref<1x128xf32, #tpu.memory_space<vmem>>, vector<1x128xf32>
    %2 = vector.shape_cast %1 : vector<1x128xf32> to vector<1x1x128xf32>
    %3 = vector.broadcast %2 : vector<1x1x128xf32> to vector<4x512x128xf32>
    %4 = arith.mulf %0, %3 : vector<4x512x128xf32>
    %c0_4 = arith.constant 0 : index
    %c0_5 = arith.constant 0 : index
    %5 = vector.load %arg3[%c0_4, %c0_5] : memref<1x128xf32, #tpu.memory_space<vmem>>, vector<1x128xf32>
    %6 = vector.shape_cast %5 : vector<1x128xf32> to vector<1x1x128xf32>
    %7 = vector.broadcast %6 : vector<1x1x128xf32> to vector<4x512x128xf32>
    %8 = arith.addf %4, %7 : vector<4x512x128xf32>
    %cst = arith.constant 0.000000e+00 : f32
    %9 = vector.broadcast %cst : f32 to vector<4x512x128xf32>
    %10 = arith.maximumf %8, %9 : vector<4x512x128xf32>
    %c0_6 = arith.constant 0 : index
    %c0_7 = arith.constant 0 : index
    %c0_8 = arith.constant 0 : index
    %11 = vector.load %arg4[%c0_6, %c0_7, %c0_8] : memref<4x512x128xf32, #tpu.memory_space<vmem>>, vector<4x512x128xf32>
    tpu.vector_store %arg4[%c0_6, %c0_7, %c0_8], %10 {strides = array<i32>} : memref<4x512x128xf32, #tpu.memory_space<vmem>>, vector<4x512x128xf32>,
    %12 = vector.extract_strided_slice %10 {offsets = [0, 0, 0], sizes = [1, 512, 128], strides = [1, 1, 1]} : vector<4x512x128xf32> to vector<1x512x128xf32>
    %13 = vector.shape_cast %12 : vector<1x512x128xf32> to vector<512x128xf32>
    %14 = vector.extract_strided_slice %10 {offsets = [1, 0, 0], sizes = [1, 512, 128], strides = [1, 1, 1]} : vector<4x512x128xf32> to vector<1x512x128xf32>
    %15 = vector.shape_cast %14 : vector<1x512x128xf32> to vector<512x128xf32>
    %16 = arith.maximumf %13, %15 : vector<512x128xf32>
    %17 = vector.extract_strided_slice %10 {offsets = [2, 0, 0], sizes = [1, 512, 128], strides = [1, 1, 1]} : vector<4x512x128xf32> to vector<1x512x128xf32>
    %18 = vector.shape_cast %17 : vector<1x512x128xf32> to vector<512x128xf32>
    %19 = vector.extract_strided_slice %10 {offsets = [3, 0, 0], sizes = [1, 512, 128], strides = [1, 1, 1]} : vector<4x512x128xf32> to vector<1x512x128xf32>
    %20 = vector.shape_cast %19 : vector<1x512x128xf32> to vector<512x128xf32>
    %21 = arith.maximumf %18, %20 : vector<512x128xf32>
    %22 = arith.maximumf %16, %21 : vector<512x128xf32>
    %c0_9 = arith.constant 0 : index
    %c0_10 = arith.constant 0 : index
    %23 = vector.load %arg5[%c0_9, %c0_10] : memref<512x128xf32, #tpu.memory_space<vmem>>, vector<512x128xf32>
    tpu.vector_store %arg5[%c0_9, %c0_10], %22 {strides = array<i32>} : memref<512x128xf32, #tpu.memory_space<vmem>>, vector<512x128xf32>,
    return
  }
  func.func @transform_0(%arg0: i32) -> (i32, i32, i32) {
    %c0_i32 = arith.constant 0 : i32
    %c0_i32_0 = arith.constant 0 : i32
    %c0_i32_1 = arith.constant 0 : i32
    return %c0_i32, %arg0, %c0_i32_0 : i32, i32, i32
  }
  func.func @transform_1(%arg0: i32) -> (i32, i32) {
    %c0_i32 = arith.constant 0 : i32
    %c0_i32_0 = arith.constant 0 : i32
    %c0_i32_1 = arith.constant 0 : i32
    return %c0_i32, %c0_i32_0 : i32, i32
  }
  func.func @transform_2(%arg0: i32) -> (i32, i32) {
    %c0_i32 = arith.constant 0 : i32
    %c0_i32_0 = arith.constant 0 : i32
    %c0_i32_1 = arith.constant 0 : i32
    return %c0_i32, %c0_i32_0 : i32, i32
  }
  func.func @transform_3(%arg0: i32) -> (i32, i32, i32) {
    %c0_i32 = arith.constant 0 : i32
    %c0_i32_0 = arith.constant 0 : i32
    %c0_i32_1 = arith.constant 0 : i32
    return %c0_i32, %arg0, %c0_i32_0 : i32, i32, i32
  }
  func.func @transform_4(%arg0: i32) -> (i32, i32) {
    %c0_i32 = arith.constant 0 : i32
    %c0_i32_0 = arith.constant 0 : i32
    return %arg0, %c0_i32 : i32, i32
  }
}

</mosaic_0001>

<bundles_post_ra>
// kernel: unet_conv_block_forward.5
= control target key start
LH: loop header
LB: loop body
LE: loop exit
PB: predicated region body
PF: predicated region fallthrough
CT: control target
= control target key end

     0   :  { %s929_s12 = smov 0   ;;  %s1482_s0 = inlined_call_operand.vmem [shape: f32[2048,128], index: 0, kind: input, shape index: {}]   ;;  %s1483_s1 = inlined_call_operand.vmem [shape: f32[1,128], index: 1, kind: input, shape index: {}]   ;;  %s1484_s2 = inlined_call_operand.vmem [shape: f32[1,128], index: 2, kind: input, shape index: {}]   ;;  %s1485_s3 = inlined_call_operand.vmem [shape: f32[2048,128], index: 3, kind: output, shape index: {}]  }
   0x1 LB: > { %s878_s13 = sadd.s32 4294967295, %s907_s12   ;;  %p882_p0 = scmp.ge.s32.totalorder %s907_s12, 1  ;;  %s907_s12 = sphi %s929_s12, %s13_s12  }
   0x2   : > { %p138_p1 = scmp.lt.s32.totalorder %s907_s12, 3 }
   0x4   : > { %p139_p2 = pnand %p882_p0, %p138_p1 }
   0x5   : > { %s883_s14 = sshll.u32 (!%p139_p2), %s878_s13, 7 }
   0x6   : > { %142 = sbr.rel (%p139_p2) target bundleno = 149 (0x95), region = 32  ;;  %p163_p3 = scmp.lt.s32.totalorder (!%p139_p2), %s883_s14, 255 }
   0xb   : > { %s1487_s14 = smov (!%p163_p3, %s883_s14), 255  ;;  %v940_v0 = vld [vmem:[%s1483_s1] ss:$0 sm:$0xff] }
   0xc   : > { %s884_s17 = sshll.u32 %s1487_s14, 3  ;;  %v950_v1 = vld [vmem:[%s1484_s2] ss:$0 sm:$0xff] }
   0xd   : > { %s945_s20 = scalar_lea.vmem %s1482_s0, %s884_s17  ;;  %s973_s25 = scalar_lea.vmem %s1485_s3, %s884_s17 }
   0xe   : > { %v174_v2 = vld [vmem:[%s945_s20] sm:$0xff]  ;;  %v175_v3 = vld [vmem:[%s945_s20 + $0x8] sm:$0xff]  ;;  %v176_v4 = vld [vmem:[%s945_s20 + $0x10] sm:$0xff] }
   0xf   : > { %v306_v5 = vmul.f32 %v940_v0, %v174_v2  ;;  %v307_v6 = vmul.f32 %v940_v0, %v175_v3  ;;  %v308_v7 = vmul.f32 %v940_v0, %v176_v4  ;;  %v177_v8 = vld [vmem:[%s945_s20 + $0x18] sm:$0xff]  ;;  %v178_v9 = vld [vmem:[%s945_s20 + $0x20] sm:$0xff]  ;;  %v179_v10 = vld [vmem:[%s945_s20 + $0x28] sm:$0xff] }
  0x10   : > { %v309_v11 = vmul.f32 %v940_v0, %v177_v8  ;;  %v310_v12 = vmul.f32 %v940_v0, %v178_v9  ;;  %v311_v13 = vmul.f32 %v940_v0, %v179_v10  ;;  %v180_v14 = vld [vmem:[%s945_s20 + $0x30] sm:$0xff]  ;;  %v181_v15 = vld [vmem:[%s945_s20 + $0x38] sm:$0xff]  ;;  %v182_v24 = vld [vmem:[%s945_s20 + $0x40] sm:$0xff] }
  0x11   : > { %v438_v16 = vadd.f32 %v950_v1, %v306_v5  ;;  %v439_v17 = vadd.f32 %v950_v1, %v307_v6  ;;  %v440_v18 = vadd.f32 %v950_v1, %v308_v7  ;;  %v312_v19 = vmul.f32 %v940_v0, %v180_v14  ;;  %v183_v25 = vld [vmem:[%s945_s20 + $0x48] sm:$0xff]  ;;  %v184_v26 = vld [vmem:[%s945_s20 + $0x50] sm:$0xff]  ;;  %v185_v31 = vld [vmem:[%s945_s20 + $0x58] sm:$0xff] }
  0x12   : > { %v441_v20 = vadd.f32 %v950_v1, %v309_v11  ;;  %v442_v21 = vadd.f32 %v950_v1, %v310_v12  ;;  %v443_v22 = vadd.f32 %v950_v1, %v311_v13  ;;  %v313_v23 = vmul.f32 %v940_v0, %v181_v15  ;;  %v186_v32 = vld [vmem:[%s945_s20 + $0x60] sm:$0xff]  ;;  %v187_v33 = vld [vmem:[%s945_s20 + $0x68] sm:$0xff]  ;;  %v188_v37 = vld [vmem:[%s945_s20 + $0x70] sm:$0xff] }
  0x13   : > { %v566_v27 = vmax.f32 %v438_v16, 0.0  ;;  %v567_v28 = vmax.f32 %v439_v17, 0.0  ;;  %v568_v29 = vmax.f32 %v440_v18, 0.0  ;;  %v444_v30 = vadd.f32 %v950_v1, %v312_v19  ;;  %v189_v42 = vld [vmem:[%s945_s20 + $0x78] sm:$0xff]  ;;  %v190_v54 = vld [vmem:[%s945_s20 + $0x80] sm:$0xff]  ;;  %v191_v55 = vld [vmem:[%s945_s20 + $0x88] sm:$0xff] }
  0x14   : > { %v569_v34 = vmax.f32 %v441_v20, 0.0  ;;  %v570_v35 = vmax.f32 %v442_v21, 0.0  ;;  %v445_v36 = vadd.f32 %v950_v1, %v313_v23  ;;  %v571_v38 = vmax.f32 %v443_v22, 0.0  ;;  %v192_v56 = vld [vmem:[%s945_s20 + $0x90] sm:$0xff]  ;;  %v193_v59 = vld [vmem:[%s945_s20 + $0x98] sm:$0xff]  ;;  %v194_v63 = vld [vmem:[%s945_s20 + $0xa0] sm:$0xff] }
  0x15   : > { %694 = vst [vmem:[%s973_s25] sm:$0xff] %v566_v27  ;;  %v314_v39 = vmul.f32 %v940_v0, %v182_v24  ;;  %v315_v40 = vmul.f32 %v940_v0, %v183_v25  ;;  %v316_v41 = vmul.f32 %v940_v0, %v184_v26  ;;  %v572_v43 = vmax.f32 %v444_v30, 0.0  ;;  %v195_v6 = vld [vmem:[%s945_s20 + $0xa8] sm:$0xff]  ;;  %v196_v10 = vld [vmem:[%s945_s20 + $0xb0] sm:$0xff]  ;;  %v197_v14 = vld [vmem:[%s945_s20 + $0xb8] sm:$0xff] }
  0x16   : > { %695 = vst [vmem:[%s973_s25 + $0x8] sm:$0xff] %v567_v28  ;;  %v317_v44 = vmul.f32 %v940_v0, %v185_v31  ;;  %v318_v45 = vmul.f32 %v940_v0, %v186_v32  ;;  %v319_v46 = vmul.f32 %v940_v0, %v187_v33  ;;  %v320_v50 = vmul.f32 %v940_v0, %v188_v37  ;;  %v198_v18 = vld [vmem:[%s945_s20 + $0xc0] sm:$0xff]  ;;  %v199_v22 = vld [vmem:[%s945_s20 + $0xc8] sm:$0xff]  ;;  %v200_v26 = vld [vmem:[%s945_s20 + $0xd0] sm:$0xff] }
  0x17   : > { %696 = vst [vmem:[%s973_s25 + $0x10] sm:$0xff] %v568_v29  ;;  %v446_v47 = vadd.f32 %v950_v1, %v314_v39  ;;  %v447_v48 = vadd.f32 %v950_v1, %v315_v40  ;;  %v448_v49 = vadd.f32 %v950_v1, %v316_v41  ;;  %v573_v51 = vmax.f32 %v445_v36, 0.0  ;;  %v201_v30 = vld [vmem:[%s945_s20 + $0xd8] sm:$0xff] }
  0x18   : > { %697 = vst [vmem:[%s973_s25 + $0x18] sm:$0xff] %v569_v34  ;;  %v449_v52 = vadd.f32 %v950_v1, %v317_v44  ;;  %v321_v53 = vmul.f32 %v940_v0, %v189_v42  ;;  %v450_v58 = vadd.f32 %v950_v1, %v318_v45  ;;  %v451_v62 = vadd.f32 %v950_v1, %v319_v46  ;;  %v202_v34 = vld [vmem:[%s945_s20 + $0xe0] sm:$0xff]  ;;  %v204_v42 = vld [vmem:[%s945_s20 + $0xf0] sm:$0xff]  ;;  %v205_v46 = vld [vmem:[%s945_s20 + $0xf8] sm:$0xff] }
  0x19   : > { %698 = vst [vmem:[%s973_s25 + $0x20] sm:$0xff] %v570_v35  ;;  %v574_v57 = vmax.f32 %v446_v47, 0.0  ;;  %v575_v60 = vmax.f32 %v447_v48, 0.0  ;;  %v576_v61 = vmax.f32 %v448_v49, 0.0  ;;  %v452_v2 = vadd.f32 %v950_v1, %v320_v50  ;;  %v206_v50 = vld [vmem:[%s945_s20 + $0x100] sm:$0xff] }
  0x1a   : > { %699 = vst [vmem:[%s973_s25 + $0x28] sm:$0xff] %v571_v38  ;;  %v322_v3 = vmul.f32 %v940_v0, %v190_v54  ;;  %v323_v4 = vmul.f32 %v940_v0, %v191_v55  ;;  %v324_v5 = vmul.f32 %v940_v0, %v192_v56  ;;  %v577_v7 = vmax.f32 %v449_v52, 0.0  ;;  %v203_v38 = vld [vmem:[%s945_s20 + $0xe8] sm:$0xff] }
  0x1b   : > { %700 = vst [vmem:[%s973_s25 + $0x30] sm:$0xff] %v572_v43  ;;  %v453_v8 = vadd.f32 %v950_v1, %v321_v53  ;;  %v325_v9 = vmul.f32 %v940_v0, %v193_v59  ;;  %v578_v11 = vmax.f32 %v450_v58, 0.0  ;;  %v326_v13 = vmul.f32 %v940_v0, %v194_v63  ;;  %v207_v54 = vld [vmem:[%s945_s20 + $0x108] sm:$0xff]  ;;  %v208_v58 = vld [vmem:[%s945_s20 + $0x110] sm:$0xff] }
  0x1c   : > { %701 = vst [vmem:[%s973_s25 + $0x38] sm:$0xff] %v573_v51  ;;  %v454_v12 = vadd.f32 %v950_v1, %v322_v3  ;;  %v579_v15 = vmax.f32 %v451_v62, 0.0  ;;  %v455_v16 = vadd.f32 %v950_v1, %v323_v4  ;;  %v327_v17 = vmul.f32 %v940_v0, %v195_v6  ;;  %v209_v62 = vld [vmem:[%s945_s20 + $0x118] sm:$0xff]  ;;  %v210_v4 = vld [vmem:[%s945_s20 + $0x120] sm:$0xff] }
  0x1d   : > { %702 = vst [vmem:[%s973_s25 + $0x40] sm:$0xff] %v574_v57  ;;  %v580_v19 = vmax.f32 %v452_v2, 0.0  ;;  %v456_v20 = vadd.f32 %v950_v1, %v324_v5  ;;  %v328_v21 = vmul.f32 %v940_v0, %v196_v10  ;;  %v581_v23 = vmax.f32 %v453_v8, 0.0  ;;  %v211_v8 = vld [vmem:[%s945_s20 + $0x128] sm:$0xff] }
  0x1e   : > { %703 = vst [vmem:[%s973_s25 + $0x48] sm:$0xff] %v575_v60  ;;  %v457_v24 = vadd.f32 %v950_v1, %v325_v9  ;;  %v329_v25 = vmul.f32 %v940_v0, %v197_v14  ;;  %v582_v27 = vmax.f32 %v454_v12, 0.0  ;;  %v458_v28 = vadd.f32 %v950_v1, %v326_v13  ;;  %v212_v12 = vld [vmem:[%s945_s20 + $0x130] sm:$0xff] }
  0x1f   : > { %704 = vst [vmem:[%s973_s25 + $0x50] sm:$0xff] %v576_v61  ;;  %v330_v29 = vmul.f32 %v940_v0, %v198_v18  ;;  %v583_v31 = vmax.f32 %v455_v16, 0.0  ;;  %v459_v32 = vadd.f32 %v950_v1, %v327_v17  ;;  %v331_v33 = vmul.f32 %v940_v0, %v199_v22  ;;  %v213_v16 = vld [vmem:[%s945_s20 + $0x138] sm:$0xff] }
  0x20   : > { %705 = vst [vmem:[%s973_s25 + $0x58] sm:$0xff] %v577_v7  ;;  %v584_v35 = vmax.f32 %v456_v20, 0.0  ;;  %v460_v36 = vadd.f32 %v950_v1, %v328_v21  ;;  %v332_v37 = vmul.f32 %v940_v0, %v200_v26  ;;  %v585_v39 = vmax.f32 %v457_v24, 0.0  ;;  %v214_v20 = vld [vmem:[%s945_s20 + $0x140] sm:$0xff]  ;;  %v215_v24 = vld [vmem:[%s945_s20 + $0x148] sm:$0xff] }
  0x21   : > { %706 = vst [vmem:[%s973_s25 + $0x60] sm:$0xff] %v578_v11  ;;  %v461_v40 = vadd.f32 %v950_v1, %v329_v25  ;;  %v333_v41 = vmul.f32 %v940_v0, %v201_v30  ;;  %v586_v43 = vmax.f32 %v458_v28, 0.0  ;;  %v462_v44 = vadd.f32 %v950_v1, %v330_v29  ;;  %v216_v28 = vld [vmem:[%s945_s20 + $0x150] sm:$0xff] }
  0x22   : > { %707 = vst [vmem:[%s973_s25 + $0x68] sm:$0xff] %v579_v15  ;;  %v334_v45 = vmul.f32 %v940_v0, %v202_v34  ;;  %v587_v47 = vmax.f32 %v459_v32, 0.0  ;;  %v463_v48 = vadd.f32 %v950_v1, %v331_v33  ;;  %v335_v49 = vmul.f32 %v940_v0, %v203_v38  ;;  %v217_v32 = vld [vmem:[%s945_s20 + $0x158] sm:$0xff] }
  0x23   : > { %708 = vst [vmem:[%s973_s25 + $0x70] sm:$0xff] %v580_v19  ;;  %v588_v51 = vmax.f32 %v460_v36, 0.0  ;;  %v464_v52 = vadd.f32 %v950_v1, %v332_v37  ;;  %v336_v53 = vmul.f32 %v940_v0, %v204_v42  ;;  %v589_v55 = vmax.f32 %v461_v40, 0.0  ;;  %v218_v36 = vld [vmem:[%s945_s20 + $0x160] sm:$0xff]  ;;  %v219_v40 = vld [vmem:[%s945_s20 + $0x168] sm:$0xff] }
  0x24   : > { %709 = vst [vmem:[%s973_s25 + $0x78] sm:$0xff] %v581_v23  ;;  %v465_v56 = vadd.f32 %v950_v1, %v333_v41  ;;  %v337_v57 = vmul.f32 %v940_v0, %v205_v46  ;;  %v590_v59 = vmax.f32 %v462_v44, 0.0  ;;  %v466_v60 = vadd.f32 %v950_v1, %v334_v45  ;;  %v220_v44 = vld [vmem:[%s945_s20 + $0x170] sm:$0xff] }
  0x25   : > { %710 = vst [vmem:[%s973_s25 + $0x80] sm:$0xff] %v582_v27  ;;  %v338_v61 = vmul.f32 %v940_v0, %v206_v50  ;;  %v591_v63 = vmax.f32 %v463_v48, 0.0  ;;  %v467_v2 = vadd.f32 %v950_v1, %v335_v49  ;;  %v339_v3 = vmul.f32 %v940_v0, %v207_v54  ;;  %v221_v48 = vld [vmem:[%s945_s20 + $0x178] sm:$0xff] }
  0x26   : > { %711 = vst [vmem:[%s973_s25 + $0x88] sm:$0xff] %v583_v31  ;;  %v592_v5 = vmax.f32 %v464_v52, 0.0  ;;  %v468_v6 = vadd.f32 %v950_v1, %v336_v53  ;;  %v340_v7 = vmul.f32 %v940_v0, %v208_v58  ;;  %v593_v9 = vmax.f32 %v465_v56, 0.0  ;;  %v222_v52 = vld [vmem:[%s945_s20 + $0x180] sm:$0xff]  ;;  %v223_v56 = vld [vmem:[%s945_s20 + $0x188] sm:$0xff] }
  0x27   : > { %712 = vst [vmem:[%s973_s25 + $0x90] sm:$0xff] %v584_v35  ;;  %v469_v10 = vadd.f32 %v950_v1, %v337_v57  ;;  %v341_v11 = vmul.f32 %v940_v0, %v209_v62  ;;  %v594_v13 = vmax.f32 %v466_v60, 0.0  ;;  %v470_v14 = vadd.f32 %v950_v1, %v338_v61  ;;  %v224_v60 = vld [vmem:[%s945_s20 + $0x190] sm:$0xff] }
  0x28   : > { %713 = vst [vmem:[%s973_s25 + $0x98] sm:$0xff] %v585_v39  ;;  %v342_v15 = vmul.f32 %v940_v0, %v210_v4  ;;  %v595_v17 = vmax.f32 %v467_v2, 0.0  ;;  %v471_v18 = vadd.f32 %v950_v1, %v339_v3  ;;  %v343_v19 = vmul.f32 %v940_v0, %v211_v8  ;;  %v225_v2 = vld [vmem:[%s945_s20 + $0x198] sm:$0xff] }
  0x29   : > { %714 = vst [vmem:[%s973_s25 + $0xa0] sm:$0xff] %v586_v43  ;;  %v596_v21 = vmax.f32 %v468_v6, 0.0  ;;  %v472_v22 = vadd.f32 %v950_v1, %v340_v7  ;;  %v344_v23 = vmul.f32 %v940_v0, %v212_v12  ;;  %v597_v25 = vmax.f32 %v469_v10, 0.0  ;;  %v226_v6 = vld [vmem:[%s945_s20 + $0x1a0] sm:$0xff]  ;;  %v227_v10 = vld [vmem:[%s945_s20 + $0x1a8] sm:$0xff] }
  0x2a   : > { %715 = vst [vmem:[%s973_s25 + $0xa8] sm:$0xff] %v587_v47  ;;  %v473_v26 = vadd.f32 %v950_v1, %v341_v11  ;;  %v345_v27 = vmul.f32 %v940_v0, %v213_v16  ;;  %v598_v29 = vmax.f32 %v470_v14, 0.0  ;;  %v474_v30 = vadd.f32 %v950_v1, %v342_v15  ;;  %v228_v14 = vld [vmem:[%s945_s20 + $0x1b0] sm:$0xff] }
  0x2b   : > { %716 = vst [vmem:[%s973_s25 + $0xb0] sm:$0xff] %v588_v51  ;;  %v346_v31 = vmul.f32 %v940_v0, %v214_v20  ;;  %v599_v33 = vmax.f32 %v471_v18, 0.0  ;;  %v475_v34 = vadd.f32 %v950_v1, %v343_v19  ;;  %v347_v35 = vmul.f32 %v940_v0, %v215_v24  ;;  %v229_v18 = vld [vmem:[%s945_s20 + $0x1b8] sm:$0xff] }
  0x2c   : > { %717 = vst [vmem:[%s973_s25 + $0xb8] sm:$0xff] %v589_v55  ;;  %v600_v37 = vmax.f32 %v472_v22, 0.0  ;;  %v476_v38 = vadd.f32 %v950_v1, %v344_v23  ;;  %v348_v39 = vmul.f32 %v940_v0, %v216_v28  ;;  %v601_v41 = vmax.f32 %v473_v26, 0.0  ;;  %v230_v22 = vld [vmem:[%s945_s20 + $0x1c0] sm:$0xff]  ;;  %v231_v26 = vld [vmem:[%s945_s20 + $0x1c8] sm:$0xff] }
  0x2d   : > { %718 = vst [vmem:[%s973_s25 + $0xc0] sm:$0xff] %v590_v59  ;;  %v477_v42 = vadd.f32 %v950_v1, %v345_v27  ;;  %v349_v43 = vmul.f32 %v940_v0, %v217_v32  ;;  %v602_v45 = vmax.f32 %v474_v30, 0.0  ;;  %v478_v46 = vadd.f32 %v950_v1, %v346_v31  ;;  %v232_v30 = vld [vmem:[%s945_s20 + $0x1d0] sm:$0xff] }
  0x2e   : > { %719 = vst [vmem:[%s973_s25 + $0xc8] sm:$0xff] %v591_v63  ;;  %v350_v47 = vmul.f32 %v940_v0, %v218_v36  ;;  %v603_v49 = vmax.f32 %v475_v34, 0.0  ;;  %v479_v50 = vadd.f32 %v950_v1, %v347_v35  ;;  %v351_v51 = vmul.f32 %v940_v0, %v219_v40  ;;  %v233_v34 = vld [vmem:[%s945_s20 + $0x1d8] sm:$0xff] }
  0x2f   : > { %720 = vst [vmem:[%s973_s25 + $0xd0] sm:$0xff] %v592_v5  ;;  %v604_v53 = vmax.f32 %v476_v38, 0.0  ;;  %v480_v54 = vadd.f32 %v950_v1, %v348_v39  ;;  %v352_v55 = vmul.f32 %v940_v0, %v220_v44  ;;  %v605_v57 = vmax.f32 %v477_v42, 0.0  ;;  %v234_v38 = vld [vmem:[%s945_s20 + $0x1e0] sm:$0xff]  ;;  %v235_v42 = vld [vmem:[%s945_s20 + $0x1e8] sm:$0xff] }
  0x30   : > { %721 = vst [vmem:[%s973_s25 + $0xd8] sm:$0xff] %v593_v9  ;;  %v481_v58 = vadd.f32 %v950_v1, %v349_v43  ;;  %v353_v59 = vmul.f32 %v940_v0, %v221_v48  ;;  %v606_v61 = vmax.f32 %v478_v46, 0.0  ;;  %v482_v62 = vadd.f32 %v950_v1, %v350_v47  ;;  %v236_v46 = vld [vmem:[%s945_s20 + $0x1f0] sm:$0xff] }
  0x31   : > { %722 = vst [vmem:[%s973_s25 + $0xe0] sm:$0xff] %v594_v13  ;;  %v354_v63 = vmul.f32 %v940_v0, %v222_v52  ;;  %v607_v3 = vmax.f32 %v479_v50, 0.0  ;;  %v483_v4 = vadd.f32 %v950_v1, %v351_v51  ;;  %v355_v5 = vmul.f32 %v940_v0, %v223_v56  ;;  %v237_v50 = vld [vmem:[%s945_s20 + $0x1f8] sm:$0xff] }
  0x32   : > { %723 = vst [vmem:[%s973_s25 + $0xe8] sm:$0xff] %v595_v17  ;;  %v608_v7 = vmax.f32 %v480_v54, 0.0  ;;  %v484_v8 = vadd.f32 %v950_v1, %v352_v55  ;;  %v356_v9 = vmul.f32 %v940_v0, %v224_v60  ;;  %v609_v11 = vmax.f32 %v481_v58, 0.0  ;;  %v238_v54 = vld [vmem:[%s945_s20 + $0x200] sm:$0xff]  ;;  %v239_v58 = vld [vmem:[%s945_s20 + $0x208] sm:$0xff] }
  0x33   : > { %724 = vst [vmem:[%s973_s25 + $0xf0] sm:$0xff] %v596_v21  ;;  %v485_v12 = vadd.f32 %v950_v1, %v353_v59  ;;  %v357_v13 = vmul.f32 %v940_v0, %v225_v2  ;;  %v610_v15 = vmax.f32 %v482_v62, 0.0  ;;  %v486_v16 = vadd.f32 %v950_v1, %v354_v63  ;;  %v240_v62 = vld [vmem:[%s945_s20 + $0x210] sm:$0xff] }
  0x34   : > { %725 = vst [vmem:[%s973_s25 + $0xf8] sm:$0xff] %v597_v25  ;;  %v358_v17 = vmul.f32 %v940_v0, %v226_v6  ;;  %v611_v19 = vmax.f32 %v483_v4, 0.0  ;;  %v487_v20 = vadd.f32 %v950_v1, %v355_v5  ;;  %v359_v21 = vmul.f32 %v940_v0, %v227_v10  ;;  %v241_v4 = vld [vmem:[%s945_s20 + $0x218] sm:$0xff] }
  0x35   : > { %726 = vst [vmem:[%s973_s25 + $0x100] sm:$0xff] %v598_v29  ;;  %v612_v23 = vmax.f32 %v484_v8, 0.0  ;;  %v488_v24 = vadd.f32 %v950_v1, %v356_v9  ;;  %v360_v25 = vmul.f32 %v940_v0, %v228_v14  ;;  %v613_v27 = vmax.f32 %v485_v12, 0.0  ;;  %v242_v8 = vld [vmem:[%s945_s20 + $0x220] sm:$0xff]  ;;  %v243_v12 = vld [vmem:[%s945_s20 + $0x228] sm:$0xff] }
  0x36   : > { %727 = vst [vmem:[%s973_s25 + $0x108] sm:$0xff] %v599_v33  ;;  %v489_v28 = vadd.f32 %v950_v1, %v357_v13  ;;  %v361_v29 = vmul.f32 %v940_v0, %v229_v18  ;;  %v614_v31 = vmax.f32 %v486_v16, 0.0  ;;  %v490_v32 = vadd.f32 %v950_v1, %v358_v17  ;;  %v244_v16 = vld [vmem:[%s945_s20 + $0x230] sm:$0xff] }
  0x37   : > { %728 = vst [vmem:[%s973_s25 + $0x110] sm:$0xff] %v600_v37  ;;  %v362_v33 = vmul.f32 %v940_v0, %v230_v22  ;;  %v615_v35 = vmax.f32 %v487_v20, 0.0  ;;  %v491_v36 = vadd.f32 %v950_v1, %v359_v21  ;;  %v363_v37 = vmul.f32 %v940_v0, %v231_v26  ;;  %v245_v20 = vld [vmem:[%s945_s20 + $0x238] sm:$0xff] }
  0x38   : > { %729 = vst [vmem:[%s973_s25 + $0x118] sm:$0xff] %v601_v41  ;;  %v616_v39 = vmax.f32 %v488_v24, 0.0  ;;  %v492_v40 = vadd.f32 %v950_v1, %v360_v25  ;;  %v364_v41 = vmul.f32 %v940_v0, %v232_v30  ;;  %v617_v43 = vmax.f32 %v489_v28, 0.0  ;;  %v246_v24 = vld [vmem:[%s945_s20 + $0x240] sm:$0xff]  ;;  %v247_v28 = vld [vmem:[%s945_s20 + $0x248] sm:$0xff] }
  0x39   : > { %730 = vst [vmem:[%s973_s25 + $0x120] sm:$0xff] %v602_v45  ;;  %v493_v44 = vadd.f32 %v950_v1, %v361_v29  ;;  %v365_v45 = vmul.f32 %v940_v0, %v233_v34  ;;  %v618_v47 = vmax.f32 %v490_v32, 0.0  ;;  %v494_v48 = vadd.f32 %v950_v1, %v362_v33  ;;  %v248_v32 = vld [vmem:[%s945_s20 + $0x250] sm:$0xff] }
  0x3a   : > { %731 = vst [vmem:[%s973_s25 + $0x128] sm:$0xff] %v603_v49  ;;  %v366_v49 = vmul.f32 %v940_v0, %v234_v38  ;;  %v619_v51 = vmax.f32 %v491_v36, 0.0  ;;  %v495_v52 = vadd.f32 %v950_v1, %v363_v37  ;;  %v620_v55 = vmax.f32 %v492_v40, 0.0  ;;  %v249_v36 = vld [vmem:[%s945_s20 + $0x258] sm:$0xff]  ;;  %v250_v40 = vld [vmem:[%s945_s20 + $0x260] sm:$0xff] }
  0x3b   : > { %732 = vst [vmem:[%s973_s25 + $0x130] sm:$0xff] %v604_v53  ;;  %v367_v53 = vmul.f32 %v940_v0, %v235_v42  ;;  %v496_v56 = vadd.f32 %v950_v1, %v364_v41  ;;  %v621_v59 = vmax.f32 %v493_v44, 0.0  ;;  %v497_v60 = vadd.f32 %v950_v1, %v365_v45  ;;  %v251_v44 = vld [vmem:[%s945_s20 + $0x268] sm:$0xff] }
  0x3c   : > { %733 = vst [vmem:[%s973_s25 + $0x138] sm:$0xff] %v605_v57  ;;  %v368_v57 = vmul.f32 %v940_v0, %v236_v46  ;;  %v622_v63 = vmax.f32 %v494_v48, 0.0  ;;  %v498_v2 = vadd.f32 %v950_v1, %v366_v49  ;;  %v623_v5 = vmax.f32 %v495_v52, 0.0  ;;  %v252_v48 = vld [vmem:[%s945_s20 + $0x270] sm:$0xff]  ;;  %v253_v52 = vld [vmem:[%s945_s20 + $0x278] sm:$0xff] }
  0x3d   : > { %734 = vst [vmem:[%s973_s25 + $0x140] sm:$0xff] %v606_v61  ;;  %v369_v61 = vmul.f32 %v940_v0, %v237_v50  ;;  %v499_v6 = vadd.f32 %v950_v1, %v367_v53  ;;  %v624_v9 = vmax.f32 %v496_v56, 0.0  ;;  %v625_v13 = vmax.f32 %v497_v60, 0.0  ;;  %v254_v56 = vld [vmem:[%s945_s20 + $0x280] sm:$0xff]  ;;  %v255_v60 = vld [vmem:[%s945_s20 + $0x288] sm:$0xff] }
  0x3e   : > { %735 = vst [vmem:[%s973_s25 + $0x148] sm:$0xff] %v607_v3  ;;  %v370_v3 = vmul.f32 %v940_v0, %v238_v54  ;;  %v500_v10 = vadd.f32 %v950_v1, %v368_v57  ;;  %v626_v17 = vmax.f32 %v498_v2, 0.0  ;;  %v256_v2 = vld [vmem:[%s945_s20 + $0x290] sm:$0xff] }
  0x3f   : > { %736 = vst [vmem:[%s973_s25 + $0x150] sm:$0xff] %v608_v7  ;;  %v371_v7 = vmul.f32 %v940_v0, %v239_v58  ;;  %v501_v14 = vadd.f32 %v950_v1, %v369_v61  ;;  %v627_v21 = vmax.f32 %v499_v6, 0.0  ;;  %v257_v6 = vld [vmem:[%s945_s20 + $0x298] sm:$0xff] }
  0x40   : > { %737 = vst [vmem:[%s973_s25 + $0x158] sm:$0xff] %v609_v11  ;;  %v372_v11 = vmul.f32 %v940_v0, %v240_v62  ;;  %v502_v18 = vadd.f32 %v950_v1, %v370_v3  ;;  %v628_v25 = vmax.f32 %v500_v10, 0.0  ;;  %v258_v10 = vld [vmem:[%s945_s20 + $0x2a0] sm:$0xff] }
  0x41   : > { %738 = vst [vmem:[%s973_s25 + $0x160] sm:$0xff] %v610_v15  ;;  %v373_v15 = vmul.f32 %v940_v0, %v241_v4  ;;  %v503_v22 = vadd.f32 %v950_v1, %v371_v7  ;;  %v629_v29 = vmax.f32 %v501_v14, 0.0  ;;  %v259_v14 = vld [vmem:[%s945_s20 + $0x2a8] sm:$0xff] }
  0x42   : > { %739 = vst [vmem:[%s973_s25 + $0x168] sm:$0xff] %v611_v19  ;;  %v374_v19 = vmul.f32 %v940_v0, %v242_v8  ;;  %v504_v26 = vadd.f32 %v950_v1, %v372_v11  ;;  %v630_v33 = vmax.f32 %v502_v18, 0.0  ;;  %v260_v18 = vld [vmem:[%s945_s20 + $0x2b0] sm:$0xff] }
  0x43   : > { %740 = vst [vmem:[%s973_s25 + $0x170] sm:$0xff] %v612_v23  ;;  %v375_v23 = vmul.f32 %v940_v0, %v243_v12  ;;  %v505_v30 = vadd.f32 %v950_v1, %v373_v15  ;;  %v631_v37 = vmax.f32 %v503_v22, 0.0  ;;  %v261_v22 = vld [vmem:[%s945_s20 + $0x2b8] sm:$0xff] }
  0x44   : > { %741 = vst [vmem:[%s973_s25 + $0x178] sm:$0xff] %v613_v27  ;;  %v376_v27 = vmul.f32 %v940_v0, %v244_v16  ;;  %v506_v34 = vadd.f32 %v950_v1, %v374_v19  ;;  %v632_v41 = vmax.f32 %v504_v26, 0.0  ;;  %v262_v26 = vld [vmem:[%s945_s20 + $0x2c0] sm:$0xff] }
  0x45   : > { %742 = vst [vmem:[%s973_s25 + $0x180] sm:$0xff] %v614_v31  ;;  %v377_v31 = vmul.f32 %v940_v0, %v245_v20  ;;  %v507_v38 = vadd.f32 %v950_v1, %v375_v23  ;;  %v633_v45 = vmax.f32 %v505_v30, 0.0  ;;  %v263_v30 = vld [vmem:[%s945_s20 + $0x2c8] sm:$0xff] }
  0x46   : > { %743 = vst [vmem:[%s973_s25 + $0x188] sm:$0xff] %v615_v35  ;;  %v378_v35 = vmul.f32 %v940_v0, %v246_v24  ;;  %v508_v42 = vadd.f32 %v950_v1, %v376_v27  ;;  %v634_v49 = vmax.f32 %v506_v34, 0.0  ;;  %v264_v34 = vld [vmem:[%s945_s20 + $0x2d0] sm:$0xff] }
  0x47   : > { %744 = vst [vmem:[%s973_s25 + $0x190] sm:$0xff] %v616_v39  ;;  %v379_v39 = vmul.f32 %v940_v0, %v247_v28  ;;  %v509_v46 = vadd.f32 %v950_v1, %v377_v31  ;;  %v635_v53 = vmax.f32 %v507_v38, 0.0  ;;  %v265_v38 = vld [vmem:[%s945_s20 + $0x2d8] sm:$0xff] }
  0x48   : > { %745 = vst [vmem:[%s973_s25 + $0x198] sm:$0xff] %v617_v43  ;;  %v380_v43 = vmul.f32 %v940_v0, %v248_v32  ;;  %v510_v50 = vadd.f32 %v950_v1, %v378_v35  ;;  %v636_v57 = vmax.f32 %v508_v42, 0.0  ;;  %v266_v42 = vld [vmem:[%s945_s20 + $0x2e0] sm:$0xff] }
  0x49   : > { %746 = vst [vmem:[%s973_s25 + $0x1a0] sm:$0xff] %v618_v47  ;;  %v381_v47 = vmul.f32 %v940_v0, %v249_v36  ;;  %v511_v54 = vadd.f32 %v950_v1, %v379_v39  ;;  %v637_v61 = vmax.f32 %v509_v46, 0.0  ;;  %v267_v46 = vld [vmem:[%s945_s20 + $0x2e8] sm:$0xff] }
  0x4a   : > { %747 = vst [vmem:[%s973_s25 + $0x1a8] sm:$0xff] %v619_v51  ;;  %v382_v51 = vmul.f32 %v940_v0, %v250_v40  ;;  %v512_v58 = vadd.f32 %v950_v1, %v380_v43  ;;  %v638_v3 = vmax.f32 %v510_v50, 0.0  ;;  %v268_v50 = vld [vmem:[%s945_s20 + $0x2f0] sm:$0xff] }
  0x4b   : > { %748 = vst [vmem:[%s973_s25 + $0x1b0] sm:$0xff] %v620_v55  ;;  %v383_v55 = vmul.f32 %v940_v0, %v251_v44  ;;  %v513_v62 = vadd.f32 %v950_v1, %v381_v47  ;;  %v639_v7 = vmax.f32 %v511_v54, 0.0  ;;  %v269_v54 = vld [vmem:[%s945_s20 + $0x2f8] sm:$0xff] }
  0x4c   : > { %749 = vst [vmem:[%s973_s25 + $0x1b8] sm:$0xff] %v621_v59  ;;  %v384_v59 = vmul.f32 %v940_v0, %v252_v48  ;;  %v514_v4 = vadd.f32 %v950_v1, %v382_v51  ;;  %v640_v11 = vmax.f32 %v512_v58, 0.0  ;;  %v270_v58 = vld [vmem:[%s945_s20 + $0x300] sm:$0xff] }
  0x4d   : > { %750 = vst [vmem:[%s973_s25 + $0x1c0] sm:$0xff] %v622_v63  ;;  %v385_v63 = vmul.f32 %v940_v0, %v253_v52  ;;  %v515_v8 = vadd.f32 %v950_v1, %v383_v55  ;;  %v641_v15 = vmax.f32 %v513_v62, 0.0  ;;  %v271_v62 = vld [vmem:[%s945_s20 + $0x308] sm:$0xff] }
  0x4e   : > { %751 = vst [vmem:[%s973_s25 + $0x1c8] sm:$0xff] %v623_v5  ;;  %v386_v5 = vmul.f32 %v940_v0, %v254_v56  ;;  %v516_v12 = vadd.f32 %v950_v1, %v384_v59  ;;  %v642_v19 = vmax.f32 %v514_v4, 0.0  ;;  %v272_v4 = vld [vmem:[%s945_s20 + $0x310] sm:$0xff] }
  0x4f   : > { %752 = vst [vmem:[%s973_s25 + $0x1d0] sm:$0xff] %v624_v9  ;;  %v387_v9 = vmul.f32 %v940_v0, %v255_v60  ;;  %v517_v16 = vadd.f32 %v950_v1, %v385_v63  ;;  %v643_v23 = vmax.f32 %v515_v8, 0.0  ;;  %v273_v8 = vld [vmem:[%s945_s20 + $0x318] sm:$0xff] }
  0x50   : > { %753 = vst [vmem:[%s973_s25 + $0x1d8] sm:$0xff] %v625_v13  ;;  %v388_v13 = vmul.f32 %v940_v0, %v256_v2  ;;  %v518_v20 = vadd.f32 %v950_v1, %v386_v5  ;;  %v644_v27 = vmax.f32 %v516_v12, 0.0  ;;  %v274_v12 = vld [vmem:[%s945_s20 + $0x320] sm:$0xff] }
  0x51   : > { %754 = vst [vmem:[%s973_s25 + $0x1e0] sm:$0xff] %v626_v17  ;;  %v389_v17 = vmul.f32 %v940_v0, %v257_v6  ;;  %v519_v24 = vadd.f32 %v950_v1, %v387_v9  ;;  %v645_v31 = vmax.f32 %v517_v16, 0.0  ;;  %v275_v16 = vld [vmem:[%s945_s20 + $0x328] sm:$0xff] }
  0x52   : > { %755 = vst [vmem:[%s973_s25 + $0x1e8] sm:$0xff] %v627_v21  ;;  %v390_v21 = vmul.f32 %v940_v0, %v258_v10  ;;  %v520_v28 = vadd.f32 %v950_v1, %v388_v13  ;;  %v646_v35 = vmax.f32 %v518_v20, 0.0  ;;  %v276_v20 = vld [vmem:[%s945_s20 + $0x330] sm:$0xff] }
  0x53   : > { %756 = vst [vmem:[%s973_s25 + $0x1f0] sm:$0xff] %v628_v25  ;;  %v391_v25 = vmul.f32 %v940_v0, %v259_v14  ;;  %v521_v32 = vadd.f32 %v950_v1, %v389_v17  ;;  %v647_v39 = vmax.f32 %v519_v24, 0.0  ;;  %v277_v24 = vld [vmem:[%s945_s20 + $0x338] sm:$0xff] }
  0x54   : > { %757 = vst [vmem:[%s973_s25 + $0x1f8] sm:$0xff] %v629_v29  ;;  %v392_v29 = vmul.f32 %v940_v0, %v260_v18  ;;  %v522_v36 = vadd.f32 %v950_v1, %v390_v21  ;;  %v648_v43 = vmax.f32 %v520_v28, 0.0  ;;  %v278_v28 = vld [vmem:[%s945_s20 + $0x340] sm:$0xff] }
  0x55   : > { %758 = vst [vmem:[%s973_s25 + $0x200] sm:$0xff] %v630_v33  ;;  %v393_v33 = vmul.f32 %v940_v0, %v261_v22  ;;  %v523_v40 = vadd.f32 %v950_v1, %v391_v25  ;;  %v649_v47 = vmax.f32 %v521_v32, 0.0  ;;  %v279_v32 = vld [vmem:[%s945_s20 + $0x348] sm:$0xff] }
  0x56   : > { %759 = vst [vmem:[%s973_s25 + $0x208] sm:$0xff] %v631_v37  ;;  %v394_v37 = vmul.f32 %v940_v0, %v262_v26  ;;  %v524_v44 = vadd.f32 %v950_v1, %v392_v29  ;;  %v650_v51 = vmax.f32 %v522_v36, 0.0  ;;  %v280_v36 = vld [vmem:[%s945_s20 + $0x350] sm:$0xff] }
  0x57   : > { %760 = vst [vmem:[%s973_s25 + $0x210] sm:$0xff] %v632_v41  ;;  %v395_v41 = vmul.f32 %v940_v0, %v263_v30  ;;  %v525_v48 = vadd.f32 %v950_v1, %v393_v33  ;;  %v651_v55 = vmax.f32 %v523_v40, 0.0  ;;  %v281_v40 = vld [vmem:[%s945_s20 + $0x358] sm:$0xff] }
  0x58   : > { %761 = vst [vmem:[%s973_s25 + $0x218] sm:$0xff] %v633_v45  ;;  %v396_v45 = vmul.f32 %v940_v0, %v264_v34  ;;  %v526_v52 = vadd.f32 %v950_v1, %v394_v37  ;;  %v652_v59 = vmax.f32 %v524_v44, 0.0 }
  0x59   : > { %762 = vst [vmem:[%s973_s25 + $0x220] sm:$0xff] %v634_v49  ;;  %v397_v49 = vmul.f32 %v940_v0, %v265_v38  ;;  %v527_v56 = vadd.f32 %v950_v1, %v395_v41  ;;  %v653_v63 = vmax.f32 %v525_v48, 0.0  ;;  %v283_v48 = vld [vmem:[%s945_s20 + $0x368] sm:$0xff] }
  0x5a   : > { %763 = vst [vmem:[%s973_s25 + $0x228] sm:$0xff] %v635_v53  ;;  %v398_v53 = vmul.f32 %v940_v0, %v266_v42  ;;  %v528_v60 = vadd.f32 %v950_v1, %v396_v45  ;;  %v654_v5 = vmax.f32 %v526_v52, 0.0  ;;  %v282_v45 = vld [vmem:[%s945_s20 + $0x360] sm:$0xff]  ;;  %v284_v52 = vld [vmem:[%s945_s20 + $0x370] sm:$0xff] }
  0x5b   : > { %764 = vst [vmem:[%s973_s25 + $0x230] sm:$0xff] %v636_v57  ;;  %v399_v57 = vmul.f32 %v940_v0, %v267_v46  ;;  %v529_v2 = vadd.f32 %v950_v1, %v397_v49  ;;  %v655_v9 = vmax.f32 %v527_v56, 0.0  ;;  %v285_v56 = vld [vmem:[%s945_s20 + $0x378] sm:$0xff] }
  0x5c   : > { %765 = vst [vmem:[%s973_s25 + $0x238] sm:$0xff] %v637_v61  ;;  %v400_v61 = vmul.f32 %v940_v0, %v268_v50  ;;  %v530_v6 = vadd.f32 %v950_v1, %v398_v53  ;;  %v656_v13 = vmax.f32 %v528_v60, 0.0  ;;  %v286_v60 = vld [vmem:[%s945_s20 + $0x380] sm:$0xff] }
  0x5d   : > { %766 = vst [vmem:[%s973_s25 + $0x240] sm:$0xff] %v638_v3  ;;  %v401_v3 = vmul.f32 %v940_v0, %v269_v54  ;;  %v531_v10 = vadd.f32 %v950_v1, %v399_v57  ;;  %v657_v17 = vmax.f32 %v529_v2, 0.0  ;;  %v287_v2 = vld [vmem:[%s945_s20 + $0x388] sm:$0xff] }
  0x5e   : > { %767 = vst [vmem:[%s973_s25 + $0x248] sm:$0xff] %v639_v7  ;;  %v402_v7 = vmul.f32 %v940_v0, %v270_v58  ;;  %v532_v14 = vadd.f32 %v950_v1, %v400_v61  ;;  %v658_v21 = vmax.f32 %v530_v6, 0.0  ;;  %v288_v6 = vld [vmem:[%s945_s20 + $0x390] sm:$0xff] }
  0x5f   : > { %768 = vst [vmem:[%s973_s25 + $0x250] sm:$0xff] %v640_v11  ;;  %v403_v11 = vmul.f32 %v940_v0, %v271_v62  ;;  %v533_v18 = vadd.f32 %v950_v1, %v401_v3  ;;  %v659_v25 = vmax.f32 %v531_v10, 0.0  ;;  %v289_v10 = vld [vmem:[%s945_s20 + $0x398] sm:$0xff] }
  0x60   : > { %769 = vst [vmem:[%s973_s25 + $0x258] sm:$0xff] %v641_v15  ;;  %v404_v15 = vmul.f32 %v940_v0, %v272_v4  ;;  %v534_v22 = vadd.f32 %v950_v1, %v402_v7  ;;  %v660_v29 = vmax.f32 %v532_v14, 0.0  ;;  %v290_v14 = vld [vmem:[%s945_s20 + $0x3a0] sm:$0xff] }
  0x61   : > { %770 = vst [vmem:[%s973_s25 + $0x260] sm:$0xff] %v642_v19  ;;  %v405_v19 = vmul.f32 %v940_v0, %v273_v8  ;;  %v535_v26 = vadd.f32 %v950_v1, %v403_v11  ;;  %v661_v33 = vmax.f32 %v533_v18, 0.0  ;;  %v291_v18 = vld [vmem:[%s945_s20 + $0x3a8] sm:$0xff] }
  0x62   : > { %771 = vst [vmem:[%s973_s25 + $0x268] sm:$0xff] %v643_v23  ;;  %v406_v23 = vmul.f32 %v940_v0, %v274_v12  ;;  %v536_v30 = vadd.f32 %v950_v1, %v404_v15  ;;  %v662_v37 = vmax.f32 %v534_v22, 0.0  ;;  %v292_v22 = vld [vmem:[%s945_s20 + $0x3b0] sm:$0xff] }
  0x63   : > { %772 = vst [vmem:[%s973_s25 + $0x270] sm:$0xff] %v644_v27  ;;  %v407_v27 = vmul.f32 %v940_v0, %v275_v16  ;;  %v537_v34 = vadd.f32 %v950_v1, %v405_v19  ;;  %v663_v41 = vmax.f32 %v535_v26, 0.0  ;;  %v293_v26 = vld [vmem:[%s945_s20 + $0x3b8] sm:$0xff] }
  0x64   : > { %773 = vst [vmem:[%s973_s25 + $0x278] sm:$0xff] %v645_v31  ;;  %v408_v31 = vmul.f32 %v940_v0, %v276_v20  ;;  %v538_v38 = vadd.f32 %v950_v1, %v406_v23  ;;  %v664_v46 = vmax.f32 %v536_v30, 0.0  ;;  %v294_v30 = vld [vmem:[%s945_s20 + $0x3c0] sm:$0xff] }
  0x65   : > { %774 = vst [vmem:[%s973_s25 + $0x280] sm:$0xff] %v646_v35  ;;  %v409_v35 = vmul.f32 %v940_v0, %v277_v24  ;;  %v539_v42 = vadd.f32 %v950_v1, %v407_v27  ;;  %v665_v49 = vmax.f32 %v537_v34, 0.0  ;;  %v295_v34 = vld [vmem:[%s945_s20 + $0x3c8] sm:$0xff] }
  0x66   : > { %775 = vst [vmem:[%s973_s25 + $0x288] sm:$0xff] %v647_v39  ;;  %v410_v39 = vmul.f32 %v940_v0, %v278_v28  ;;  %v1377_v0 = vld [vmem:[%s1484_s2] ss:$0 sm:$0xff]  ;;  %v666_v53 = vmax.f32 %v538_v38, 0.0  ;;  %v296_v38 = vld [vmem:[%s945_s20 + $0x3d0] sm:$0xff] }
  0x67   : > { %776 = vst [vmem:[%s973_s25 + $0x290] sm:$0xff] %v648_v43  ;;  %v1369_v43 = vld [vmem:[%s1483_s1] ss:$0 sm:$0xff]  ;;  %v541_v50 = vadd.f32 %v1377_v0, %v409_v35  ;;  %v667_v57 = vmax.f32 %v539_v42, 0.0  ;;  %v297_v42 = vld [vmem:[%s945_s20 + $0x3d8] sm:$0xff] }
  0x68   : > { %777 = vst [vmem:[%s973_s25 + $0x298] sm:$0xff] %v649_v47  ;;  %v411_v44 = vmul.f32 %v1369_v43, %v279_v32  ;;  %v540_v47 = vadd.f32 %v1377_v0, %v408_v31  ;;  %v412_v1 = vmul.f32 %v1369_v43, %v280_v36  ;;  %v542_v54 = vadd.f32 %v1377_v0, %v410_v39 }
  0x69   : > { %778 = vst [vmem:[%s973_s25 + $0x2a0] sm:$0xff] %v650_v51  ;;  %v413_v51 = vmul.f32 %v1369_v43, %v281_v40  ;;  %v669_v3 = vmax.f32 %v541_v50, 0.0  ;;  %v299_v50 = vld [vmem:[%s945_s20 + $0x3e8] sm:$0xff] }
  0x6a   : > { %779 = vst [vmem:[%s973_s25 + $0x2a8] sm:$0xff] %v651_v55  ;;  %v414_v55 = vmul.f32 %v1369_v43, %v282_v45  ;;  %v543_v58 = vadd.f32 %v1377_v0, %v411_v44  ;;  %v668_v61 = vmax.f32 %v540_v47, 0.0  ;;  %v544_v62 = vadd.f32 %v1377_v0, %v412_v1  ;;  %v298_v47 = vld [vmem:[%s945_s20 + $0x3e0] sm:$0xff] }
  0x6b   : > { %780 = vst [vmem:[%s973_s25 + $0x2b0] sm:$0xff] %v652_v59  ;;  %v415_v59 = vmul.f32 %v1369_v43, %v283_v48  ;;  %v545_v4 = vadd.f32 %v1377_v0, %v413_v51  ;;  %v670_v7 = vmax.f32 %v542_v54, 0.0  ;;  %v300_v54 = vld [vmem:[%s945_s20 + $0x3f0] sm:$0xff] }
  0x6c   : > { %781 = vst [vmem:[%s973_s25 + $0x2b8] sm:$0xff] %v653_v63  ;;  %v416_v63 = vmul.f32 %v1369_v43, %v284_v52  ;;  %v546_v8 = vadd.f32 %v1377_v0, %v414_v55  ;;  %v671_v11 = vmax.f32 %v543_v58, 0.0  ;;  %v672_v15 = vmax.f32 %v544_v62, 0.0  ;;  %v301_v58 = vld [vmem:[%s945_s20 + $0x3f8] sm:$0xff] }
  0x6d   : > { %782 = vst [vmem:[%s973_s25 + $0x2c0] sm:$0xff] %v654_v5  ;;  %v417_v5 = vmul.f32 %v1369_v43, %v285_v56  ;;  %v547_v12 = vadd.f32 %v1377_v0, %v415_v59  ;;  %v673_v19 = vmax.f32 %v545_v4, 0.0 }
  0x6e   : > { %783 = vst [vmem:[%s973_s25 + $0x2c8] sm:$0xff] %v655_v9  ;;  %v418_v9 = vmul.f32 %v1369_v43, %v286_v60  ;;  %v548_v16 = vadd.f32 %v1377_v0, %v416_v63  ;;  %v674_v23 = vmax.f32 %v546_v8, 0.0 }
  0x6f   : > { %784 = vst [vmem:[%s973_s25 + $0x2d0] sm:$0xff] %v656_v13  ;;  %v419_v13 = vmul.f32 %v1369_v43, %v287_v2  ;;  %v549_v20 = vadd.f32 %v1377_v0, %v417_v5  ;;  %v675_v27 = vmax.f32 %v547_v12, 0.0  ;;  %v432_v2 = vmul.f32 %v1369_v43, %v300_v54 }
  0x70   : > { %785 = vst [vmem:[%s973_s25 + $0x2d8] sm:$0xff] %v657_v17  ;;  %v420_v17 = vmul.f32 %v1369_v43, %v288_v6  ;;  %v550_v24 = vadd.f32 %v1377_v0, %v418_v9  ;;  %v676_v31 = vmax.f32 %v548_v16, 0.0  ;;  %v433_v5 = vmul.f32 %v1369_v43, %v301_v58 }
  0x71   : > { %786 = vst [vmem:[%s973_s25 + $0x2e0] sm:$0xff] %v658_v21  ;;  %v421_v21 = vmul.f32 %v1369_v43, %v289_v10  ;;  %v551_v28 = vadd.f32 %v1377_v0, %v419_v13  ;;  %v677_v35 = vmax.f32 %v549_v20, 0.0 }
  0x72   : > { %787 = vst [vmem:[%s973_s25 + $0x2e8] sm:$0xff] %v659_v25  ;;  %v422_v25 = vmul.f32 %v1369_v43, %v290_v14  ;;  %v552_v32 = vadd.f32 %v1377_v0, %v420_v17  ;;  %v678_v39 = vmax.f32 %v550_v24, 0.0  ;;  %v565_v12 = vadd.f32 %v1377_v0, %v433_v5 }
  0x73   : > { %788 = vst [vmem:[%s973_s25 + $0x2f0] sm:$0xff] %v660_v29  ;;  %v423_v29 = vmul.f32 %v1369_v43, %v291_v18  ;;  %v553_v36 = vadd.f32 %v1377_v0, %v421_v21  ;;  %v679_v44 = vmax.f32 %v551_v28, 0.0 }
  0x74   : > { %789 = vst [vmem:[%s973_s25 + $0x2f8] sm:$0xff] %v661_v33  ;;  %v424_v33 = vmul.f32 %v1369_v43, %v292_v22  ;;  %v554_v40 = vadd.f32 %v1377_v0, %v422_v25  ;;  %v680_v1 = vmax.f32 %v552_v32, 0.0  ;;  %v693_v16 = vmax.f32 %v565_v12, 0.0 }
  0x75   : > { %790 = vst [vmem:[%s973_s25 + $0x300] sm:$0xff] %v662_v37  ;;  %v425_v37 = vmul.f32 %v1369_v43, %v293_v26  ;;  %v555_v45 = vadd.f32 %v1377_v0, %v423_v29  ;;  %v681_v51 = vmax.f32 %v553_v36, 0.0 }
  0x76   : > { %791 = vst [vmem:[%s973_s25 + $0x308] sm:$0xff] %v663_v41  ;;  %v426_v41 = vmul.f32 %v1369_v43, %v294_v30  ;;  %v556_v48 = vadd.f32 %v1377_v0, %v424_v33  ;;  %v682_v55 = vmax.f32 %v554_v40, 0.0 }
  0x77   : > { %792 = vst [vmem:[%s973_s25 + $0x310] sm:$0xff] %v664_v46  ;;  %v427_v46 = vmul.f32 %v1369_v43, %v295_v34  ;;  %v557_v52 = vadd.f32 %v1377_v0, %v425_v37  ;;  %v683_v59 = vmax.f32 %v555_v45, 0.0 }
  0x78   : > { %793 = vst [vmem:[%s973_s25 + $0x318] sm:$0xff] %v665_v49  ;;  %v428_v49 = vmul.f32 %v1369_v43, %v296_v38  ;;  %v558_v56 = vadd.f32 %v1377_v0, %v426_v41  ;;  %v684_v62 = vmax.f32 %v556_v48, 0.0 }
  0x79   : > { %794 = vst [vmem:[%s973_s25 + $0x320] sm:$0xff] %v666_v53  ;;  %v429_v53 = vmul.f32 %v1369_v43, %v297_v42  ;;  %v559_v60 = vadd.f32 %v1377_v0, %v427_v46 }
  0x7a   : > { %795 = vst [vmem:[%s973_s25 + $0x328] sm:$0xff] %v667_v57  ;;  %v430_v57 = vmul.f32 %v1369_v43, %v298_v47  ;;  %v560_v63 = vadd.f32 %v1377_v0, %v428_v49  ;;  %v686_v6 = vmax.f32 %v558_v56, 0.0 }
  0x7b   : > { %796 = vst [vmem:[%s973_s25 + $0x330] sm:$0xff] %v668_v61  ;;  %v431_v61 = vmul.f32 %v1369_v43, %v299_v50  ;;  %v561_v4 = vadd.f32 %v1377_v0, %v429_v53  ;;  %v687_v8 = vmax.f32 %v559_v60, 0.0 }
  0x7c   : > { %797 = vst [vmem:[%s973_s25 + $0x338] sm:$0xff] %v669_v3  ;;  %v685_v3 = vmax.f32 %v557_v52, 0.0  ;;  %v688_v10 = vmax.f32 %v560_v63, 0.0 }
  0x7d   : > { %798 = vst [vmem:[%s973_s25 + $0x340] sm:$0xff] %v670_v7  ;;  %v562_v7 = vadd.f32 %v1377_v0, %v430_v57  ;;  %v563_v9 = vadd.f32 %v1377_v0, %v431_v61  ;;  %v689_v43 = vmax.f32 %v561_v4, 0.0 }
  0x7e   : > { %799 = vst [vmem:[%s973_s25 + $0x348] sm:$0xff] %v671_v11  ;;  %v564_v11 = vadd.f32 %v1377_v0, %v432_v2 }
  0x7f   : > { %800 = vst [vmem:[%s973_s25 + $0x350] sm:$0xff] %v672_v15  ;;  %v690_v13 = vmax.f32 %v562_v7, 0.0  ;;  %v691_v14 = vmax.f32 %v563_v9, 0.0 }
  0x80   : > { %801 = vst [vmem:[%s973_s25 + $0x358] sm:$0xff] %v673_v19  ;;  %v692_v15 = vmax.f32 %v564_v11, 0.0 }
  0x81   : > { %802 = vst [vmem:[%s973_s25 + $0x360] sm:$0xff] %v674_v23 }
  0x82   : > { %803 = vst [vmem:[%s973_s25 + $0x368] sm:$0xff] %v675_v27 }
  0x83   : > { %804 = vst [vmem:[%s973_s25 + $0x370] sm:$0xff] %v676_v31 }
  0x84   : > { %805 = vst [vmem:[%s973_s25 + $0x378] sm:$0xff] %v677_v35 }
  0x85   : > { %806 = vst [vmem:[%s973_s25 + $0x380] sm:$0xff] %v678_v39 }
  0x86   : > { %807 = vst [vmem:[%s973_s25 + $0x388] sm:$0xff] %v679_v44 }
  0x87   : > { %808 = vst [vmem:[%s973_s25 + $0x390] sm:$0xff] %v680_v1 }
  0x88   : > { %809 = vst [vmem:[%s973_s25 + $0x398] sm:$0xff] %v681_v51 }
  0x89   : > { %810 = vst [vmem:[%s973_s25 + $0x3a0] sm:$0xff] %v682_v55 }
  0x8a   : > { %811 = vst [vmem:[%s973_s25 + $0x3a8] sm:$0xff] %v683_v59 }
  0x8b   : > { %812 = vst [vmem:[%s973_s25 + $0x3b0] sm:$0xff] %v684_v62 }
  0x8c   : > { %813 = vst [vmem:[%s973_s25 + $0x3b8] sm:$0xff] %v685_v3 }
  0x8d   : > { %814 = vst [vmem:[%s973_s25 + $0x3c0] sm:$0xff] %v686_v6 }
  0x8e   : > { %815 = vst [vmem:[%s973_s25 + $0x3c8] sm:$0xff] %v687_v8 }
  0x8f   : > { %816 = vst [vmem:[%s973_s25 + $0x3d0] sm:$0xff] %v688_v10 }
  0x90   : > { %817 = vst [vmem:[%s973_s25 + $0x3d8] sm:$0xff] %v689_v43 }
  0x91   : > { %818 = vst [vmem:[%s973_s25 + $0x3e0] sm:$0xff] %v690_v13 }
  0x92   : > { %819 = vst [vmem:[%s973_s25 + $0x3e8] sm:$0xff] %v691_v14 }
  0x93   : > { %820 = vst [vmem:[%s973_s25 + $0x3f0] sm:$0xff] %v692_v15 }
  0x94   : > { %821 = vst [vmem:[%s973_s25 + $0x3f8] sm:$0xff] %v693_v16 }
  0x95 PF: > { %s13_s12 = sadd.s32 1, %s907_s12  }
  0x96   : > { %p10_p4 = scmp.ge.s32.totalorder %s13_s12, 4  }
  0x98   :  { %12 = sbr.rel (!%p10_p4) target bundleno = 1 (0x1), region = 62 }

// kernel: unet_conv_block_forward.4
= control target key start
LH: loop header
LB: loop body
LE: loop exit
PB: predicated region body
PF: predicated region fallthrough
CT: control target
= control target key end

     0   :  { %s2233_s18 = smov 0   ;;  %s3241_s0 = inlined_call_operand.vmem [shape: bf16[2048,128], index: 0, kind: input, shape index: {}]   ;;  %s3242_s1 = inlined_call_operand.vmem [shape: bf16[128,128], index: 1, kind: input, shape index: {}]   ;;  %s3243_s2 = inlined_call_operand.vmem [shape: f32[1,128], index: 2, kind: input, shape index: {}]   ;;  %s3244_s3 = inlined_call_operand.vmem [shape: f32[2048,128], index: 3, kind: output, shape index: {0}]   ;;  %s3245_s4 = inlined_call_operand.vmem [shape: f32[16,128], index: 4, kind: output, shape index: {1}]   ;;  %s3246_s5 = inlined_call_operand.vmem [shape: f32[16,128], index: 5, kind: output, shape index: {2}]  }
   0x1 LB: > { %s2239_s19 = sadd.s32 4294967295, %s2201_s18   ;;  %p1792_p0 = scmp.ge.s32.totalorder %s2201_s18, 1  ;;  %s2201_s18 = sphi %s2233_s18, %s16_s18  }
   0x2   : > { %p193_p1 = scmp.lt.s32.totalorder %s2201_s18, 3 }
   0x4   : > { %p194_p2 = pnand %p1792_p0, %p193_p1 }
   0x6   : > { %197 = sbr.rel (%p194_p2) target bundleno = 616 (0x268), region = 32 }
   0xb   : > { %v2160_v0 = vld [vmem:[%s3242_s1 + $0x38] sm:$0xff]  ;;  %v2159_v1 = vld [vmem:[%s3242_s1 + $0x30] sm:$0xff]  ;;  %v2158_v2 = vld [vmem:[%s3242_s1 + $0x28] sm:$0xff]  ;;  %s1793_s28 = sshll.u32 %s2239_s19, 7  ;;  %p241_p4 = scmp.lt.s32.totalorder %s2239_s19, 1 }
   0xc   : > { %829 = vmatpush.bf16.msra.mxu0 %v2160_v0  ;;  %2161 = vmatpush.bf16.msra.mxu1 %v2160_v0  ;;  %v2157_v3 = vld [vmem:[%s3242_s1 + $0x20] sm:$0xff]  ;;  %v2156_v4 = vld [vmem:[%s3242_s1 + $0x18] sm:$0xff]  ;;  %p230_p3 = scmp.lt.s32.totalorder %s1793_s28, 255  ;;  %v2155_v5 = vld [vmem:[%s3242_s1 + $0x10] sm:$0xff] }
   0xd   : > { %2162 = vmatpush.bf16.msra.mxu2 %v2160_v0  ;;  %2163 = vmatpush.bf16.msra.mxu3 %v2160_v0  ;;  %v2154_v6 = vld [vmem:[%s3242_s1 + $0x8] sm:$0xff]  ;;  %v2153_v7 = vld [vmem:[%s3242_s1] sm:$0xff]  ;;  %s3310_s19 = smov (!%p241_p4, %s2239_s19), 1 }
   0xe   : > { %s3308_s28 = smov (!%p230_p3, %s1793_s28), 255  ;;  %v2298_v26 = vld [vmem:[%s3243_s2] ss:$0 sm:$0xff]  ;;  %s1797_s26 = sshll.u32 %s3310_s19, 3 }
   0xf   : > { %s1794_s10 = sshll.u32 %s3308_s28, 2  ;;  %s1796_s16 = sshll.u32 %s3308_s28, 3 }
  0x10   : > { %830 = vmatpush.bf16.msra.mxu0 %v2159_v1  ;;  %2164 = vmatpush.bf16.msra.mxu1 %v2159_v1  ;;  %s2274_s15 = scalar_lea.vmem %s3241_s0, %s1794_s10  ;;  %s2304_s23 = scalar_lea.vmem %s3244_s3, %s1796_s16 }
  0x11   : > { %2165 = vmatpush.bf16.msra.mxu2 %v2159_v1  ;;  %2166 = vmatpush.bf16.msra.mxu3 %v2159_v1  ;;  %v2089_v8 = vld [vmem:[%s2274_s15] sm:$0xff]  ;;  %v2090_v9 = vld [vmem:[%s2274_s15 + $0x8] sm:$0xff]  ;;  %v2091_v11 = vld [vmem:[%s2274_s15 + $0x10] sm:$0xff]  ;;  %s244_s29 = scalar_lea.vmem %s3245_s4, %s1797_s26  ;;  %s248_s19 = scalar_lea.vmem %s3246_s5, %s1797_s26 }
  0x12   : > { %v2105_v10 = vld [vmem:[%s2274_s15 + $0x80] sm:$0xff]  ;;  %v2106_v12 = vld [vmem:[%s2274_s15 + $0x88] sm:$0xff]  ;;  %v2092_v13 = vld [vmem:[%s2274_s15 + $0x18] sm:$0xff] }
  0x13   : > { %v2107_v14 = vld [vmem:[%s2274_s15 + $0x90] sm:$0xff]  ;;  %v2093_v15 = vld [vmem:[%s2274_s15 + $0x20] sm:$0xff]  ;;  %v2108_v16 = vld [vmem:[%s2274_s15 + $0x98] sm:$0xff] }
  0x14   : > { %831 = vmatpush.bf16.msra.mxu0 %v2158_v2  ;;  %2167 = vmatpush.bf16.msra.mxu1 %v2158_v2  ;;  %v2094_v17 = vld [vmem:[%s2274_s15 + $0x28] sm:$0xff]  ;;  %v2121_v18 = vld [vmem:[%s2274_s15 + $0x100] sm:$0xff]  ;;  %v2095_v20 = vld [vmem:[%s2274_s15 + $0x30] sm:$0xff] }
  0x15   : > { %2168 = vmatpush.bf16.msra.mxu2 %v2158_v2  ;;  %2169 = vmatpush.bf16.msra.mxu3 %v2158_v2  ;;  %v2109_v19 = vld [vmem:[%s2274_s15 + $0xa0] sm:$0xff]  ;;  %v2122_v21 = vld [vmem:[%s2274_s15 + $0x108] sm:$0xff]  ;;  %v2096_v23 = vld [vmem:[%s2274_s15 + $0x38] sm:$0xff] }
  0x16   : > { %v2110_v22 = vld [vmem:[%s2274_s15 + $0xa8] sm:$0xff]  ;;  %v2123_v24 = vld [vmem:[%s2274_s15 + $0x110] sm:$0xff]  ;;  %v2097_v27 = vld [vmem:[%s2274_s15 + $0x40] sm:$0xff] }
  0x17   : > { %v2111_v25 = vld [vmem:[%s2274_s15 + $0xb0] sm:$0xff]  ;;  %v2124_v30 = vld [vmem:[%s2274_s15 + $0x118] sm:$0xff]  ;;  %v2098_v38 = vld [vmem:[%s2274_s15 + $0x48] sm:$0xff] }
  0x18   : > { %832 = vmatpush.bf16.msra.mxu0 %v2157_v3  ;;  %2170 = vmatpush.bf16.msra.mxu1 %v2157_v3  ;;  %v2112_v33 = vld [vmem:[%s2274_s15 + $0xb8] sm:$0xff]  ;;  %v2125_v43 = vld [vmem:[%s2274_s15 + $0x120] sm:$0xff]  ;;  %v2099_v54 = vld [vmem:[%s2274_s15 + $0x50] sm:$0xff] }
  0x19   : > { %2171 = vmatpush.bf16.msra.mxu2 %v2157_v3  ;;  %2172 = vmatpush.bf16.msra.mxu3 %v2157_v3  ;;  %v2137_v44 = vld [vmem:[%s2274_s15 + $0x180] sm:$0xff]  ;;  %v2126_v61 = vld [vmem:[%s2274_s15 + $0x128] sm:$0xff] }
  0x1a   : > { %v2113_v49 = vld [vmem:[%s2274_s15 + $0xc0] sm:$0xff]  ;;  %v2138_v62 = vld [vmem:[%s2274_s15 + $0x188] sm:$0xff] }
  0x1b   : > { %v2114_v3 = vld [vmem:[%s2274_s15 + $0xc8] sm:$0xff] }
  0x1c   : > { %833 = vmatpush.bf16.msra.mxu0 %v2156_v4  ;;  %2173 = vmatpush.bf16.msra.mxu1 %v2156_v4 }
  0x1d   : > { %2174 = vmatpush.bf16.msra.mxu2 %v2156_v4  ;;  %2175 = vmatpush.bf16.msra.mxu3 %v2156_v4 }
  0x20   : > { %834 = vmatpush.bf16.msra.mxu0 %v2155_v5  ;;  %2176 = vmatpush.bf16.msra.mxu1 %v2155_v5 }
  0x21   : > { %2177 = vmatpush.bf16.msra.mxu2 %v2155_v5  ;;  %2178 = vmatpush.bf16.msra.mxu3 %v2155_v5 }
  0x24   : > { %835 = vmatpush.bf16.msra.mxu0 %v2154_v6  ;;  %2179 = vmatpush.bf16.msra.mxu1 %v2154_v6 }
  0x25   : > { %2180 = vmatpush.bf16.msra.mxu2 %v2154_v6  ;;  %2181 = vmatpush.bf16.msra.mxu3 %v2154_v6 }
  0x28   : > { %836 = vmatpush.bf16.msra.mxu0 %v2153_v7  ;;  %2182 = vmatpush.bf16.msra.mxu1 %v2153_v7 }
  0x29   : > { %2183 = vmatpush.bf16.msra.mxu2 %v2153_v7  ;;  %2184 = vmatpush.bf16.msra.mxu3 %v2153_v7 }
  0x2b   : > { %837 = vmatmul.bf16.vlgmr.msra.gmra.mxu0 %v2089_v8  ;;  %917 = vmatmul.bf16.vlgmr.msra.gmra.mxu1 %v2105_v10  ;;  %v2100_v8 = vld [vmem:[%s2274_s15 + $0x58] sm:$0xff] }
  0x2c   : > { %997 = vmatmul.bf16.vlgmr.msra.gmra.mxu2 %v2121_v18  ;;  %1077 = vmatmul.bf16.vlgmr.msra.gmra.mxu3 %v2137_v44 }
  0x3b   : > { %842 = vmatmul.bf16.gmra.mxu0 %v2090_v9  ;;  %922 = vmatmul.bf16.gmra.mxu1 %v2106_v12 }
  0x3c   : > { %1002 = vmatmul.bf16.gmra.mxu2 %v2122_v21  ;;  %1082 = vmatmul.bf16.gmra.mxu3 %v2138_v62  ;;  %v2115_v21 = vld [vmem:[%s2274_s15 + $0xd0] sm:$0xff] }
  0x4b   : > { %847 = vmatmul.bf16.gmra.mxu0 %v2091_v11  ;;  %927 = vmatmul.bf16.gmra.mxu1 %v2107_v14 }
  0x4c   : > { %1007 = vmatmul.bf16.gmra.mxu2 %v2123_v24 }
  0x5b   : > { %852 = vmatmul.bf16.gmra.mxu0 %v2092_v13  ;;  %932 = vmatmul.bf16.gmra.mxu1 %v2108_v16  ;;  %v2139_v16 = vld [vmem:[%s2274_s15 + $0x190] sm:$0xff] }
  0x5c   : > { %1012 = vmatmul.bf16.gmra.mxu2 %v2124_v30  ;;  %1087 = vmatmul.bf16.gmra.mxu3 %v2139_v16 }
  0x6b   : > { %857 = vmatmul.bf16.gmra.mxu0 %v2093_v15  ;;  %937 = vmatmul.bf16.gmra.mxu1 %v2109_v19  ;;  %v2127_v15 = vld [vmem:[%s2274_s15 + $0x130] sm:$0xff] }
  0x6c   : > { %1017 = vmatmul.bf16.gmra.mxu2 %v2125_v43 }
  0x7b   : > { %862 = vmatmul.bf16.gmra.mxu0 %v2094_v17  ;;  %942 = vmatmul.bf16.gmra.mxu1 %v2110_v22 }
  0x7c   : > { %1022 = vmatmul.bf16.gmra.mxu2 %v2126_v61  ;;  %v2117_v61 = vld [vmem:[%s2274_s15 + $0xe0] sm:$0xff] }
  0x8b   : > { %867 = vmatmul.bf16.gmra.mxu0 %v2095_v20  ;;  %947 = vmatmul.bf16.gmra.mxu1 %v2111_v25 }
  0x8c   : > { %1027 = vmatmul.bf16.gmra.mxu2 %v2127_v15  ;;  %v2142_v15 = vld [vmem:[%s2274_s15 + $0x1a8] sm:$0xff] }
  0x9b   : > { %872 = vmatmul.bf16.gmra.mxu0 %v2096_v23  ;;  %952 = vmatmul.bf16.gmra.mxu1 %v2112_v33 }
  0xa8   : > { %v838_v28 = vpop.f32.mrf.mxu0  ;;  %v918_v47 = vpop.f32.mrf.mxu1 }
  0xa9   : > { %v839_v29 = vadd.f32 %v2298_v26, %v838_v28  ;;  %v2321_v53 = vadd.f32 %v2298_v26, %v918_v47 }
  0xab   : > { %1158 = vst [vmem:[%s2304_s23] sm:$0xff] %v839_v29  ;;  %877 = vmatmul.bf16.gmra.mxu0 %v2097_v27  ;;  %v1414_v34 = vmul.f32 %v839_v29, %v839_v29  ;;  %957 = vmatmul.bf16.gmra.mxu1 %v2113_v49  ;;  %v2101_v27 = vld [vmem:[%s2274_s15 + $0x60] sm:$0xff] }
  0xac   : > { %1190 = vst [vmem:[%s2304_s23 + $0x100] sm:$0xff] %v2321_v53 }
  0xb0   : > { %v840_v31 = vpop.f32.mrf.mxu0  ;;  %v920_v56 = vpop.f32.mrf.mxu1 }
  0xb1   : > { %v841_v32 = vadd.f32 %v2298_v26, %v840_v31  ;;  %v2328_v58 = vadd.f32 %v2298_v26, %v920_v56 }
  0xb3   : > { %1159 = vst [vmem:[%s2304_s23 + $0x8] sm:$0xff] %v841_v32  ;;  %v1286_v35 = vadd.f32 %v841_v32, %v839_v29  ;;  %v1415_v36 = vmul.f32 %v841_v32, %v841_v32 }
  0xb4   : > { %1191 = vst [vmem:[%s2304_s23 + $0x108] sm:$0xff] %v2328_v58 }
  0xb5   : > { %v1542_v37 = vadd.f32 %v1415_v36, %v1414_v34  ;;  %v2128_v34 = vld [vmem:[%s2274_s15 + $0x138] sm:$0xff] }
  0xb6   : > { %1032 = vmatmul.bf16.gmra.mxu2 %v2128_v34 }
  0xb8   : > { %v843_v39 = vpop.f32.mrf.mxu0  ;;  %v923_v1 = vpop.f32.mrf.mxu1 }
  0xb9   : > { %v844_v40 = vadd.f32 %v2298_v26, %v843_v39  ;;  %v2339_v7 = vadd.f32 %v2298_v26, %v923_v1 }
  0xbb   : > { %1160 = vst [vmem:[%s2304_s23 + $0x10] sm:$0xff] %v844_v40  ;;  %v1287_v41 = vadd.f32 %v1286_v35, %v844_v40  ;;  %v1416_v42 = vmul.f32 %v844_v40, %v844_v40  ;;  %882 = vmatmul.bf16.gmra.mxu0 %v2098_v38  ;;  %962 = vmatmul.bf16.gmra.mxu1 %v2114_v3  ;;  %v2140_v35 = vld [vmem:[%s2274_s15 + $0x198] sm:$0xff]  ;;  %v2103_v3 = vld [vmem:[%s2274_s15 + $0x70] sm:$0xff] }
  0xbc   : > { %1192 = vst [vmem:[%s2304_s23 + $0x110] sm:$0xff] %v2339_v7  ;;  %1092 = vmatmul.bf16.gmra.mxu3 %v2140_v35  ;;  %v2116_v40 = vld [vmem:[%s2274_s15 + $0xd8] sm:$0xff] }
  0xbd   : > { %v1543_v45 = vadd.f32 %v1542_v37, %v1416_v42 }
  0xc0   : > { %v845_v46 = vpop.f32.mrf.mxu0  ;;  %v925_v10 = vpop.f32.mrf.mxu1 }
  0xc1   : > { %v846_v48 = vadd.f32 %v2298_v26, %v845_v46  ;;  %v2346_v12 = vadd.f32 %v2298_v26, %v925_v10 }
  0xc3   : > { %1161 = vst [vmem:[%s2304_s23 + $0x18] sm:$0xff] %v846_v48  ;;  %v1288_v50 = vadd.f32 %v1287_v41, %v846_v48  ;;  %v1417_v51 = vmul.f32 %v846_v48, %v846_v48 }
  0xc4   : > { %1193 = vst [vmem:[%s2304_s23 + $0x118] sm:$0xff] %v2346_v12 }
  0xc5   : > { %v1544_v52 = vadd.f32 %v1543_v45, %v1417_v51  ;;  %v2102_v45 = vld [vmem:[%s2274_s15 + $0x68] sm:$0xff] }
  0xc8   : > { %v848_v55 = vpop.f32.mrf.mxu0  ;;  %v928_v19 = vpop.f32.mrf.mxu1 }
  0xc9   : > { %v849_v57 = vadd.f32 %v2298_v26, %v848_v55  ;;  %v2357_v25 = vadd.f32 %v2298_v26, %v928_v19 }
  0xcb   : > { %1162 = vst [vmem:[%s2304_s23 + $0x20] sm:$0xff] %v849_v57  ;;  %v1289_v59 = vadd.f32 %v1288_v50, %v849_v57  ;;  %v1418_v60 = vmul.f32 %v849_v57, %v849_v57  ;;  %887 = vmatmul.bf16.gmra.mxu0 %v2099_v54  ;;  %967 = vmatmul.bf16.gmra.mxu1 %v2115_v21  ;;  %v2141_v54 = vld [vmem:[%s2274_s15 + $0x1a0] sm:$0xff]  ;;  %v2118_v21 = vld [vmem:[%s2274_s15 + $0xe8] sm:$0xff] }
  0xcc   : > { %1194 = vst [vmem:[%s2304_s23 + $0x120] sm:$0xff] %v2357_v25  ;;  %1097 = vmatmul.bf16.gmra.mxu3 %v2141_v54 }
  0xcd   : > { %v1545_v63 = vadd.f32 %v1544_v52, %v1418_v60  ;;  %v2129_v52 = vld [vmem:[%s2274_s15 + $0x140] sm:$0xff]  ;;  %v998_v60 = vpop.f32.mrf.mxu2 }
  0xce   : > { %1037 = vmatmul.bf16.gmra.mxu2 %v2129_v52 }
  0xd0   : > { %v850_v0 = vpop.f32.mrf.mxu0  ;;  %v930_v29 = vpop.f32.mrf.mxu1 }
  0xd1   : > { %v851_v2 = vadd.f32 %v2298_v26, %v850_v0  ;;  %v2364_v31 = vadd.f32 %v2298_v26, %v930_v29  ;;  %v2104_v29 = vld [vmem:[%s2274_s15 + $0x78] sm:$0xff] }
  0xd3   : > { %1163 = vst [vmem:[%s2304_s23 + $0x28] sm:$0xff] %v851_v2  ;;  %v1290_v4 = vadd.f32 %v1289_v59, %v851_v2  ;;  %v1419_v5 = vmul.f32 %v851_v2, %v851_v2  ;;  %v2396_v2 = vadd.f32 %v2298_v26, %v998_v60 }
  0xd4   : > { %1195 = vst [vmem:[%s2304_s23 + $0x128] sm:$0xff] %v2364_v31 }
  0xd5   : > { %v1546_v6 = vadd.f32 %v1545_v63, %v1419_v5  ;;  %1222 = vst [vmem:[%s2304_s23 + $0x200] sm:$0xff] %v2396_v2 }
  0xd8   : > { %v853_v9 = vpop.f32.mrf.mxu0  ;;  %v933_v38 = vpop.f32.mrf.mxu1 }
  0xd9   : > { %v854_v11 = vadd.f32 %v2298_v26, %v853_v9  ;;  %v2375_v44 = vadd.f32 %v2298_v26, %v933_v38  ;;  %v1000_v9 = vpop.f32.mrf.mxu2 }
  0xda   : > { %v2408_v10 = vadd.f32 %v2298_v26, %v1000_v9 }
  0xdb   : > { %1164 = vst [vmem:[%s2304_s23 + $0x30] sm:$0xff] %v854_v11  ;;  %v1291_v13 = vadd.f32 %v1290_v4, %v854_v11  ;;  %v1420_v14 = vmul.f32 %v854_v11, %v854_v11  ;;  %892 = vmatmul.bf16.gmra.mxu0 %v2100_v8  ;;  %972 = vmatmul.bf16.gmra.mxu1 %v2116_v40  ;;  %v2143_v40 = vld [vmem:[%s2274_s15 + $0x1b0] sm:$0xff] }
  0xdc   : > { %1196 = vst [vmem:[%s2304_s23 + $0x130] sm:$0xff] %v2375_v44  ;;  %1102 = vmatmul.bf16.gmra.mxu3 %v2142_v15 }
  0xdd   : > { %v1547_v17 = vadd.f32 %v1546_v6, %v1420_v14  ;;  %v2130_v14 = vld [vmem:[%s2274_s15 + $0x148] sm:$0xff]  ;;  %1223 = vst [vmem:[%s2304_s23 + $0x208] sm:$0xff] %v2408_v10 }
  0xde   : > { %1042 = vmatmul.bf16.gmra.mxu2 %v2130_v14 }
  0xe0   : > { %v855_v18 = vpop.f32.mrf.mxu0  ;;  %v935_v47 = vpop.f32.mrf.mxu1 }
  0xe1   : > { %v856_v20 = vadd.f32 %v2298_v26, %v855_v18  ;;  %v2382_v49 = vadd.f32 %v2298_v26, %v935_v47  ;;  %v2119_v47 = vld [vmem:[%s2274_s15 + $0xf0] sm:$0xff] }
  0xe3   : > { %1165 = vst [vmem:[%s2304_s23 + $0x38] sm:$0xff] %v856_v20  ;;  %v1292_v22 = vadd.f32 %v1291_v13, %v856_v20  ;;  %v1421_v23 = vmul.f32 %v856_v20, %v856_v20  ;;  %v1003_v20 = vpop.f32.mrf.mxu2 }
  0xe4   : > { %1197 = vst [vmem:[%s2304_s23 + $0x138] sm:$0xff] %v2382_v49 }
  0xe5   : > { %v1548_v24 = vadd.f32 %v1547_v17, %v1421_v23 }
  0xe8   : > { %v858_v28 = vpop.f32.mrf.mxu0  ;;  %v938_v57 = vpop.f32.mrf.mxu1 }
  0xe9   : > { %v859_v30 = vadd.f32 %v2298_v26, %v858_v28  ;;  %v2393_v1 = vadd.f32 %v2298_v26, %v938_v57  ;;  %v2424_v28 = vadd.f32 %v2298_v26, %v1003_v20 }
  0xeb   : > { %1166 = vst [vmem:[%s2304_s23 + $0x40] sm:$0xff] %v859_v30  ;;  %v1293_v32 = vadd.f32 %v1292_v22, %v859_v30  ;;  %v1422_v33 = vmul.f32 %v859_v30, %v859_v30  ;;  %897 = vmatmul.bf16.gmra.mxu0 %v2101_v27  ;;  %977 = vmatmul.bf16.gmra.mxu1 %v2117_v61  ;;  %v1005_v35 = vpop.f32.mrf.mxu2 }
  0xec   : > { %1198 = vst [vmem:[%s2304_s23 + $0x140] sm:$0xff] %v2393_v1  ;;  %1107 = vmatmul.bf16.gmra.mxu3 %v2143_v40 }
  0xed   : > { %v1549_v36 = vadd.f32 %v1548_v24, %v1422_v33  ;;  %1224 = vst [vmem:[%s2304_s23 + $0x210] sm:$0xff] %v2424_v28 }
  0xf0   : > { %v860_v37 = vpop.f32.mrf.mxu0  ;;  %v940_v5 = vpop.f32.mrf.mxu1 }
  0xf1   : > { %v861_v39 = vadd.f32 %v2298_v26, %v860_v37  ;;  %v2405_v8 = vadd.f32 %v2298_v26, %v940_v5 }
  0xf3   : > { %1167 = vst [vmem:[%s2304_s23 + $0x48] sm:$0xff] %v861_v39  ;;  %v1294_v41 = vadd.f32 %v1293_v32, %v861_v39  ;;  %v1423_v42 = vmul.f32 %v861_v39, %v861_v39  ;;  %v2131_v39 = vld [vmem:[%s2274_s15 + $0x150] sm:$0xff] }
  0xf4   : > { %1199 = vst [vmem:[%s2304_s23 + $0x148] sm:$0xff] %v2405_v8  ;;  %1047 = vmatmul.bf16.gmra.mxu2 %v2131_v39 }
  0xf5   : > { %v1550_v43 = vadd.f32 %v1549_v36, %v1423_v42  ;;  %v2436_v36 = vadd.f32 %v2298_v26, %v1005_v35 }
  0xf7   : > { %1225 = vst [vmem:[%s2304_s23 + $0x218] sm:$0xff] %v2436_v36 }
  0xf8   : > { %v863_v46 = vpop.f32.mrf.mxu0  ;;  %v943_v18 = vpop.f32.mrf.mxu1 }
  0xf9   : > { %v864_v48 = vadd.f32 %v2298_v26, %v863_v46  ;;  %v2421_v27 = vadd.f32 %v2298_v26, %v943_v18  ;;  %v1008_v46 = vpop.f32.mrf.mxu2 }
  0xfa   : > { %v2452_v54 = vadd.f32 %v2298_v26, %v1008_v46 }
  0xfb   : > { %1168 = vst [vmem:[%s2304_s23 + $0x50] sm:$0xff] %v864_v48  ;;  %v1295_v50 = vadd.f32 %v1294_v41, %v864_v48  ;;  %v1424_v51 = vmul.f32 %v864_v48, %v864_v48  ;;  %902 = vmatmul.bf16.gmra.mxu0 %v2102_v45  ;;  %982 = vmatmul.bf16.gmra.mxu1 %v2118_v21 }
  0xfc   : > { %1200 = vst [vmem:[%s2304_s23 + $0x150] sm:$0xff] %v2421_v27 }
  0xfd   : > { %v1551_v55 = vadd.f32 %v1550_v43, %v1424_v51  ;;  %1226 = vst [vmem:[%s2304_s23 + $0x220] sm:$0xff] %v2452_v54 }
 0x100   : > { %v865_v56 = vpop.f32.mrf.mxu0  ;;  %v945_v32 = vpop.f32.mrf.mxu1 }
 0x101   : > { %v866_v59 = vadd.f32 %v2298_v26, %v865_v56  ;;  %v2433_v34 = vadd.f32 %v2298_v26, %v945_v32  ;;  %v1010_v60 = vpop.f32.mrf.mxu2  ;;  %v2133_v32 = vld [vmem:[%s2274_s15 + $0x160] sm:$0xff] }
 0x102   : > { %v2463_v61 = vadd.f32 %v2298_v26, %v1010_v60 }
 0x103   : > { %1169 = vst [vmem:[%s2304_s23 + $0x58] sm:$0xff] %v866_v59  ;;  %v1296_v62 = vadd.f32 %v1295_v50, %v866_v59  ;;  %v1425_v63 = vmul.f32 %v866_v59, %v866_v59 }
 0x104   : > { %1201 = vst [vmem:[%s2304_s23 + $0x158] sm:$0xff] %v2433_v34 }
 0x105   : > { %v1552_v0 = vadd.f32 %v1551_v55, %v1425_v63  ;;  %1227 = vst [vmem:[%s2304_s23 + $0x228] sm:$0xff] %v2463_v61 }
 0x108   : > { %v868_v4 = vpop.f32.mrf.mxu0  ;;  %v948_v43 = vpop.f32.mrf.mxu1 }
 0x109   : > { %v869_v6 = vadd.f32 %v2298_v26, %v868_v4  ;;  %v2449_v52 = vadd.f32 %v2298_v26, %v948_v43 }
 0x10b   : > { %1170 = vst [vmem:[%s2304_s23 + $0x60] sm:$0xff] %v869_v6  ;;  %v1297_v11 = vadd.f32 %v1296_v62, %v869_v6  ;;  %v1426_v13 = vmul.f32 %v869_v6, %v869_v6  ;;  %907 = vmatmul.bf16.gmra.mxu0 %v2103_v3  ;;  %987 = vmatmul.bf16.gmra.mxu1 %v2119_v47  ;;  %v2144_v3 = vld [vmem:[%s2274_s15 + $0x1b8] sm:$0xff] }
 0x10c   : > { %1202 = vst [vmem:[%s2304_s23 + $0x160] sm:$0xff] %v2449_v52  ;;  %1112 = vmatmul.bf16.gmra.mxu3 %v2144_v3 }
 0x10d   : > { %v1553_v16 = vadd.f32 %v1552_v0, %v1426_v13  ;;  %v2132_v0 = vld [vmem:[%s2274_s15 + $0x158] sm:$0xff] }
 0x10e   : > { %1052 = vmatmul.bf16.gmra.mxu2 %v2132_v0  ;;  %v2120_v13 = vld [vmem:[%s2274_s15 + $0xf8] sm:$0xff] }
 0x110   : > { %v870_v17 = vpop.f32.mrf.mxu0  ;;  %v950_v56 = vpop.f32.mrf.mxu1 }
 0x111   : > { %v871_v19 = vadd.f32 %v2298_v26, %v870_v17  ;;  %v2460_v59 = vadd.f32 %v2298_v26, %v950_v56 }
 0x113   : > { %1171 = vst [vmem:[%s2304_s23 + $0x68] sm:$0xff] %v871_v19  ;;  %v1298_v22 = vadd.f32 %v1297_v11, %v871_v19  ;;  %v1427_v23 = vmul.f32 %v871_v19, %v871_v19  ;;  %v1013_v11 = vpop.f32.mrf.mxu2 }
 0x114   : > { %1203 = vst [vmem:[%s2304_s23 + $0x168] sm:$0xff] %v2460_v59  ;;  %v2479_v18 = vadd.f32 %v2298_v26, %v1013_v11 }
 0x115   : > { %v1554_v24 = vadd.f32 %v1553_v16, %v1427_v23 }
 0x116   : > { %1228 = vst [vmem:[%s2304_s23 + $0x230] sm:$0xff] %v2479_v18 }
 0x118   : > { %v873_v30 = vpop.f32.mrf.mxu0  ;;  %v953_v6 = vpop.f32.mrf.mxu1 }
 0x119   : > { %v874_v33 = vadd.f32 %v2298_v26, %v873_v30  ;;  %v2476_v17 = vadd.f32 %v2298_v26, %v953_v6 }
 0x11b   : > { %1172 = vst [vmem:[%s2304_s23 + $0x70] sm:$0xff] %v874_v33  ;;  %v1299_v37 = vadd.f32 %v1298_v22, %v874_v33  ;;  %v1428_v38 = vmul.f32 %v874_v33, %v874_v33  ;;  %912 = vmatmul.bf16.gmra.mxu0 %v2104_v29  ;;  %992 = vmatmul.bf16.gmra.mxu1 %v2120_v13  ;;  %v1015_v23 = vpop.f32.mrf.mxu2  ;;  %v2145_v33 = vld [vmem:[%s2274_s15 + $0x1c0] sm:$0xff] }
 0x11c   : > { %1204 = vst [vmem:[%s2304_s23 + $0x170] sm:$0xff] %v2476_v17  ;;  %1117 = vmatmul.bf16.gmra.mxu3 %v2145_v33 }
 0x11d   : > { %v1555_v41 = vadd.f32 %v1554_v24, %v1428_v38  ;;  %v2490_v24 = vadd.f32 %v2298_v26, %v1015_v23 }
 0x11e   : > { %1057 = vmatmul.bf16.gmra.mxu2 %v2133_v32 }
 0x11f   : > { %1229 = vst [vmem:[%s2304_s23 + $0x238] sm:$0xff] %v2490_v24 }
 0x120   : > { %v875_v42 = vpop.f32.mrf.mxu0  ;;  %v955_v20 = vpop.f32.mrf.mxu1 }
 0x121   : > { %v876_v45 = vadd.f32 %v2298_v26, %v875_v42  ;;  %v2487_v22 = vadd.f32 %v2298_v26, %v955_v20 }
 0x123   : > { %1173 = vst [vmem:[%s2304_s23 + $0x78] sm:$0xff] %v876_v45  ;;  %v1300_v48 = vadd.f32 %v1299_v37, %v876_v45  ;;  %v1429_v50 = vmul.f32 %v876_v45, %v876_v45  ;;  %v1018_v40 = vpop.f32.mrf.mxu2 }
 0x124   : > { %1205 = vst [vmem:[%s2304_s23 + $0x178] sm:$0xff] %v2487_v22  ;;  %v2505_v47 = vadd.f32 %v2298_v26, %v1018_v40 }
 0x125   : > { %v1556_v51 = vadd.f32 %v1555_v41, %v1429_v50  ;;  %v1078_v41 = vpop.f32.mrf.mxu3 }
 0x126   : > { %1230 = vst [vmem:[%s2304_s23 + $0x240] sm:$0xff] %v2505_v47 }
 0x128   : > { %v878_v55 = vpop.f32.mrf.mxu0  ;;  %v958_v38 = vpop.f32.mrf.mxu1 }
 0x129   : > { %v879_v57 = vadd.f32 %v2298_v26, %v878_v55  ;;  %v2502_v46 = vadd.f32 %v2298_v26, %v958_v38  ;;  %v2135_v38 = vld [vmem:[%s2274_s15 + $0x170] sm:$0xff] }
 0x12b   : > { %1174 = vst [vmem:[%s2304_s23 + $0x80] sm:$0xff] %v879_v57  ;;  %v1301_v62 = vadd.f32 %v1300_v48, %v879_v57  ;;  %v1430_v63 = vmul.f32 %v879_v57, %v879_v57  ;;  %v2508_v48 = vadd.f32 %v2298_v26, %v1078_v41  ;;  %v1020_v57 = vpop.f32.mrf.mxu2 }
 0x12c   : > { %1206 = vst [vmem:[%s2304_s23 + $0x180] sm:$0xff] %v2502_v46 }
 0x12d   : > { %v1557_v4 = vadd.f32 %v1556_v51, %v1430_v63  ;;  %3277 = vst [vmem:[#allocation2_spill] sm:$0xff] %v2508_v48  ;;  %v1080_v60 = vpop.f32.mrf.mxu3 }
 0x12e   : > { %1254 = vst [vmem:[%s2304_s23 + $0x300] sm:$0xff] %v2508_v48  ;;  %v2524_v63 = vadd.f32 %v2298_v26, %v1080_v60 }
 0x130   : > { %v880_v5 = vpop.f32.mrf.mxu0  ;;  %v960_v51 = vpop.f32.mrf.mxu1  ;;  %3278 = vst [vmem:[#allocation3_spill] sm:$0xff] %v2524_v63 }
 0x131   : > { %v881_v9 = vadd.f32 %v2298_v26, %v880_v5  ;;  %v2518_v56 = vadd.f32 %v2298_v26, %v960_v51  ;;  %v2146_v5 = vld [vmem:[%s2274_s15 + $0x1c8] sm:$0xff]  ;;  %1255 = vst [vmem:[%s2304_s23 + $0x308] sm:$0xff] %v2524_v63 }
 0x132   : > { %1122 = vmatmul.bf16.gmra.mxu3 %v2146_v5  ;;  %v2150_v63 = vld [vmem:[%s2274_s15 + $0x1e8] sm:$0xff] }
 0x133   : > { %1175 = vst [vmem:[%s2304_s23 + $0x88] sm:$0xff] %v881_v9  ;;  %v1302_v14 = vadd.f32 %v1301_v62, %v881_v9  ;;  %v1431_v15 = vmul.f32 %v881_v9, %v881_v9  ;;  %v2521_v62 = vadd.f32 %v2298_v26, %v1020_v57 }
 0x134   : > { %1207 = vst [vmem:[%s2304_s23 + $0x188] sm:$0xff] %v2518_v56 }
 0x135   : > { %v1558_v16 = vadd.f32 %v1557_v4, %v1431_v15  ;;  %v2134_v4 = vld [vmem:[%s2274_s15 + $0x168] sm:$0xff]  ;;  %1231 = vst [vmem:[%s2304_s23 + $0x248] sm:$0xff] %v2521_v62  ;;  %v1083_v15 = vpop.f32.mrf.mxu3 }
 0x136   : > { %1062 = vmatmul.bf16.gmra.mxu2 %v2134_v4  ;;  %v2551_v20 = vadd.f32 %v2298_v26, %v1083_v15  ;;  %v2136_v15 = vld [vmem:[%s2274_s15 + $0x178] sm:$0xff] }
 0x138   : > { %v883_v19 = vpop.f32.mrf.mxu0  ;;  %v963_v11 = vpop.f32.mrf.mxu1  ;;  %3279 = vst [vmem:[#allocation4_spill] sm:$0xff] %v2551_v20 }
 0x139   : > { %v884_v21 = vadd.f32 %v2298_v26, %v883_v19  ;;  %1256 = vst [vmem:[%s2304_s23 + $0x310] sm:$0xff] %v2551_v20 }
 0x13b   : > { %1176 = vst [vmem:[%s2304_s23 + $0x90] sm:$0xff] %v884_v21  ;;  %v1303_v29 = vadd.f32 %v1302_v14, %v884_v21  ;;  %v1432_v30 = vmul.f32 %v884_v21, %v884_v21  ;;  %v1023_v14 = vpop.f32.mrf.mxu2 }
 0x13c   : > { %v2548_v19 = vadd.f32 %v2298_v26, %v1023_v14 }
 0x13d   : > { %v1559_v35 = vadd.f32 %v1558_v16, %v1432_v30  ;;  %v2545_v16 = vadd.f32 %v2298_v26, %v963_v11  ;;  %v1085_v33 = vpop.f32.mrf.mxu3 }
 0x13e   : > { %1232 = vst [vmem:[%s2304_s23 + $0x250] sm:$0xff] %v2548_v19 }
 0x13f   : > { %1208 = vst [vmem:[%s2304_s23 + $0x190] sm:$0xff] %v2545_v16 }
 0x140   : > { %v885_v37 = vpop.f32.mrf.mxu0  ;;  %v965_v23 = vpop.f32.mrf.mxu1 }
 0x141   : > { %v886_v39 = vadd.f32 %v2298_v26, %v885_v37  ;;  %v2563_v30 = vadd.f32 %v2298_v26, %v965_v23  ;;  %v2569_v37 = vadd.f32 %v2298_v26, %v1085_v33 }
 0x143   : > { %1177 = vst [vmem:[%s2304_s23 + $0x98] sm:$0xff] %v886_v39  ;;  %v1304_v42 = vadd.f32 %v1303_v29, %v886_v39  ;;  %v1433_v43 = vmul.f32 %v886_v39, %v886_v39  ;;  %v1025_v32 = vpop.f32.mrf.mxu2  ;;  %v2147_v39 = vld [vmem:[%s2274_s15 + $0x1d0] sm:$0xff] }
 0x144   : > { %3280 = vst [vmem:[#allocation5_spill] sm:$0xff] %v2569_v37  ;;  %1127 = vmatmul.bf16.gmra.mxu3 %v2147_v39 }
 0x145   : > { %v1560_v45 = vadd.f32 %v1559_v35, %v1433_v43  ;;  %v2566_v35 = vadd.f32 %v2298_v26, %v1025_v32  ;;  %1209 = vst [vmem:[%s2304_s23 + $0x198] sm:$0xff] %v2563_v30 }
 0x146   : > { %1067 = vmatmul.bf16.gmra.mxu2 %v2135_v38  ;;  %1257 = vst [vmem:[%s2304_s23 + $0x318] sm:$0xff] %v2569_v37 }
 0x147   : > { %1233 = vst [vmem:[%s2304_s23 + $0x258] sm:$0xff] %v2566_v35 }
 0x148   : > { %v888_v50 = vpop.f32.mrf.mxu0  ;;  %v968_v41 = vpop.f32.mrf.mxu1 }
 0x149   : > { %v889_v55 = vadd.f32 %v2298_v26, %v888_v50  ;;  %v2587_v50 = vadd.f32 %v2298_v26, %v968_v41 }
 0x14b   : > { %1178 = vst [vmem:[%s2304_s23 + $0xa0] sm:$0xff] %v889_v55  ;;  %v2527_v0 = vadd.f32 %v1304_v42, %v889_v55  ;;  %v1434_v3 = vmul.f32 %v889_v55, %v889_v55  ;;  %v1028_v43 = vpop.f32.mrf.mxu2 }
 0x14c   : > { %v2590_v51 = vadd.f32 %v2298_v26, %v1028_v43  ;;  %1210 = vst [vmem:[%s2304_s23 + $0x1a0] sm:$0xff] %v2587_v50 }
 0x14d   : > { %v2533_v6 = vadd.f32 %v1560_v45, %v1434_v3  ;;  %v1088_v45 = vpop.f32.mrf.mxu3 }
 0x14e   : > { %v2593_v55 = vadd.f32 %v2298_v26, %v1088_v45  ;;  %1234 = vst [vmem:[%s2304_s23 + $0x260] sm:$0xff] %v2590_v51 }
 0x150   : > { %v890_v9 = vpop.f32.mrf.mxu0  ;;  %3281 = vst [vmem:[#allocation6_spill] sm:$0xff] %v2593_v55  ;;  %v970_v60 = vpop.f32.mrf.mxu1 }
 0x151   : > { %v2540_v13 = vadd.f32 %v2298_v26, %v890_v9  ;;  %1258 = vst [vmem:[%s2304_s23 + $0x320] sm:$0xff] %v2593_v55  ;;  %v2605_v4 = vadd.f32 %v2298_v26, %v970_v60 }
 0x153   : > { %1179 = vst [vmem:[%s2304_s23 + $0xa8] sm:$0xff] %v2540_v13  ;;  %v1030_v5 = vpop.f32.mrf.mxu2 }
 0x154   : > { %v2608_v11 = vadd.f32 %v2298_v26, %v1030_v5  ;;  %1211 = vst [vmem:[%s2304_s23 + $0x1a8] sm:$0xff] %v2605_v4 }
 0x155   : > { %v1090_v9 = vpop.f32.mrf.mxu3 }
 0x156   : > { %3282 = vst [vmem:[#allocation7_spill] sm:$0xff] %v2608_v11  ;;  %v2611_v14 = vadd.f32 %v2298_v26, %v1090_v9  ;;  %1072 = vmatmul.bf16.gmra.mxu2 %v2136_v15 }
 0x157   : > { %1235 = vst [vmem:[%s2304_s23 + $0x268] sm:$0xff] %v2608_v11 }
 0x158   : > { %v893_v21 = vpop.f32.mrf.mxu0  ;;  %3283 = vst [vmem:[#allocation8_spill] sm:$0xff] %v2611_v14  ;;  %v973_v32 = vpop.f32.mrf.mxu1 }
 0x159   : > { %v2558_v29 = vadd.f32 %v2298_v26, %v893_v21  ;;  %v2148_v21 = vld [vmem:[%s2274_s15 + $0x1d8] sm:$0xff]  ;;  %1259 = vst [vmem:[%s2304_s23 + $0x328] sm:$0xff] %v2611_v14 }
 0x15a   : > { %1132 = vmatmul.bf16.gmra.mxu3 %v2148_v21 }
 0x15b   : > { %1180 = vst [vmem:[%s2304_s23 + $0xb0] sm:$0xff] %v2558_v29  ;;  %v1033_v38 = vpop.f32.mrf.mxu2 }
 0x15c   : > { %v2632_v41 = vadd.f32 %v2298_v26, %v1033_v38 }
 0x15d   : > { %v1093_v39 = vpop.f32.mrf.mxu3 }
 0x15e   : > { %3284 = vst [vmem:[#allocation9_spill] sm:$0xff] %v2632_v41  ;;  %v2635_v43 = vadd.f32 %v2298_v26, %v1093_v39 }
 0x15f   : > { %1236 = vst [vmem:[%s2304_s23 + $0x270] sm:$0xff] %v2632_v41 }
 0x160   : > { %v895_v40 = vpop.f32.mrf.mxu0  ;;  %3285 = vst [vmem:[#allocation10_spill] sm:$0xff] %v2635_v43 }
 0x161   : > { %v2582_v42 = vadd.f32 %v2298_v26, %v895_v40  ;;  %v2629_v40 = vadd.f32 %v2298_v26, %v973_v32  ;;  %1260 = vst [vmem:[%s2304_s23 + $0x330] sm:$0xff] %v2635_v43  ;;  %v2149_v32 = vld [vmem:[%s2274_s15 + $0x1e0] sm:$0xff] }
 0x163   : > { %1181 = vst [vmem:[%s2304_s23 + $0xb8] sm:$0xff] %v2582_v42  ;;  %v1035_v9 = vpop.f32.mrf.mxu2  ;;  %v1437_v48 = vmul.f32 %v2582_v42, %v2582_v42 }
 0x164   : > { %1212 = vst [vmem:[%s2304_s23 + $0x1b0] sm:$0xff] %v2629_v40  ;;  %v2650_v21 = vadd.f32 %v2298_v26, %v1035_v9 }
 0x165   : > { %v1095_v15 = vpop.f32.mrf.mxu3 }
 0x166   : > { %3286 = vst [vmem:[#allocation11_spill] sm:$0xff] %v2650_v21 }
 0x167   : > { %1237 = vst [vmem:[%s2304_s23 + $0x278] sm:$0xff] %v2650_v21 }
 0x168   : > { %v898_v57 = vpop.f32.mrf.mxu0 }
 0x169   : > { %v2600_v3 = vadd.f32 %v2298_v26, %v898_v57  ;;  %v975_v57 = vpop.f32.mrf.mxu1 }
 0x16a   : > { %v2647_v5 = vadd.f32 %v2298_v26, %v975_v57  ;;  %1137 = vmatmul.bf16.gmra.mxu3 %v2149_v32 }
 0x16b   : > { %1182 = vst [vmem:[%s2304_s23 + $0xc0] sm:$0xff] %v2600_v3  ;;  %v1038_v57 = vpop.f32.mrf.mxu2 }
 0x16c   : > { %1213 = vst [vmem:[%s2304_s23 + $0x1b8] sm:$0xff] %v2647_v5 }
 0x16d   : > { %v1098_v9 = vpop.f32.mrf.mxu3 }
 0x170   : > { %v900_v23 = vpop.f32.mrf.mxu0 }
 0x171   : > { %v2624_v33 = vadd.f32 %v2298_v26, %v900_v23  ;;  %v2653_v23 = vadd.f32 %v2298_v26, %v1095_v15  ;;  %v978_v39 = vpop.f32.mrf.mxu1 }
 0x172   : > { %v2668_v32 = vadd.f32 %v2298_v26, %v978_v39 }
 0x173   : > { %1183 = vst [vmem:[%s2304_s23 + $0xc8] sm:$0xff] %v2624_v33  ;;  %v1040_v55 = vpop.f32.mrf.mxu2 }
 0x174   : > { %3287 = vst [vmem:[#allocation12_spill] sm:$0xff] %v2653_v23  ;;  %v2686_v39 = vadd.f32 %v2298_v26, %v1040_v55 }
 0x175   : > { %1261 = vst [vmem:[%s2304_s23 + $0x338] sm:$0xff] %v2653_v23  ;;  %v2671_v23 = vadd.f32 %v2298_v26, %v1038_v57  ;;  %v1100_v37 = vpop.f32.mrf.mxu3 }
 0x176   : > { %1214 = vst [vmem:[%s2304_s23 + $0x1c0] sm:$0xff] %v2668_v32  ;;  %v2691_v57 = vadd.f32 %v2298_v26, %v1100_v37 }
 0x177   : > { %3288 = vst [vmem:[#allocation13_spill] sm:$0xff] %v2671_v23 }
 0x178   : > { %v903_v45 = vpop.f32.mrf.mxu0  ;;  %3290 = vst [vmem:[#allocation15_spill] sm:$0xff] %v2686_v39 }
 0x179   : > { %v2642_v60 = vadd.f32 %v2298_v26, %v903_v45  ;;  %v980_v43 = vpop.f32.mrf.mxu1  ;;  %1238 = vst [vmem:[%s2304_s23 + $0x280] sm:$0xff] %v2671_v23 }
 0x17a   : > { %v2678_v20 = vadd.f32 %v2298_v26, %v980_v43  ;;  %3291 = vst [vmem:[#allocation16_spill] sm:$0xff] %v2691_v57  ;;  %1142 = vmatmul.bf16.gmra.mxu3 %v2150_v63  ;;  %v1436_v43 = vmul.f32 %v2558_v29, %v2558_v29 }
 0x17b   : > { %1184 = vst [vmem:[%s2304_s23 + $0xd0] sm:$0xff] %v2642_v60 }
 0x17c   : > { %1215 = vst [vmem:[%s2304_s23 + $0x1c8] sm:$0xff] %v2678_v20 }
 0x17d   : > { %1239 = vst [vmem:[%s2304_s23 + $0x288] sm:$0xff] %v2686_v39  ;;  %v1103_v41 = vpop.f32.mrf.mxu3  ;;  %v1439_v39 = vmul.f32 %v2624_v33, %v2624_v33 }
 0x17e   : > { %1263 = vst [vmem:[%s2304_s23 + $0x348] sm:$0xff] %v2691_v57 }
 0x180   : > { %v905_v38 = vpop.f32.mrf.mxu0 }
 0x181   : > { %v906_v45 = vadd.f32 %v2298_v26, %v905_v38  ;;  %v2674_v38 = vadd.f32 %v2298_v26, %v1098_v9  ;;  %v1306_v9 = vadd.f32 %v2527_v0, %v2540_v13  ;;  %v983_v63 = vpop.f32.mrf.mxu1 }
 0x183   : > { %1185 = vst [vmem:[%s2304_s23 + $0xd8] sm:$0xff] %v906_v45  ;;  %v1307_v37 = vadd.f32 %v1306_v9, %v2558_v29 }
 0x184   : > { %3289 = vst [vmem:[#allocation14_spill] sm:$0xff] %v2674_v38 }
 0x185   : > { %1262 = vst [vmem:[%s2304_s23 + $0x340] sm:$0xff] %v2674_v38  ;;  %v1043_v38 = vpop.f32.mrf.mxu2 }
 0x188   : > { %v908_v15 = vpop.f32.mrf.mxu0 }
 0x189   : > { %v909_v14 = vadd.f32 %v2298_v26, %v908_v15  ;;  %v1435_v15 = vmul.f32 %v2540_v13, %v2540_v13  ;;  %v1438_v13 = vmul.f32 %v2600_v3, %v2600_v3 }
 0x18b   : > { %1186 = vst [vmem:[%s2304_s23 + $0xe0] sm:$0xff] %v909_v14  ;;  %v1562_v55 = vadd.f32 %v2533_v6, %v1435_v15  ;;  %v1308_v6 = vadd.f32 %v1307_v37, %v2582_v42  ;;  %v985_v42 = vpop.f32.mrf.mxu1 }
 0x18d   : > { %v1563_v0 = vadd.f32 %v1562_v55, %v1436_v43  ;;  %v1309_v11 = vadd.f32 %v1308_v6, %v2600_v3  ;;  %v1441_v55 = vmul.f32 %v906_v45, %v906_v45  ;;  %v2726_v3 = vadd.f32 %v2298_v26, %v1043_v38  ;;  %v1105_v6 = vpop.f32.mrf.mxu3 }
 0x18f   : > { %v1564_v15 = vadd.f32 %v1563_v0, %v1437_v48  ;;  %v1310_v9 = vadd.f32 %v1309_v11, %v2624_v33  ;;  %v2723_v0 = vadd.f32 %v2298_v26, %v983_v63  ;;  %v2729_v33 = vadd.f32 %v2298_v26, %v1103_v41  ;;  %1240 = vst [vmem:[%s2304_s23 + $0x290] sm:$0xff] %v2726_v3 }
 0x190   : > { %v910_v23 = vpop.f32.mrf.mxu0  ;;  %v2744_v41 = vadd.f32 %v2298_v26, %v1105_v6 }
 0x191   : > { %v911_v21 = vadd.f32 %v2298_v26, %v910_v23  ;;  %v1565_v29 = vadd.f32 %v1564_v15, %v1438_v13  ;;  %v1440_v23 = vmul.f32 %v2642_v60, %v2642_v60  ;;  %v1311_v48 = vadd.f32 %v1310_v9, %v2642_v60  ;;  %v1045_v13 = vpop.f32.mrf.mxu2  ;;  %1216 = vst [vmem:[%s2304_s23 + $0x1d0] sm:$0xff] %v2723_v0 }
 0x192   : > { %v1442_v15 = vmul.f32 %v909_v14, %v909_v14  ;;  %v2733_v60 = vadd.f32 %v2298_v26, %v985_v42  ;;  %v2739_v38 = vadd.f32 %v2298_v26, %v1045_v13  ;;  %1264 = vst [vmem:[%s2304_s23 + $0x350] sm:$0xff] %v2729_v33 }
 0x193   : > { %1187 = vst [vmem:[%s2304_s23 + $0xe8] sm:$0xff] %v911_v21  ;;  %v1566_v43 = vadd.f32 %v1565_v29, %v1439_v39  ;;  %v1312_v39 = vadd.f32 %v1311_v48, %v906_v45 }
 0x194   : > { %1217 = vst [vmem:[%s2304_s23 + $0x1d8] sm:$0xff] %v2733_v60 }
 0x195   : > { %v1567_v11 = vadd.f32 %v1566_v43, %v1440_v23  ;;  %v1313_v29 = vadd.f32 %v1312_v39, %v909_v14  ;;  %v1443_v23 = vmul.f32 %v911_v21, %v911_v21  ;;  %1241 = vst [vmem:[%s2304_s23 + $0x298] sm:$0xff] %v2739_v38  ;;  %v988_v14 = vpop.f32.mrf.mxu1 }
 0x196   : > { %1265 = vst [vmem:[%s2304_s23 + $0x358] sm:$0xff] %v2744_v41 }
 0x197   : > { %v1568_v63 = vadd.f32 %v1567_v11, %v1441_v55  ;;  %v1314_v9 = vadd.f32 %v1313_v29, %v911_v21  ;;  %v1108_v11 = vpop.f32.mrf.mxu3  ;;  %v1446_v21 = vmul.f32 %v2321_v53, %v2321_v53 }
 0x198   : > { %v913_v57 = vpop.f32.mrf.mxu0 }
 0x199   : > { %v914_v37 = vadd.f32 %v2298_v26, %v913_v57  ;;  %v2151_v57 = vld [vmem:[%s2274_s15 + $0x1f0] sm:$0xff]  ;;  %v1569_v45 = vadd.f32 %v1568_v63, %v1442_v15  ;;  %v1048_v6 = vpop.f32.mrf.mxu2 }
 0x19a   : > { %1147 = vmatmul.bf16.gmra.mxu3 %v2151_v57 }
 0x19b   : > { %1188 = vst [vmem:[%s2304_s23 + $0xf0] sm:$0xff] %v914_v37  ;;  %v1444_v43 = vmul.f32 %v914_v37, %v914_v37  ;;  %v1570_v42 = vadd.f32 %v1569_v45, %v1443_v23  ;;  %v1315_v48 = vadd.f32 %v1314_v9, %v914_v37  ;;  %v1447_v23 = vmul.f32 %v2328_v58, %v2328_v58 }
 0x19c   : > { %v1448_v9 = vmul.f32 %v2339_v7, %v2339_v7 }
 0x19d   : > { %v1571_v39 = vadd.f32 %v1570_v42, %v1444_v43  ;;  %v990_v43 = vpop.f32.mrf.mxu1 }
 0x1a0   : > { %v915_v55 = vpop.f32.mrf.mxu0 }
 0x1a1   : > { %v916_v13 = vadd.f32 %v2298_v26, %v915_v55 }
 0x1a3   : > { %1189 = vst [vmem:[%s2304_s23 + $0xf8] sm:$0xff] %v916_v13  ;;  %v1316_v57 = vadd.f32 %v1315_v48, %v916_v13  ;;  %v1445_v15 = vmul.f32 %v916_v13, %v916_v13  ;;  %v2766_v48 = vadd.f32 %v2298_v26, %v988_v14  ;;  %v1050_v13 = vpop.f32.mrf.mxu2 }
 0x1a5   : > { %v1317_v63 = vadd.f32 %v1316_v57, %v2321_v53  ;;  %v1572_v29 = vadd.f32 %v1571_v39, %v1445_v15  ;;  %v2769_v53 = vadd.f32 %v2298_v26, %v1048_v6  ;;  %v1110_v39 = vpop.f32.mrf.mxu3  ;;  %v2775_v57 = vadd.f32 %v2298_v26, %v990_v43  ;;  %1218 = vst [vmem:[%s2304_s23 + $0x1e0] sm:$0xff] %v2766_v48 }
 0x1a6   : > { %v2783_v6 = vadd.f32 %v2298_v26, %v1050_v13  ;;  %v1453_v13 = vmul.f32 %v2382_v49, %v2382_v49 }
 0x1a7   : > { %v1318_v37 = vadd.f32 %v1317_v63, %v2328_v58  ;;  %v1573_v45 = vadd.f32 %v1572_v29, %v1446_v21  ;;  %v2772_v58 = vadd.f32 %v2298_v26, %v1108_v11  ;;  %v2152_v21 = vld [vmem:[%s2274_s15 + $0x1f8] sm:$0xff]  ;;  %1242 = vst [vmem:[%s2304_s23 + $0x2a0] sm:$0xff] %v2769_v53  ;;  %v2789_v11 = vadd.f32 %v2298_v26, %v1110_v39  ;;  %v993_v26 = vpop.f32.mrf.mxu1 }
 0x1a8   : > { %v1450_v63 = vmul.f32 %v2357_v25, %v2357_v25  ;;  %1219 = vst [vmem:[%s2304_s23 + $0x1e8] sm:$0xff] %v2775_v57 }
 0x1a9   : > { %v1319_v55 = vadd.f32 %v1318_v37, %v2339_v7  ;;  %v1574_v42 = vadd.f32 %v1573_v45, %v1447_v23  ;;  %v1449_v7 = vmul.f32 %v2346_v12, %v2346_v12  ;;  %1266 = vst [vmem:[%s2304_s23 + $0x360] sm:$0xff] %v2772_v58  ;;  %v1451_v23 = vmul.f32 %v2364_v31, %v2364_v31 }
 0x1aa   : > { %1152 = vmatmul.bf16.gmra.mxu3 %v2152_v21  ;;  %1243 = vst [vmem:[%s2304_s23 + $0x2a8] sm:$0xff] %v2783_v6  ;;  %v1455_v21 = vmul.f32 %v2405_v8, %v2405_v8 }
 0x1ab   : > { %v1320_v15 = vadd.f32 %v1319_v55, %v2346_v12  ;;  %v1575_v14 = vadd.f32 %v1574_v42, %v1448_v9  ;;  %1267 = vst [vmem:[%s2304_s23 + $0x368] sm:$0xff] %v2789_v11  ;;  %v1053_v55 = vpop.f32.mrf.mxu2 }
 0x1ad   : > { %v1321_v29 = vadd.f32 %v1320_v15, %v2357_v25  ;;  %v1576_v12 = vadd.f32 %v1575_v14, %v1449_v7  ;;  %v1452_v25 = vmul.f32 %v2375_v44, %v2375_v44  ;;  %v1113_v42 = vpop.f32.mrf.mxu3  ;;  %v1454_v7 = vmul.f32 %v2393_v1, %v2393_v1 }
 0x1af   : > { %v1322_v37 = vadd.f32 %v1321_v29, %v2364_v31  ;;  %v1577_v45 = vadd.f32 %v1576_v12, %v1450_v63  ;;  %v1456_v29 = vmul.f32 %v2421_v27, %v2421_v27  ;;  %v995_v12 = vpop.f32.mrf.mxu1 }
 0x1b1   : > { %v1323_v9 = vadd.f32 %v1322_v37, %v2375_v44  ;;  %v1578_v43 = vadd.f32 %v1577_v45, %v1451_v23 }
 0x1b3   : > { %v1324_v39 = vadd.f32 %v1323_v9, %v2382_v49  ;;  %v1579_v31 = vadd.f32 %v1578_v43, %v1452_v25  ;;  %v1055_v45 = vpop.f32.mrf.mxu2  ;;  %v1457_v43 = vmul.f32 %v2433_v34, %v2433_v34 }
 0x1b5   : > { %v1325_v15 = vadd.f32 %v1324_v39, %v2393_v1  ;;  %v1580_v14 = vadd.f32 %v1579_v31, %v1453_v13  ;;  %v2823_v1 = vld [vmem:[%s3243_s2] ss:$0 sm:$0xff]  ;;  %v1115_v25 = vpop.f32.mrf.mxu3  ;;  %v1458_v39 = vmul.f32 %v2449_v52, %v2449_v52 }
 0x1b6   : > { %v2826_v37 = vadd.f32 %v2823_v1, %v993_v26  ;;  %v2832_v9 = vadd.f32 %v2823_v1, %v1113_v42  ;;  %v2848_v42 = vadd.f32 %v2823_v1, %v1115_v25 }
 0x1b7   : > { %v1326_v44 = vadd.f32 %v1325_v15, %v2405_v8  ;;  %v1581_v63 = vadd.f32 %v1580_v14, %v1454_v7  ;;  %v2829_v8 = vadd.f32 %v2823_v1, %v1053_v55  ;;  %v2843_v55 = vadd.f32 %v2823_v1, %v1055_v45 }
 0x1b8   : > { %1220 = vst [vmem:[%s2304_s23 + $0x1f0] sm:$0xff] %v2826_v37 }
 0x1b9   : > { %v1327_v49 = vadd.f32 %v1326_v44, %v2421_v27  ;;  %v1582_v23 = vadd.f32 %v1581_v63, %v1455_v21  ;;  %v2835_v27 = vadd.f32 %v2823_v1, %v995_v12  ;;  %1244 = vst [vmem:[%s2304_s23 + $0x2b0] sm:$0xff] %v2829_v8  ;;  %v1460_v21 = vmul.f32 %v2476_v17, %v2476_v17 }
 0x1ba   : > { %1268 = vst [vmem:[%s2304_s23 + $0x370] sm:$0xff] %v2832_v9  ;;  %v1461_v12 = vmul.f32 %v2487_v22, %v2487_v22 }
 0x1bb   : > { %v1328_v26 = vadd.f32 %v1327_v49, %v2433_v34  ;;  %v1583_v13 = vadd.f32 %v1582_v23, %v1456_v29  ;;  %1221 = vst [vmem:[%s2304_s23 + $0x1f8] sm:$0xff] %v2835_v27  ;;  %v1459_v34 = vmul.f32 %v2460_v59, %v2460_v59  ;;  %v1058_v63 = vpop.f32.mrf.mxu2 }
 0x1bc   : > { %1245 = vst [vmem:[%s2304_s23 + $0x2b8] sm:$0xff] %v2843_v55 }
 0x1bd   : > { %v1584_v31 = vadd.f32 %v1583_v13, %v1457_v43  ;;  %v1329_v7 = vadd.f32 %v1328_v26, %v2449_v52  ;;  %1269 = vst [vmem:[%s2304_s23 + $0x378] sm:$0xff] %v2848_v42  ;;  %v1118_v29 = vpop.f32.mrf.mxu3  ;;  %v1463_v43 = vmul.f32 %v2518_v56, %v2518_v56  ;;  %v1464_v13 = vmul.f32 %v2545_v16, %v2545_v16 }
 0x1bf   : > { %v1330_v15 = vadd.f32 %v1329_v7, %v2460_v59  ;;  %v1585_v14 = vadd.f32 %v1584_v31, %v1458_v39  ;;  %v1462_v59 = vmul.f32 %v2502_v46, %v2502_v46  ;;  %v2880_v31 = vadd.f32 %v2823_v1, %v1058_v63 }
 0x1c1   : > { %v1331_v44 = vadd.f32 %v1330_v15, %v2476_v17  ;;  %v1586_v52 = vadd.f32 %v1585_v14, %v1459_v34  ;;  %1246 = vst [vmem:[%s2304_s23 + $0x2c0] sm:$0xff] %v2880_v31 }
 0x1c3   : > { %v1332_v49 = vadd.f32 %v1331_v44, %v2487_v22  ;;  %v1587_v23 = vadd.f32 %v1586_v52, %v1460_v21  ;;  %v1060_v7 = vpop.f32.mrf.mxu2  ;;  %v1466_v44 = vmul.f32 %v2587_v50, %v2587_v50 }
 0x1c4   : > { %v2886_v15 = vadd.f32 %v2823_v1, %v1060_v7  ;;  %v1472_v7 = vmul.f32 %v2723_v0, %v2723_v0 }
 0x1c5   : > { %v1333_v45 = vadd.f32 %v1332_v49, %v2502_v46  ;;  %v1588_v25 = vadd.f32 %v1587_v23, %v1461_v12  ;;  %v2883_v46 = vadd.f32 %v2823_v1, %v1118_v29  ;;  %v1120_v34 = vpop.f32.mrf.mxu3  ;;  %v1467_v29 = vmul.f32 %v2605_v4, %v2605_v4 }
 0x1c6   : > { %1247 = vst [vmem:[%s2304_s23 + $0x2c8] sm:$0xff] %v2886_v15  ;;  %v1468_v49 = vmul.f32 %v2629_v40, %v2629_v40 }
 0x1c7   : > { %v1334_v17 = vadd.f32 %v1333_v45, %v2518_v56  ;;  %v1589_v26 = vadd.f32 %v1588_v25, %v1462_v59  ;;  %v2889_v56 = vadd.f32 %v2823_v1, %v1120_v34  ;;  %1270 = vst [vmem:[%s2304_s23 + $0x380] sm:$0xff] %v2883_v46 }
 0x1c9   : > { %v1335_v22 = vadd.f32 %v1334_v17, %v2545_v16  ;;  %v1590_v39 = vadd.f32 %v1589_v26, %v1463_v43  ;;  %v1465_v16 = vmul.f32 %v2563_v30, %v2563_v30  ;;  %1271 = vst [vmem:[%s2304_s23 + $0x388] sm:$0xff] %v2889_v56 }
 0x1cb   : > { %v1336_v14 = vadd.f32 %v1335_v22, %v2563_v30  ;;  %v1591_v21 = vadd.f32 %v1590_v39, %v1464_v13  ;;  %v1063_v45 = vpop.f32.mrf.mxu2  ;;  %v1471_v39 = vmul.f32 %v2678_v20, %v2678_v20 }
 0x1cd   : > { %v1337_v52 = vadd.f32 %v1336_v14, %v2587_v50  ;;  %v1592_v63 = vadd.f32 %v1591_v21, %v1465_v16  ;;  %v1123_v25 = vpop.f32.mrf.mxu3  ;;  %v1469_v50 = vmul.f32 %v2647_v5, %v2647_v5  ;;  %v2924_v16 = vadd.f32 %v2823_v1, %v1063_v45 }
 0x1cf   : > { %v1338_v30 = vadd.f32 %v1337_v52, %v2605_v4  ;;  %v1593_v12 = vadd.f32 %v1592_v63, %v1466_v44  ;;  %v1470_v4 = vmul.f32 %v2668_v32, %v2668_v32  ;;  %1248 = vst [vmem:[%s2304_s23 + $0x2d0] sm:$0xff] %v2924_v16 }
 0x1d1   : > { %v1339_v23 = vadd.f32 %v1338_v30, %v2629_v40  ;;  %v1594_v59 = vadd.f32 %v1593_v12, %v1467_v29  ;;  %v1474_v12 = vmul.f32 %v2766_v48, %v2766_v48 }
 0x1d3   : > { %v1340_v43 = vadd.f32 %v1339_v23, %v2647_v5  ;;  %v1595_v17 = vadd.f32 %v1594_v59, %v1468_v49  ;;  %v1065_v14 = vpop.f32.mrf.mxu2 }
 0x1d4   : > { %v2930_v44 = vadd.f32 %v2823_v1, %v1065_v14 }
 0x1d5   : > { %v1341_v26 = vadd.f32 %v1340_v43, %v2668_v32  ;;  %v1596_v13 = vadd.f32 %v1595_v17, %v1469_v50  ;;  %v2927_v32 = vadd.f32 %v2823_v1, %v1123_v25  ;;  %v1125_v21 = vpop.f32.mrf.mxu3  ;;  %v1476_v25 = vmul.f32 %v2826_v37, %v2826_v37 }
 0x1d6   : > { %1249 = vst [vmem:[%s2304_s23 + $0x2d8] sm:$0xff] %v2930_v44 }
 0x1d7   : > { %v1597_v22 = vadd.f32 %v1596_v13, %v1470_v4  ;;  %v1342_v40 = vadd.f32 %v1341_v26, %v2678_v20  ;;  %v2933_v20 = vadd.f32 %v2823_v1, %v1125_v21  ;;  %1272 = vst [vmem:[%s2304_s23 + $0x390] sm:$0xff] %v2927_v32  ;;  %v1477_v26 = vmul.f32 %v2835_v27, %v2835_v27 }
 0x1d8   : > { %v1478_v4 = vmul.f32 %v2396_v2, %v2396_v2 }
 0x1d9   : > { %v1598_v34 = vadd.f32 %v1597_v22, %v1471_v39  ;;  %v1343_v5 = vadd.f32 %v1342_v40, %v2723_v0  ;;  %v1473_v0 = vmul.f32 %v2733_v60, %v2733_v60  ;;  %1273 = vst [vmem:[%s2304_s23 + $0x398] sm:$0xff] %v2933_v20  ;;  %v1479_v22 = vmul.f32 %v2408_v10, %v2408_v10 }
 0x1da   : > { %v1480_v39 = vmul.f32 %v2424_v28, %v2424_v28 }
 0x1db   : > { %v1599_v52 = vadd.f32 %v1598_v34, %v1472_v7  ;;  %v1344_v63 = vadd.f32 %v1343_v5, %v2733_v60  ;;  %v1475_v60 = vmul.f32 %v2775_v57, %v2775_v57  ;;  %v1068_v50 = vpop.f32.mrf.mxu2 }
 0x1dc   : > { %v2968_v34 = vadd.f32 %v2823_v1, %v1068_v50 }
 0x1dd   : > { %v1600_v29 = vadd.f32 %v1599_v52, %v1473_v0  ;;  %v1345_v30 = vadd.f32 %v1344_v63, %v2766_v48  ;;  %v1128_v43 = vpop.f32.mrf.mxu3  ;;  %v1482_v0 = vmul.f32 %v2452_v54, %v2452_v54 }
 0x1de   : > { %1250 = vst [vmem:[%s2304_s23 + $0x2e0] sm:$0xff] %v2968_v34 }
 0x1df   : > { %v1601_v49 = vadd.f32 %v1600_v29, %v1474_v12  ;;  %v1346_v23 = vadd.f32 %v1345_v30, %v2775_v57  ;;  %v1483_v12 = vmul.f32 %v2463_v61, %v2463_v61 }
 0x1e1   : > { %v1602_v59 = vadd.f32 %v1601_v49, %v1475_v60  ;;  %v1347_v45 = vadd.f32 %v1346_v23, %v2826_v37  ;;  %v1484_v23 = vmul.f32 %v2479_v18, %v2479_v18 }
 0x1e3   : > { %v1603_v17 = vadd.f32 %v1602_v59, %v1476_v25  ;;  %v1348_v48 = vadd.f32 %v1347_v45, %v2835_v27  ;;  %v1070_v5 = vpop.f32.mrf.mxu2 }
 0x1e4   : > { %v2974_v21 = vadd.f32 %v2823_v1, %v1070_v5  ;;  %v1490_v5 = vmul.f32 %v2590_v51, %v2590_v51 }
 0x1e5   : > { %v1349_v13 = vadd.f32 %v1348_v48, %v2396_v2  ;;  %v1604_v57 = vadd.f32 %v1603_v17, %v1477_v26  ;;  %v2971_v2 = vadd.f32 %v2823_v1, %v1128_v43  ;;  %v1130_v14 = vpop.f32.mrf.mxu3  ;;  %v1486_v17 = vmul.f32 %v2505_v47, %v2505_v47 }
 0x1e6   : > { %1251 = vst [vmem:[%s2304_s23 + $0x2e8] sm:$0xff] %v2974_v21  ;;  %v1487_v26 = vmul.f32 %v2521_v62, %v2521_v62 }
 0x1e7   : > { %v1350_v37 = vadd.f32 %v1349_v13, %v2408_v10  ;;  %v1605_v40 = vadd.f32 %v1604_v57, %v1478_v4  ;;  %v2977_v10 = vadd.f32 %v2823_v1, %v1130_v14  ;;  %1274 = vst [vmem:[%s2304_s23 + $0x3a0] sm:$0xff] %v2971_v2  ;;  %v1488_v13 = vmul.f32 %v2548_v19, %v2548_v19 }
 0x1e9   : > { %v1351_v7 = vadd.f32 %v1350_v37, %v2424_v28  ;;  %v1606_v27 = vadd.f32 %v1605_v40, %v1479_v22  ;;  %v1481_v28 = vmul.f32 %v2436_v36, %v2436_v36  ;;  %1275 = vst [vmem:[%s2304_s23 + $0x3a8] sm:$0xff] %v2977_v10 }
 0x1eb   : > { %v1352_v52 = vadd.f32 %v1351_v7, %v2436_v36  ;;  %v1607_v63 = vadd.f32 %v1606_v27, %v1480_v39  ;;  %v1073_v45 = vpop.f32.mrf.mxu2 }
 0x1ec   : > { %v3012_v22 = vadd.f32 %v2823_v1, %v1073_v45  ;;  %v3295_v45 = vld [vmem:[#allocation13_spill] sm:$0xff] }
 0x1ed   : > { %v1353_v29 = vadd.f32 %v1352_v52, %v2452_v54  ;;  %v1608_v30 = vadd.f32 %v1607_v63, %v1481_v28  ;;  %v1133_v25 = vpop.f32.mrf.mxu3  ;;  %v1485_v54 = vmul.f32 %v2490_v24, %v2490_v24  ;;  %v3292_v52 = vld [vmem:[#allocation7_spill] sm:$0xff] }
 0x1ee   : > { %1252 = vst [vmem:[%s2304_s23 + $0x2f0] sm:$0xff] %v3012_v22  ;;  %v1491_v63 = vmul.f32 %v3292_v52, %v3292_v52 }
 0x1ef   : > { %v1354_v36 = vadd.f32 %v1353_v29, %v2463_v61  ;;  %v1609_v49 = vadd.f32 %v1608_v30, %v1482_v0  ;;  %v3293_v29 = vld [vmem:[#allocation9_spill] sm:$0xff] }
 0x1f0   : > { %v1492_v30 = vmul.f32 %v3293_v29, %v3293_v29 }
 0x1f1   : > { %v1355_v60 = vadd.f32 %v1354_v36, %v2479_v18  ;;  %v1610_v59 = vadd.f32 %v1609_v49, %v1483_v12 }
 0x1f3   : > { %v1356_v50 = vadd.f32 %v1355_v60, %v2490_v24  ;;  %v1611_v43 = vadd.f32 %v1610_v59, %v1484_v23  ;;  %v1075_v37 = vpop.f32.mrf.mxu2  ;;  %v3294_v23 = vld [vmem:[#allocation11_spill] sm:$0xff] }
 0x1f4   : > { %v3018_v39 = vadd.f32 %v2823_v1, %v1075_v37  ;;  %v1497_v37 = vmul.f32 %v2739_v38, %v2739_v38 }
 0x1f5   : > { %v1357_v61 = vadd.f32 %v1356_v50, %v2505_v47  ;;  %v1612_v48 = vadd.f32 %v1611_v43, %v1485_v54  ;;  %v3015_v47 = vadd.f32 %v2823_v1, %v1133_v25  ;;  %v1135_v40 = vpop.f32.mrf.mxu3  ;;  %v1494_v25 = vmul.f32 %v3295_v45, %v3295_v45  ;;  %v3296_v43 = vld [vmem:[#allocation15_spill] sm:$0xff] }
 0x1f6   : > { %1253 = vst [vmem:[%s2304_s23 + $0x2f8] sm:$0xff] %v3018_v39 }
 0x1f7   : > { %v1358_v18 = vadd.f32 %v1357_v61, %v2521_v62  ;;  %v1613_v4 = vadd.f32 %v1612_v48, %v1486_v17  ;;  %v3021_v62 = vadd.f32 %v2823_v1, %v1135_v40  ;;  %1276 = vst [vmem:[%s2304_s23 + $0x3b0] sm:$0xff] %v3015_v47  ;;  %v1495_v17 = vmul.f32 %v3296_v43, %v3296_v43 }
 0x1f9   : > { %v1359_v24 = vadd.f32 %v1358_v18, %v2548_v19  ;;  %v1614_v57 = vadd.f32 %v1613_v4, %v1487_v26  ;;  %v1489_v19 = vmul.f32 %v2566_v35, %v2566_v35  ;;  %1277 = vst [vmem:[%s2304_s23 + $0x3b8] sm:$0xff] %v3021_v62  ;;  %v1496_v26 = vmul.f32 %v2726_v3, %v2726_v3 }
 0x1fb   : > { %v1615_v7 = vadd.f32 %v1614_v57, %v1488_v13  ;;  %v1360_v27 = vadd.f32 %v1359_v24, %v2566_v35 }
 0x1fd   : > { %v1361_v14 = vadd.f32 %v1360_v27, %v2590_v51  ;;  %v1616_v28 = vadd.f32 %v1615_v7, %v1489_v19  ;;  %v1138_v49 = vpop.f32.mrf.mxu3  ;;  %v1493_v51 = vmul.f32 %v3294_v23, %v3294_v23 }
 0x1fe   : > { %v3056_v13 = vadd.f32 %v2823_v1, %v1138_v49 }
 0x1ff   : > { %v1362_v0 = vadd.f32 %v1361_v14, %v3292_v52  ;;  %v1617_v35 = vadd.f32 %v1616_v28, %v1490_v5  ;;  %v1499_v5 = vmul.f32 %v2783_v6, %v2783_v6 }
 0x200   : > { %1278 = vst [vmem:[%s2304_s23 + $0x3c0] sm:$0xff] %v3056_v13 }
 0x201   : > { %v1363_v12 = vadd.f32 %v1362_v0, %v3293_v29  ;;  %v1618_v36 = vadd.f32 %v1617_v35, %v1491_v63  ;;  %v1501_v29 = vmul.f32 %v2843_v55, %v2843_v55 }
 0x203   : > { %v1364_v60 = vadd.f32 %v1363_v12, %v3294_v23  ;;  %v1619_v59 = vadd.f32 %v1618_v36, %v1492_v30 }
 0x205   : > { %v1365_v54 = vadd.f32 %v1364_v60, %v3295_v45  ;;  %v1620_v50 = vadd.f32 %v1619_v59, %v1493_v51  ;;  %v1140_v24 = vpop.f32.mrf.mxu3 }
 0x206   : > { %v3059_v57 = vadd.f32 %v2823_v1, %v1140_v24 }
 0x207   : > { %v1366_v61 = vadd.f32 %v1365_v54, %v3296_v43  ;;  %v1621_v48 = vadd.f32 %v1620_v50, %v1494_v25  ;;  %v1505_v54 = vmul.f32 %v2930_v44, %v2930_v44  ;;  %v1506_v50 = vmul.f32 %v2968_v34, %v2968_v34 }
 0x208   : > { %1279 = vst [vmem:[%s2304_s23 + $0x3c8] sm:$0xff] %v3059_v57 }
 0x209   : > { %v1367_v18 = vadd.f32 %v1366_v61, %v2726_v3  ;;  %v1622_v4 = vadd.f32 %v1621_v48, %v1495_v17  ;;  %v1498_v3 = vmul.f32 %v2769_v53, %v2769_v53  ;;  %v1507_v61 = vmul.f32 %v2974_v21, %v2974_v21 }
 0x20b   : > { %v1368_v40 = vadd.f32 %v1367_v18, %v2739_v38  ;;  %v1623_v19 = vadd.f32 %v1622_v4, %v1496_v26  ;;  %v1500_v38 = vmul.f32 %v2829_v8, %v2829_v8 }
 0x20d   : > { %v1369_v7 = vadd.f32 %v1368_v40, %v2769_v53  ;;  %v1624_v27 = vadd.f32 %v1623_v19, %v1497_v37  ;;  %v1143_v0 = vpop.f32.mrf.mxu3  ;;  %v1509_v37 = vmul.f32 %v3018_v39, %v3018_v39 }
 0x20e   : > { %v3090_v60 = vadd.f32 %v2823_v1, %v1143_v0  ;;  %v3300_v0 = vld [vmem:[#allocation5_spill] sm:$0xff] }
 0x20f   : > { %v1370_v14 = vadd.f32 %v1369_v7, %v2783_v6  ;;  %v1625_v28 = vadd.f32 %v1624_v27, %v1498_v3  ;;  %v1502_v6 = vmul.f32 %v2880_v31, %v2880_v31  ;;  %v3298_v3 = vld [vmem:[#allocation3_spill] sm:$0xff] }
 0x210   : > { %1280 = vst [vmem:[%s2304_s23 + $0x3d0] sm:$0xff] %v3090_v60  ;;  %v1511_v7 = vmul.f32 %v3298_v3, %v3298_v3 }
 0x211   : > { %v1371_v52 = vadd.f32 %v1370_v14, %v2829_v8  ;;  %v1626_v63 = vadd.f32 %v1625_v28, %v1499_v5  ;;  %v1503_v8 = vmul.f32 %v2886_v15, %v2886_v15  ;;  %v3299_v5 = vld [vmem:[#allocation4_spill] sm:$0xff] }
 0x212   : > { %v1512_v14 = vmul.f32 %v3299_v5, %v3299_v5 }
 0x213   : > { %v1372_v35 = vadd.f32 %v1371_v52, %v2843_v55  ;;  %v1627_v53 = vadd.f32 %v1626_v63, %v1500_v38  ;;  %v1504_v55 = vmul.f32 %v2924_v16, %v2924_v16 }
 0x215   : > { %v1628_v30 = vadd.f32 %v1627_v53, %v1501_v29  ;;  %v1373_v12 = vadd.f32 %v1372_v35, %v2880_v31  ;;  %v1145_v59 = vpop.f32.mrf.mxu3  ;;  %v1513_v35 = vmul.f32 %v3300_v0, %v3300_v0 }
 0x216   : > { %v3093_v45 = vadd.f32 %v2823_v1, %v1145_v59 }
 0x217   : > { %v1629_v36 = vadd.f32 %v1628_v30, %v1502_v6  ;;  %v1374_v49 = vadd.f32 %v1373_v12, %v2886_v15  ;;  %v3301_v30 = vld [vmem:[#allocation6_spill] sm:$0xff] }
 0x218   : > { %1281 = vst [vmem:[%s2304_s23 + $0x3d8] sm:$0xff] %v3093_v45  ;;  %v1514_v12 = vmul.f32 %v3301_v30, %v3301_v30 }
 0x219   : > { %v1630_v23 = vadd.f32 %v1629_v36, %v1503_v8  ;;  %v1375_v51 = vadd.f32 %v1374_v49, %v2924_v16  ;;  %v3302_v49 = vld [vmem:[#allocation8_spill] sm:$0xff] }
 0x21a   : > { %v1515_v8 = vmul.f32 %v3302_v49, %v3302_v49 }
 0x21b   : > { %v1631_v31 = vadd.f32 %v1630_v23, %v1504_v55  ;;  %v1376_v25 = vadd.f32 %v1375_v51, %v2930_v44  ;;  %v1508_v44 = vmul.f32 %v3012_v22, %v3012_v22  ;;  %v3303_v55 = vld [vmem:[#allocation10_spill] sm:$0xff] }
 0x21c   : > { %v1516_v59 = vmul.f32 %v3303_v55, %v3303_v55 }
 0x21d   : > { %v1632_v15 = vadd.f32 %v1631_v31, %v1505_v54  ;;  %v1377_v16 = vadd.f32 %v1376_v25, %v2968_v34  ;;  %v1148_v18 = vpop.f32.mrf.mxu3  ;;  %v3297_v34 = vld [vmem:[#allocation2_spill] sm:$0xff] }
 0x21e   : > { %v1510_v40 = vmul.f32 %v3297_v34, %v3297_v34  ;;  %v3124_v38 = vadd.f32 %v2823_v1, %v1148_v18 }
 0x21f   : > { %v1633_v43 = vadd.f32 %v1632_v15, %v1506_v50  ;;  %v1378_v17 = vadd.f32 %v1377_v16, %v2974_v21  ;;  %v3304_v15 = vld [vmem:[#allocation12_spill] sm:$0xff] }
 0x220   : > { %1282 = vst [vmem:[%s2304_s23 + $0x3e0] sm:$0xff] %v3124_v38  ;;  %v1517_v16 = vmul.f32 %v3304_v15, %v3304_v15 }
 0x221   : > { %v1634_v48 = vadd.f32 %v1633_v43, %v1507_v61  ;;  %v1379_v26 = vadd.f32 %v1378_v17, %v3012_v22  ;;  %v3305_v17 = vld [vmem:[#allocation14_spill] sm:$0xff] }
 0x222   : > { %v1518_v61 = vmul.f32 %v3305_v17, %v3305_v17 }
 0x223   : > { %v1635_v4 = vadd.f32 %v1634_v48, %v1508_v44  ;;  %v1380_v24 = vadd.f32 %v1379_v26, %v3018_v39  ;;  %v3306_v44 = vld [vmem:[#allocation16_spill] sm:$0xff] }
 0x224   : > { %v1519_v18 = vmul.f32 %v3306_v44, %v3306_v44 }
 0x225   : > { %v1381_v21 = vadd.f32 %v1380_v24, %v3297_v34  ;;  %v1636_v19 = vadd.f32 %v1635_v4, %v1509_v37  ;;  %v1150_v52 = vpop.f32.mrf.mxu3  ;;  %v1520_v37 = vmul.f32 %v2729_v33, %v2729_v33 }
 0x226   : > { %v3127_v63 = vadd.f32 %v2823_v1, %v1150_v52  ;;  %v1524_v52 = vmul.f32 %v2832_v9, %v2832_v9 }
 0x227   : > { %v1382_v22 = vadd.f32 %v1381_v21, %v3298_v3  ;;  %v1637_v27 = vadd.f32 %v1636_v19, %v1510_v40 }
 0x228   : > { %1283 = vst [vmem:[%s2304_s23 + $0x3e8] sm:$0xff] %v3127_v63 }
 0x229   : > { %v1383_v28 = vadd.f32 %v1382_v22, %v3299_v5  ;;  %v1638_v39 = vadd.f32 %v1637_v27, %v1511_v7  ;;  %v1521_v7 = vmul.f32 %v2744_v41, %v2744_v41 }
 0x22b   : > { %v1384_v29 = vadd.f32 %v1383_v28, %v3300_v0  ;;  %v1639_v53 = vadd.f32 %v1638_v39, %v1512_v14 }
 0x22d   : > { %v1385_v6 = vadd.f32 %v1384_v29, %v3301_v30  ;;  %v1640_v36 = vadd.f32 %v1639_v53, %v1513_v35  ;;  %v1153_v54 = vpop.f32.mrf.mxu3  ;;  %v1525_v35 = vmul.f32 %v2848_v42, %v2848_v42 }
 0x22e   : > { %v3158_v21 = vadd.f32 %v2823_v1, %v1153_v54 }
 0x22f   : > { %v1386_v23 = vadd.f32 %v1385_v6, %v3302_v49  ;;  %v1641_v51 = vadd.f32 %v1640_v36, %v1514_v12 }
 0x230   : > { %1284 = vst [vmem:[%s2304_s23 + $0x3f0] sm:$0xff] %v3158_v21 }
 0x231   : > { %v1387_v31 = vadd.f32 %v1386_v23, %v3303_v55  ;;  %v1642_v25 = vadd.f32 %v1641_v51, %v1515_v8 }
 0x233   : > { %v1388_v50 = vadd.f32 %v1387_v31, %v3304_v15  ;;  %v1643_v43 = vadd.f32 %v1642_v25, %v1516_v59  ;;  %v1532_v25 = vmul.f32 %v3015_v47, %v3015_v47 }
 0x235   : > { %v1389_v48 = vadd.f32 %v1388_v50, %v3305_v17  ;;  %v1644_v26 = vadd.f32 %v1643_v43, %v1517_v16  ;;  %v1155_v19 = vpop.f32.mrf.mxu3 }
 0x236   : > { %v3161_v3 = vadd.f32 %v2823_v1, %v1155_v19  ;;  %v1523_v1 = vmul.f32 %v2789_v11, %v2789_v11 }
 0x237   : > { %v1390_v4 = vadd.f32 %v1389_v48, %v3306_v44  ;;  %v1645_v24 = vadd.f32 %v1644_v26, %v1518_v61 }
 0x238   : > { %1285 = vst [vmem:[%s2304_s23 + $0x3f8] sm:$0xff] %v3161_v3 }
 0x239   : > { %v1391_v34 = vadd.f32 %v1390_v4, %v2729_v33  ;;  %v1646_v40 = vadd.f32 %v1645_v24, %v1519_v18  ;;  %v1522_v33 = vmul.f32 %v2772_v58, %v2772_v58  ;;  %v1537_v4 = vmul.f32 %v3093_v45, %v3093_v45 }
 0x23b   : > { %v1647_v22 = vadd.f32 %v1646_v40, %v1520_v37  ;;  %v1392_v27 = vadd.f32 %v1391_v34, %v2744_v41  ;;  %v1539_v40 = vmul.f32 %v3127_v63, %v3127_v63 }
 0x23d   : > { %v1393_v5 = vadd.f32 %v1392_v27, %v2772_v58  ;;  %v1648_v14 = vadd.f32 %v1647_v22, %v1521_v7  ;;  %v1526_v58 = vmul.f32 %v2883_v46, %v2883_v46  ;;  %v1541_v22 = vmul.f32 %v3161_v3, %v3161_v3 }
 0x23f   : > { %v1394_v28 = vadd.f32 %v1393_v5, %v2789_v11  ;;  %v1649_v39 = vadd.f32 %v1648_v14, %v1522_v33  ;;  %v1527_v11 = vmul.f32 %v2889_v56, %v2889_v56 }
 0x241   : > { %v1395_v41 = vadd.f32 %v1394_v28, %v2832_v9  ;;  %v1650_v0 = vadd.f32 %v1649_v39, %v1523_v1  ;;  %v1528_v9 = vmul.f32 %v2927_v32, %v2927_v32 }
 0x243   : > { %v1396_v29 = vadd.f32 %v1395_v41, %v2848_v42  ;;  %v1651_v53 = vadd.f32 %v1650_v0, %v1524_v52  ;;  %v1529_v42 = vmul.f32 %v2933_v20, %v2933_v20 }
 0x245   : > { %v1397_v30 = vadd.f32 %v1396_v29, %v2883_v46  ;;  %v1652_v12 = vadd.f32 %v1651_v53, %v1525_v35  ;;  %v1530_v46 = vmul.f32 %v2971_v2, %v2971_v2 }
 0x247   : > { %v1398_v6 = vadd.f32 %v1397_v30, %v2889_v56  ;;  %v1653_v36 = vadd.f32 %v1652_v12, %v1526_v58  ;;  %v1531_v56 = vmul.f32 %v2977_v10, %v2977_v10 }
 0x249   : > { %v1399_v49 = vadd.f32 %v1398_v6, %v2927_v32  ;;  %v1654_v8 = vadd.f32 %v1653_v36, %v1527_v11 }
 0x24b   : > { %v1400_v23 = vadd.f32 %v1399_v49, %v2933_v20  ;;  %v1655_v51 = vadd.f32 %v1654_v8, %v1528_v9 }
 0x24d   : > { %v1401_v55 = vadd.f32 %v1400_v23, %v2971_v2  ;;  %v1656_v59 = vadd.f32 %v1655_v51, %v1529_v42  ;;  %v1533_v2 = vmul.f32 %v3021_v62, %v3021_v62 }
 0x24f   : > { %v1402_v31 = vadd.f32 %v1401_v55, %v2977_v10  ;;  %v1657_v32 = vadd.f32 %v1656_v59, %v1530_v46  ;;  %v1534_v10 = vmul.f32 %v3056_v13, %v3056_v13 }
 0x251   : > { %v1403_v54 = vadd.f32 %v1402_v31, %v3015_v47  ;;  %v1658_v20 = vadd.f32 %v1657_v32, %v1531_v56  ;;  %v1535_v47 = vmul.f32 %v3059_v57, %v3059_v57 }
 0x253   : > { %v1404_v15 = vadd.f32 %v1403_v54, %v3021_v62  ;;  %v1659_v16 = vadd.f32 %v1658_v20, %v1532_v25  ;;  %v1536_v62 = vmul.f32 %v3090_v60, %v3090_v60 }
 0x255   : > { %v1660_v50 = vadd.f32 %v1659_v16, %v1533_v2  ;;  %v1405_v43 = vadd.f32 %v1404_v15, %v3056_v13 }
 0x257   : > { %v1661_v17 = vadd.f32 %v1660_v50, %v1534_v10  ;;  %v1406_v61 = vadd.f32 %v1405_v43, %v3059_v57  ;;  %v1538_v57 = vmul.f32 %v3124_v38, %v3124_v38 }
 0x259   : > { %v1662_v48 = vadd.f32 %v1661_v17, %v1535_v47  ;;  %v1407_v26 = vadd.f32 %v1406_v61, %v3090_v60 }
 0x25b   : > { %v1663_v44 = vadd.f32 %v1662_v48, %v1536_v62  ;;  %v1408_v18 = vadd.f32 %v1407_v26, %v3093_v45  ;;  %v1540_v45 = vmul.f32 %v3158_v21, %v3158_v21 }
 0x25d   : > { %v1664_v13 = vadd.f32 %v1663_v44, %v1537_v4  ;;  %v1409_v24 = vadd.f32 %v1408_v18, %v3124_v38 }
 0x25f   : > { %v1665_v37 = vadd.f32 %v1664_v13, %v1538_v57  ;;  %v1410_v34 = vadd.f32 %v1409_v24, %v3127_v63 }
 0x261   : > { %v1666_v60 = vadd.f32 %v1665_v37, %v1539_v40  ;;  %v1411_v19 = vadd.f32 %v1410_v34, %v3158_v21 }
 0x263   : > { %v1667_v7 = vadd.f32 %v1666_v60, %v1540_v45  ;;  %v1412_v38 = vadd.f32 %v1411_v19, %v3161_v3 }
 0x265   : > { %1413 = vst [vmem:[%s244_s29] sm:$0xff] %v1412_v38  ;;  %v1668_v63 = vadd.f32 %v1667_v7, %v1541_v22 }
 0x267   : > { %1669 = vst [vmem:[%s248_s19] sm:$0xff] %v1668_v63 }
 0x268 PF: > { %s16_s18 = sadd.s32 1, %s2201_s18  }
 0x269   : > { %p13_p5 = scmp.ge.s32.totalorder %s16_s18, 4  }
 0x26b   :  { %15 = sbr.rel (!%p13_p5) target bundleno = 1 (0x1), region = 86 }

// kernel: unet_conv_block_forward.7
= control target key start
LH: loop header
LB: loop body
LE: loop exit
PB: predicated region body
PF: predicated region fallthrough
CT: control target
= control target key end

     0   :  { %s5085_s0 = inlined_call_operand.vmem [shape: f32[4,512,128], index: 0, kind: input, shape index: {}]   ;;  %s5086_s1 = inlined_call_operand.vmem [shape: f32[1,128], index: 1, kind: input, shape index: {}]   ;;  %s5087_s2 = inlined_call_operand.vmem [shape: f32[1,128], index: 2, kind: input, shape index: {}]   ;;  %s5088_s3 = inlined_call_operand.vmem [shape: f32[4,512,128], index: 3, kind: output, shape index: {0}]   ;;  %s5089_s4 = inlined_call_operand.vmem [shape: f32[512,128], index: 4, kind: output, shape index: {1}]  }
   0x1   :  { %v16_v0 = vld [vmem:[%s5085_s0] sm:$0xff]  ;;  %v17_v3 = vld [vmem:[%s5085_s0 + $0x8] sm:$0xff]  ;;  %v18_v6 = vld [vmem:[%s5085_s0 + $0x10] sm:$0xff] }
   0x2   :  { %v1797_v1 = vld [vmem:[%s5086_s1] ss:$0 sm:$0xff]  ;;  %v19_v7 = vld [vmem:[%s5085_s0 + $0x18] sm:$0xff]  ;;  %v21_v12 = vld [vmem:[%s5085_s0 + $0x28] sm:$0xff] }
   0x3   :  { %v1802_v2 = vld [vmem:[%s5087_s2] ss:$0 sm:$0xff]  ;;  %v276_v4 = vmul.f32 %v1797_v1, %v16_v0  ;;  %v277_v5 = vmul.f32 %v1797_v1, %v17_v3  ;;  %v278_v9 = vmul.f32 %v1797_v1, %v18_v6  ;;  %v279_v10 = vmul.f32 %v1797_v1, %v19_v7  ;;  %v22_v13 = vld [vmem:[%s5085_s0 + $0x30] sm:$0xff]  ;;  %v23_v14 = vld [vmem:[%s5085_s0 + $0x38] sm:$0xff] }
   0x4   :  { %v20_v8 = vld [vmem:[%s5085_s0 + $0x20] sm:$0xff]  ;;  %v281_v17 = vmul.f32 %v1797_v1, %v21_v12  ;;  %v282_v18 = vmul.f32 %v1797_v1, %v22_v13  ;;  %v283_v21 = vmul.f32 %v1797_v1, %v23_v14  ;;  %v25_v23 = vld [vmem:[%s5085_s0 + $0x48] sm:$0xff]  ;;  %v26_v26 = vld [vmem:[%s5085_s0 + $0x50] sm:$0xff] }
   0x5   :  { %v280_v11 = vmul.f32 %v1797_v1, %v20_v8  ;;  %v536_v15 = vadd.f32 %v1802_v2, %v276_v4  ;;  %v537_v16 = vadd.f32 %v1802_v2, %v277_v5  ;;  %v538_v19 = vadd.f32 %v1802_v2, %v278_v9  ;;  %v24_v22 = vld [vmem:[%s5085_s0 + $0x40] sm:$0xff]  ;;  %v27_v27 = vld [vmem:[%s5085_s0 + $0x58] sm:$0xff]  ;;  %v29_v35 = vld [vmem:[%s5085_s0 + $0x68] sm:$0xff] }
   0x6   :  { %v539_v20 = vadd.f32 %v1802_v2, %v279_v10  ;;  %v541_v29 = vadd.f32 %v1802_v2, %v281_v17  ;;  %v28_v30 = vld [vmem:[%s5085_s0 + $0x60] sm:$0xff]  ;;  %v542_v32 = vadd.f32 %v1802_v2, %v282_v18  ;;  %v284_v33 = vmul.f32 %v1797_v1, %v24_v22  ;;  %v30_v40 = vld [vmem:[%s5085_s0 + $0x70] sm:$0xff]  ;;  %v31_v44 = vld [vmem:[%s5085_s0 + $0x78] sm:$0xff] }
   0x7   :  { %v792_v24 = vmax.f32 %v536_v15, 0.0  ;;  %v540_v25 = vadd.f32 %v1802_v2, %v280_v11  ;;  %v793_v28 = vmax.f32 %v537_v16, 0.0  ;;  %v794_v31 = vmax.f32 %v538_v19, 0.0  ;;  %v32_v48 = vld [vmem:[%s5085_s0 + $0x80] sm:$0xff]  ;;  %v33_v52 = vld [vmem:[%s5085_s0 + $0x88] sm:$0xff]  ;;  %v34_v56 = vld [vmem:[%s5085_s0 + $0x90] sm:$0xff] }
   0x8   :  { %v285_v34 = vmul.f32 %v1797_v1, %v25_v23  ;;  %v795_v36 = vmax.f32 %v539_v20, 0.0  ;;  %v543_v37 = vadd.f32 %v1802_v2, %v283_v21  ;;  %v286_v38 = vmul.f32 %v1797_v1, %v26_v26  ;;  %v35_v60 = vld [vmem:[%s5085_s0 + $0x98] sm:$0xff]  ;;  %v36_v0 = vld [vmem:[%s5085_s0 + $0xa0] sm:$0xff]  ;;  %v37_v6 = vld [vmem:[%s5085_s0 + $0xa8] sm:$0xff] }
   0x9   :  { %1048 = vst [vmem:[%s5088_s3] sm:$0xff] %v792_v24  ;;  %v287_v39 = vmul.f32 %v1797_v1, %v27_v27  ;;  %v796_v41 = vmax.f32 %v540_v25, 0.0  ;;  %v544_v42 = vadd.f32 %v1802_v2, %v284_v33  ;;  %v288_v43 = vmul.f32 %v1797_v1, %v28_v30  ;;  %v38_v10 = vld [vmem:[%s5085_s0 + $0xb0] sm:$0xff]  ;;  %v39_v14 = vld [vmem:[%s5085_s0 + $0xb8] sm:$0xff]  ;;  %v40_v18 = vld [vmem:[%s5085_s0 + $0xc0] sm:$0xff] }
   0xa   :  { %1049 = vst [vmem:[%s5088_s3 + $0x8] sm:$0xff] %v793_v28  ;;  %v797_v45 = vmax.f32 %v541_v29, 0.0  ;;  %v545_v46 = vadd.f32 %v1802_v2, %v285_v34  ;;  %v289_v47 = vmul.f32 %v1797_v1, %v29_v35  ;;  %v798_v49 = vmax.f32 %v542_v32, 0.0  ;;  %v41_v22 = vld [vmem:[%s5085_s0 + $0xc8] sm:$0xff]  ;;  %v42_v26 = vld [vmem:[%s5085_s0 + $0xd0] sm:$0xff]  ;;  %v43_v30 = vld [vmem:[%s5085_s0 + $0xd8] sm:$0xff] }
   0xb   :  { %1050 = vst [vmem:[%s5088_s3 + $0x10] sm:$0xff] %v794_v31  ;;  %v546_v50 = vadd.f32 %v1802_v2, %v286_v38  ;;  %v290_v51 = vmul.f32 %v1797_v1, %v30_v40  ;;  %v799_v53 = vmax.f32 %v543_v37, 0.0  ;;  %v547_v54 = vadd.f32 %v1802_v2, %v287_v39  ;;  %v44_v34 = vld [vmem:[%s5085_s0 + $0xe0] sm:$0xff]  ;;  %v45_v38 = vld [vmem:[%s5085_s0 + $0xe8] sm:$0xff] }
   0xc   :  { %1051 = vst [vmem:[%s5088_s3 + $0x18] sm:$0xff] %v795_v36  ;;  %v291_v55 = vmul.f32 %v1797_v1, %v31_v44  ;;  %v800_v57 = vmax.f32 %v544_v42, 0.0  ;;  %v548_v58 = vadd.f32 %v1802_v2, %v288_v43  ;;  %v292_v59 = vmul.f32 %v1797_v1, %v32_v48  ;;  %v46_v42 = vld [vmem:[%s5085_s0 + $0xf0] sm:$0xff] }
   0xd   :  { %1052 = vst [vmem:[%s5088_s3 + $0x20] sm:$0xff] %v796_v41  ;;  %v801_v61 = vmax.f32 %v545_v46, 0.0  ;;  %v549_v62 = vadd.f32 %v1802_v2, %v289_v47  ;;  %v293_v63 = vmul.f32 %v1797_v1, %v33_v52  ;;  %v802_v3 = vmax.f32 %v546_v50, 0.0  ;;  %v47_v46 = vld [vmem:[%s5085_s0 + $0xf8] sm:$0xff]  ;;  %v48_v50 = vld [vmem:[%s5085_s0 + $0x100] sm:$0xff] }
   0xe   :  { %1053 = vst [vmem:[%s5088_s3 + $0x28] sm:$0xff] %v797_v45  ;;  %v550_v4 = vadd.f32 %v1802_v2, %v290_v51  ;;  %v294_v5 = vmul.f32 %v1797_v1, %v34_v56  ;;  %v803_v7 = vmax.f32 %v547_v54, 0.0  ;;  %v551_v8 = vadd.f32 %v1802_v2, %v291_v55  ;;  %v49_v54 = vld [vmem:[%s5085_s0 + $0x108] sm:$0xff] }
   0xf   :  { %1054 = vst [vmem:[%s5088_s3 + $0x30] sm:$0xff] %v798_v49  ;;  %v295_v9 = vmul.f32 %v1797_v1, %v35_v60  ;;  %v804_v11 = vmax.f32 %v548_v58, 0.0  ;;  %v552_v12 = vadd.f32 %v1802_v2, %v292_v59  ;;  %v296_v13 = vmul.f32 %v1797_v1, %v36_v0  ;;  %v50_v58 = vld [vmem:[%s5085_s0 + $0x110] sm:$0xff] }
  0x10   :  { %1055 = vst [vmem:[%s5088_s3 + $0x38] sm:$0xff] %v799_v53  ;;  %v805_v15 = vmax.f32 %v549_v62, 0.0  ;;  %v553_v16 = vadd.f32 %v1802_v2, %v293_v63  ;;  %v297_v17 = vmul.f32 %v1797_v1, %v37_v6  ;;  %v806_v19 = vmax.f32 %v550_v4, 0.0  ;;  %v51_v62 = vld [vmem:[%s5085_s0 + $0x118] sm:$0xff]  ;;  %v52_v4 = vld [vmem:[%s5085_s0 + $0x120] sm:$0xff] }
  0x11   :  { %1056 = vst [vmem:[%s5088_s3 + $0x40] sm:$0xff] %v800_v57  ;;  %v554_v20 = vadd.f32 %v1802_v2, %v294_v5  ;;  %v298_v21 = vmul.f32 %v1797_v1, %v38_v10  ;;  %v807_v23 = vmax.f32 %v551_v8, 0.0  ;;  %v555_v24 = vadd.f32 %v1802_v2, %v295_v9  ;;  %v53_v8 = vld [vmem:[%s5085_s0 + $0x128] sm:$0xff] }
  0x12   :  { %1057 = vst [vmem:[%s5088_s3 + $0x48] sm:$0xff] %v801_v61  ;;  %v299_v25 = vmul.f32 %v1797_v1, %v39_v14  ;;  %v808_v27 = vmax.f32 %v552_v12, 0.0  ;;  %v556_v28 = vadd.f32 %v1802_v2, %v296_v13  ;;  %v300_v29 = vmul.f32 %v1797_v1, %v40_v18  ;;  %v54_v12 = vld [vmem:[%s5085_s0 + $0x130] sm:$0xff] }
  0x13   :  { %1058 = vst [vmem:[%s5088_s3 + $0x50] sm:$0xff] %v802_v3  ;;  %v809_v31 = vmax.f32 %v553_v16, 0.0  ;;  %v557_v32 = vadd.f32 %v1802_v2, %v297_v17  ;;  %v301_v33 = vmul.f32 %v1797_v1, %v41_v22  ;;  %v810_v35 = vmax.f32 %v554_v20, 0.0  ;;  %v55_v16 = vld [vmem:[%s5085_s0 + $0x138] sm:$0xff]  ;;  %v56_v20 = vld [vmem:[%s5085_s0 + $0x140] sm:$0xff] }
  0x14   :  { %1059 = vst [vmem:[%s5088_s3 + $0x58] sm:$0xff] %v803_v7  ;;  %v558_v36 = vadd.f32 %v1802_v2, %v298_v21  ;;  %v302_v37 = vmul.f32 %v1797_v1, %v42_v26  ;;  %v811_v39 = vmax.f32 %v555_v24, 0.0  ;;  %v559_v40 = vadd.f32 %v1802_v2, %v299_v25  ;;  %v57_v24 = vld [vmem:[%s5085_s0 + $0x148] sm:$0xff] }
  0x15   :  { %1060 = vst [vmem:[%s5088_s3 + $0x60] sm:$0xff] %v804_v11  ;;  %v303_v41 = vmul.f32 %v1797_v1, %v43_v30  ;;  %v812_v43 = vmax.f32 %v556_v28, 0.0  ;;  %v560_v44 = vadd.f32 %v1802_v2, %v300_v29  ;;  %v304_v45 = vmul.f32 %v1797_v1, %v44_v34  ;;  %v58_v28 = vld [vmem:[%s5085_s0 + $0x150] sm:$0xff] }
  0x16   :  { %1061 = vst [vmem:[%s5088_s3 + $0x68] sm:$0xff] %v805_v15  ;;  %v813_v47 = vmax.f32 %v557_v32, 0.0  ;;  %v561_v48 = vadd.f32 %v1802_v2, %v301_v33  ;;  %v305_v49 = vmul.f32 %v1797_v1, %v45_v38  ;;  %v814_v51 = vmax.f32 %v558_v36, 0.0  ;;  %v59_v32 = vld [vmem:[%s5085_s0 + $0x158] sm:$0xff]  ;;  %v60_v36 = vld [vmem:[%s5085_s0 + $0x160] sm:$0xff] }
  0x17   :  { %1062 = vst [vmem:[%s5088_s3 + $0x70] sm:$0xff] %v806_v19  ;;  %v562_v52 = vadd.f32 %v1802_v2, %v302_v37  ;;  %v306_v53 = vmul.f32 %v1797_v1, %v46_v42  ;;  %v815_v55 = vmax.f32 %v559_v40, 0.0  ;;  %v563_v56 = vadd.f32 %v1802_v2, %v303_v41  ;;  %v61_v40 = vld [vmem:[%s5085_s0 + $0x168] sm:$0xff] }
  0x18   :  { %1063 = vst [vmem:[%s5088_s3 + $0x78] sm:$0xff] %v807_v23  ;;  %v307_v57 = vmul.f32 %v1797_v1, %v47_v46  ;;  %v816_v59 = vmax.f32 %v560_v44, 0.0  ;;  %v564_v60 = vadd.f32 %v1802_v2, %v304_v45  ;;  %v308_v61 = vmul.f32 %v1797_v1, %v48_v50  ;;  %v62_v44 = vld [vmem:[%s5085_s0 + $0x170] sm:$0xff] }
  0x19   :  { %1064 = vst [vmem:[%s5088_s3 + $0x80] sm:$0xff] %v808_v27  ;;  %v817_v63 = vmax.f32 %v561_v48, 0.0  ;;  %v565_v0 = vadd.f32 %v1802_v2, %v305_v49  ;;  %v309_v3 = vmul.f32 %v1797_v1, %v49_v54  ;;  %v818_v5 = vmax.f32 %v562_v52, 0.0  ;;  %v63_v48 = vld [vmem:[%s5085_s0 + $0x178] sm:$0xff]  ;;  %v64_v52 = vld [vmem:[%s5085_s0 + $0x180] sm:$0xff] }
  0x1a   :  { %1065 = vst [vmem:[%s5088_s3 + $0x88] sm:$0xff] %v809_v31  ;;  %v566_v6 = vadd.f32 %v1802_v2, %v306_v53  ;;  %v310_v7 = vmul.f32 %v1797_v1, %v50_v58  ;;  %v819_v9 = vmax.f32 %v563_v56, 0.0  ;;  %v567_v10 = vadd.f32 %v1802_v2, %v307_v57  ;;  %v65_v56 = vld [vmem:[%s5085_s0 + $0x188] sm:$0xff] }
  0x1b   :  { %1066 = vst [vmem:[%s5088_s3 + $0x90] sm:$0xff] %v810_v35  ;;  %v311_v11 = vmul.f32 %v1797_v1, %v51_v62  ;;  %v820_v13 = vmax.f32 %v564_v60, 0.0  ;;  %v568_v14 = vadd.f32 %v1802_v2, %v308_v61  ;;  %v312_v15 = vmul.f32 %v1797_v1, %v52_v4  ;;  %v66_v60 = vld [vmem:[%s5085_s0 + $0x190] sm:$0xff] }
  0x1c   :  { %1067 = vst [vmem:[%s5088_s3 + $0x98] sm:$0xff] %v811_v39  ;;  %v821_v17 = vmax.f32 %v565_v0, 0.0  ;;  %v569_v18 = vadd.f32 %v1802_v2, %v309_v3  ;;  %v313_v19 = vmul.f32 %v1797_v1, %v53_v8  ;;  %v822_v21 = vmax.f32 %v566_v6, 0.0  ;;  %v67_v0 = vld [vmem:[%s5085_s0 + $0x198] sm:$0xff]  ;;  %v68_v6 = vld [vmem:[%s5085_s0 + $0x1a0] sm:$0xff] }
  0x1d   :  { %1068 = vst [vmem:[%s5088_s3 + $0xa0] sm:$0xff] %v812_v43  ;;  %v570_v22 = vadd.f32 %v1802_v2, %v310_v7  ;;  %v314_v23 = vmul.f32 %v1797_v1, %v54_v12  ;;  %v823_v25 = vmax.f32 %v567_v10, 0.0  ;;  %v571_v26 = vadd.f32 %v1802_v2, %v311_v11  ;;  %v69_v10 = vld [vmem:[%s5085_s0 + $0x1a8] sm:$0xff] }
  0x1e   :  { %1069 = vst [vmem:[%s5088_s3 + $0xa8] sm:$0xff] %v813_v47  ;;  %v315_v27 = vmul.f32 %v1797_v1, %v55_v16  ;;  %v824_v29 = vmax.f32 %v568_v14, 0.0  ;;  %v572_v30 = vadd.f32 %v1802_v2, %v312_v15  ;;  %v316_v31 = vmul.f32 %v1797_v1, %v56_v20  ;;  %v70_v14 = vld [vmem:[%s5085_s0 + $0x1b0] sm:$0xff] }
  0x1f   :  { %1070 = vst [vmem:[%s5088_s3 + $0xb0] sm:$0xff] %v814_v51  ;;  %v825_v33 = vmax.f32 %v569_v18, 0.0  ;;  %v573_v34 = vadd.f32 %v1802_v2, %v313_v19  ;;  %v317_v35 = vmul.f32 %v1797_v1, %v57_v24  ;;  %v826_v37 = vmax.f32 %v570_v22, 0.0  ;;  %v71_v18 = vld [vmem:[%s5085_s0 + $0x1b8] sm:$0xff]  ;;  %v72_v22 = vld [vmem:[%s5085_s0 + $0x1c0] sm:$0xff] }
  0x20   :  { %1071 = vst [vmem:[%s5088_s3 + $0xb8] sm:$0xff] %v815_v55  ;;  %v574_v38 = vadd.f32 %v1802_v2, %v314_v23  ;;  %v318_v39 = vmul.f32 %v1797_v1, %v58_v28  ;;  %v827_v41 = vmax.f32 %v571_v26, 0.0  ;;  %v575_v42 = vadd.f32 %v1802_v2, %v315_v27  ;;  %v73_v26 = vld [vmem:[%s5085_s0 + $0x1c8] sm:$0xff] }
  0x21   :  { %1072 = vst [vmem:[%s5088_s3 + $0xc0] sm:$0xff] %v816_v59  ;;  %v319_v43 = vmul.f32 %v1797_v1, %v59_v32  ;;  %v828_v45 = vmax.f32 %v572_v30, 0.0  ;;  %v576_v46 = vadd.f32 %v1802_v2, %v316_v31  ;;  %v320_v47 = vmul.f32 %v1797_v1, %v60_v36  ;;  %v74_v30 = vld [vmem:[%s5085_s0 + $0x1d0] sm:$0xff] }
  0x22   :  { %1073 = vst [vmem:[%s5088_s3 + $0xc8] sm:$0xff] %v817_v63  ;;  %v829_v49 = vmax.f32 %v573_v34, 0.0  ;;  %v577_v50 = vadd.f32 %v1802_v2, %v317_v35  ;;  %v321_v51 = vmul.f32 %v1797_v1, %v61_v40  ;;  %v830_v53 = vmax.f32 %v574_v38, 0.0  ;;  %v75_v34 = vld [vmem:[%s5085_s0 + $0x1d8] sm:$0xff]  ;;  %v76_v38 = vld [vmem:[%s5085_s0 + $0x1e0] sm:$0xff] }
  0x23   :  { %1074 = vst [vmem:[%s5088_s3 + $0xd0] sm:$0xff] %v818_v5  ;;  %v578_v54 = vadd.f32 %v1802_v2, %v318_v39  ;;  %v322_v55 = vmul.f32 %v1797_v1, %v62_v44  ;;  %v831_v57 = vmax.f32 %v575_v42, 0.0  ;;  %v579_v58 = vadd.f32 %v1802_v2, %v319_v43  ;;  %v77_v42 = vld [vmem:[%s5085_s0 + $0x1e8] sm:$0xff] }
  0x24   :  { %1075 = vst [vmem:[%s5088_s3 + $0xd8] sm:$0xff] %v819_v9  ;;  %v323_v59 = vmul.f32 %v1797_v1, %v63_v48  ;;  %v832_v61 = vmax.f32 %v576_v46, 0.0  ;;  %v580_v62 = vadd.f32 %v1802_v2, %v320_v47  ;;  %v324_v63 = vmul.f32 %v1797_v1, %v64_v52  ;;  %v78_v46 = vld [vmem:[%s5085_s0 + $0x1f0] sm:$0xff] }
  0x25   :  { %1076 = vst [vmem:[%s5088_s3 + $0xe0] sm:$0xff] %v820_v13  ;;  %v833_v3 = vmax.f32 %v577_v50, 0.0  ;;  %v581_v4 = vadd.f32 %v1802_v2, %v321_v51  ;;  %v325_v5 = vmul.f32 %v1797_v1, %v65_v56  ;;  %v834_v7 = vmax.f32 %v578_v54, 0.0  ;;  %v79_v50 = vld [vmem:[%s5085_s0 + $0x1f8] sm:$0xff]  ;;  %v80_v54 = vld [vmem:[%s5085_s0 + $0x200] sm:$0xff] }
  0x26   :  { %1077 = vst [vmem:[%s5088_s3 + $0xe8] sm:$0xff] %v821_v17  ;;  %v582_v8 = vadd.f32 %v1802_v2, %v322_v55  ;;  %v326_v9 = vmul.f32 %v1797_v1, %v66_v60  ;;  %v835_v11 = vmax.f32 %v579_v58, 0.0  ;;  %v583_v12 = vadd.f32 %v1802_v2, %v323_v59  ;;  %v81_v58 = vld [vmem:[%s5085_s0 + $0x208] sm:$0xff] }
  0x27   :  { %1078 = vst [vmem:[%s5088_s3 + $0xf0] sm:$0xff] %v822_v21  ;;  %v327_v13 = vmul.f32 %v1797_v1, %v67_v0  ;;  %v836_v15 = vmax.f32 %v580_v62, 0.0  ;;  %v584_v16 = vadd.f32 %v1802_v2, %v324_v63  ;;  %v328_v17 = vmul.f32 %v1797_v1, %v68_v6  ;;  %v82_v62 = vld [vmem:[%s5085_s0 + $0x210] sm:$0xff] }
  0x28   :  { %1079 = vst [vmem:[%s5088_s3 + $0xf8] sm:$0xff] %v823_v25  ;;  %v837_v19 = vmax.f32 %v581_v4, 0.0  ;;  %v585_v20 = vadd.f32 %v1802_v2, %v325_v5  ;;  %v329_v21 = vmul.f32 %v1797_v1, %v69_v10  ;;  %v838_v23 = vmax.f32 %v582_v8, 0.0  ;;  %v83_v4 = vld [vmem:[%s5085_s0 + $0x218] sm:$0xff]  ;;  %v84_v8 = vld [vmem:[%s5085_s0 + $0x220] sm:$0xff] }
  0x29   :  { %1080 = vst [vmem:[%s5088_s3 + $0x100] sm:$0xff] %v824_v29  ;;  %v586_v24 = vadd.f32 %v1802_v2, %v326_v9  ;;  %v330_v25 = vmul.f32 %v1797_v1, %v70_v14  ;;  %v839_v27 = vmax.f32 %v583_v12, 0.0  ;;  %v587_v28 = vadd.f32 %v1802_v2, %v327_v13  ;;  %v85_v12 = vld [vmem:[%s5085_s0 + $0x228] sm:$0xff] }
  0x2a   :  { %1081 = vst [vmem:[%s5088_s3 + $0x108] sm:$0xff] %v825_v33  ;;  %v331_v29 = vmul.f32 %v1797_v1, %v71_v18  ;;  %v840_v31 = vmax.f32 %v584_v16, 0.0  ;;  %v588_v32 = vadd.f32 %v1802_v2, %v328_v17  ;;  %v332_v33 = vmul.f32 %v1797_v1, %v72_v22  ;;  %v86_v16 = vld [vmem:[%s5085_s0 + $0x230] sm:$0xff] }
  0x2b   :  { %1082 = vst [vmem:[%s5088_s3 + $0x110] sm:$0xff] %v826_v37  ;;  %v841_v35 = vmax.f32 %v585_v20, 0.0  ;;  %v589_v36 = vadd.f32 %v1802_v2, %v329_v21  ;;  %v333_v37 = vmul.f32 %v1797_v1, %v73_v26  ;;  %v842_v39 = vmax.f32 %v586_v24, 0.0  ;;  %v87_v20 = vld [vmem:[%s5085_s0 + $0x238] sm:$0xff]  ;;  %v88_v24 = vld [vmem:[%s5085_s0 + $0x240] sm:$0xff] }
  0x2c   :  { %1083 = vst [vmem:[%s5088_s3 + $0x118] sm:$0xff] %v827_v41  ;;  %v590_v40 = vadd.f32 %v1802_v2, %v330_v25  ;;  %v334_v41 = vmul.f32 %v1797_v1, %v74_v30  ;;  %v843_v43 = vmax.f32 %v587_v28, 0.0  ;;  %v591_v44 = vadd.f32 %v1802_v2, %v331_v29  ;;  %v89_v28 = vld [vmem:[%s5085_s0 + $0x248] sm:$0xff] }
  0x2d   :  { %1084 = vst [vmem:[%s5088_s3 + $0x120] sm:$0xff] %v828_v45  ;;  %v335_v45 = vmul.f32 %v1797_v1, %v75_v34  ;;  %v844_v47 = vmax.f32 %v588_v32, 0.0  ;;  %v592_v48 = vadd.f32 %v1802_v2, %v332_v33  ;;  %v845_v51 = vmax.f32 %v589_v36, 0.0  ;;  %v90_v32 = vld [vmem:[%s5085_s0 + $0x250] sm:$0xff]  ;;  %v91_v36 = vld [vmem:[%s5085_s0 + $0x258] sm:$0xff] }
  0x2e   :  { %1085 = vst [vmem:[%s5088_s3 + $0x128] sm:$0xff] %v829_v49  ;;  %v336_v49 = vmul.f32 %v1797_v1, %v76_v38  ;;  %v593_v52 = vadd.f32 %v1802_v2, %v333_v37  ;;  %v846_v55 = vmax.f32 %v590_v40, 0.0  ;;  %v594_v56 = vadd.f32 %v1802_v2, %v334_v41  ;;  %v92_v40 = vld [vmem:[%s5085_s0 + $0x260] sm:$0xff] }
  0x2f   :  { %1086 = vst [vmem:[%s5088_s3 + $0x130] sm:$0xff] %v830_v53  ;;  %v337_v53 = vmul.f32 %v1797_v1, %v77_v42  ;;  %v847_v59 = vmax.f32 %v591_v44, 0.0  ;;  %v595_v60 = vadd.f32 %v1802_v2, %v335_v45  ;;  %v848_v63 = vmax.f32 %v592_v48, 0.0  ;;  %v93_v44 = vld [vmem:[%s5085_s0 + $0x268] sm:$0xff]  ;;  %v94_v48 = vld [vmem:[%s5085_s0 + $0x270] sm:$0xff] }
  0x30   :  { %1087 = vst [vmem:[%s5088_s3 + $0x138] sm:$0xff] %v831_v57  ;;  %v338_v57 = vmul.f32 %v1797_v1, %v78_v46  ;;  %v596_v0 = vadd.f32 %v1802_v2, %v336_v49  ;;  %v849_v5 = vmax.f32 %v593_v52, 0.0  ;;  %v850_v9 = vmax.f32 %v594_v56, 0.0  ;;  %v95_v52 = vld [vmem:[%s5085_s0 + $0x278] sm:$0xff]  ;;  %v96_v56 = vld [vmem:[%s5085_s0 + $0x280] sm:$0xff] }
  0x31   :  { %1088 = vst [vmem:[%s5088_s3 + $0x140] sm:$0xff] %v832_v61  ;;  %v339_v61 = vmul.f32 %v1797_v1, %v79_v50  ;;  %v597_v6 = vadd.f32 %v1802_v2, %v337_v53  ;;  %v851_v13 = vmax.f32 %v595_v60, 0.0  ;;  %v97_v60 = vld [vmem:[%s5085_s0 + $0x288] sm:$0xff] }
  0x32   :  { %1089 = vst [vmem:[%s5088_s3 + $0x148] sm:$0xff] %v833_v3  ;;  %v340_v3 = vmul.f32 %v1797_v1, %v80_v54  ;;  %v598_v10 = vadd.f32 %v1802_v2, %v338_v57  ;;  %v852_v17 = vmax.f32 %v596_v0, 0.0  ;;  %v98_v0 = vld [vmem:[%s5085_s0 + $0x290] sm:$0xff] }
  0x33   :  { %1090 = vst [vmem:[%s5088_s3 + $0x150] sm:$0xff] %v834_v7  ;;  %v341_v7 = vmul.f32 %v1797_v1, %v81_v58  ;;  %v599_v14 = vadd.f32 %v1802_v2, %v339_v61  ;;  %v853_v21 = vmax.f32 %v597_v6, 0.0  ;;  %v99_v6 = vld [vmem:[%s5085_s0 + $0x298] sm:$0xff] }
  0x34   :  { %1091 = vst [vmem:[%s5088_s3 + $0x158] sm:$0xff] %v835_v11  ;;  %v342_v11 = vmul.f32 %v1797_v1, %v82_v62  ;;  %v600_v18 = vadd.f32 %v1802_v2, %v340_v3  ;;  %v854_v25 = vmax.f32 %v598_v10, 0.0  ;;  %v100_v10 = vld [vmem:[%s5085_s0 + $0x2a0] sm:$0xff] }
  0x35   :  { %1092 = vst [vmem:[%s5088_s3 + $0x160] sm:$0xff] %v836_v15  ;;  %v343_v15 = vmul.f32 %v1797_v1, %v83_v4  ;;  %v601_v22 = vadd.f32 %v1802_v2, %v341_v7  ;;  %v855_v29 = vmax.f32 %v599_v14, 0.0  ;;  %v101_v14 = vld [vmem:[%s5085_s0 + $0x2a8] sm:$0xff] }
  0x36   :  { %1093 = vst [vmem:[%s5088_s3 + $0x168] sm:$0xff] %v837_v19  ;;  %v344_v19 = vmul.f32 %v1797_v1, %v84_v8  ;;  %v602_v26 = vadd.f32 %v1802_v2, %v342_v11  ;;  %v856_v33 = vmax.f32 %v600_v18, 0.0  ;;  %v102_v18 = vld [vmem:[%s5085_s0 + $0x2b0] sm:$0xff] }
  0x37   :  { %1094 = vst [vmem:[%s5088_s3 + $0x170] sm:$0xff] %v838_v23  ;;  %v345_v23 = vmul.f32 %v1797_v1, %v85_v12  ;;  %v603_v30 = vadd.f32 %v1802_v2, %v343_v15  ;;  %v857_v37 = vmax.f32 %v601_v22, 0.0  ;;  %v103_v22 = vld [vmem:[%s5085_s0 + $0x2b8] sm:$0xff] }
  0x38   :  { %1095 = vst [vmem:[%s5088_s3 + $0x178] sm:$0xff] %v839_v27  ;;  %v346_v27 = vmul.f32 %v1797_v1, %v86_v16  ;;  %v604_v34 = vadd.f32 %v1802_v2, %v344_v19  ;;  %v858_v41 = vmax.f32 %v602_v26, 0.0  ;;  %v104_v26 = vld [vmem:[%s5085_s0 + $0x2c0] sm:$0xff] }
  0x39   :  { %1096 = vst [vmem:[%s5088_s3 + $0x180] sm:$0xff] %v840_v31  ;;  %v347_v31 = vmul.f32 %v1797_v1, %v87_v20  ;;  %v605_v38 = vadd.f32 %v1802_v2, %v345_v23  ;;  %v859_v45 = vmax.f32 %v603_v30, 0.0  ;;  %v105_v30 = vld [vmem:[%s5085_s0 + $0x2c8] sm:$0xff] }
  0x3a   :  { %1097 = vst [vmem:[%s5088_s3 + $0x188] sm:$0xff] %v841_v35  ;;  %v348_v35 = vmul.f32 %v1797_v1, %v88_v24  ;;  %v606_v42 = vadd.f32 %v1802_v2, %v346_v27  ;;  %v860_v49 = vmax.f32 %v604_v34, 0.0  ;;  %v106_v34 = vld [vmem:[%s5085_s0 + $0x2d0] sm:$0xff] }
  0x3b   :  { %1098 = vst [vmem:[%s5088_s3 + $0x190] sm:$0xff] %v842_v39  ;;  %v349_v39 = vmul.f32 %v1797_v1, %v89_v28  ;;  %v607_v46 = vadd.f32 %v1802_v2, %v347_v31  ;;  %v861_v53 = vmax.f32 %v605_v38, 0.0  ;;  %v107_v38 = vld [vmem:[%s5085_s0 + $0x2d8] sm:$0xff] }
  0x3c   :  { %1099 = vst [vmem:[%s5088_s3 + $0x198] sm:$0xff] %v843_v43  ;;  %v350_v43 = vmul.f32 %v1797_v1, %v90_v32  ;;  %v608_v50 = vadd.f32 %v1802_v2, %v348_v35  ;;  %v862_v57 = vmax.f32 %v606_v42, 0.0  ;;  %v108_v42 = vld [vmem:[%s5085_s0 + $0x2e0] sm:$0xff] }
  0x3d   :  { %1100 = vst [vmem:[%s5088_s3 + $0x1a0] sm:$0xff] %v844_v47  ;;  %v351_v47 = vmul.f32 %v1797_v1, %v91_v36  ;;  %v609_v54 = vadd.f32 %v1802_v2, %v349_v39  ;;  %v863_v61 = vmax.f32 %v607_v46, 0.0  ;;  %v109_v46 = vld [vmem:[%s5085_s0 + $0x2e8] sm:$0xff] }
  0x3e   :  { %1101 = vst [vmem:[%s5088_s3 + $0x1a8] sm:$0xff] %v845_v51  ;;  %v352_v51 = vmul.f32 %v1797_v1, %v92_v40  ;;  %v610_v58 = vadd.f32 %v1802_v2, %v350_v43  ;;  %v864_v3 = vmax.f32 %v608_v50, 0.0  ;;  %v110_v50 = vld [vmem:[%s5085_s0 + $0x2f0] sm:$0xff] }
  0x3f   :  { %1102 = vst [vmem:[%s5088_s3 + $0x1b0] sm:$0xff] %v846_v55  ;;  %v353_v55 = vmul.f32 %v1797_v1, %v93_v44  ;;  %v611_v62 = vadd.f32 %v1802_v2, %v351_v47  ;;  %v865_v7 = vmax.f32 %v609_v54, 0.0  ;;  %v111_v54 = vld [vmem:[%s5085_s0 + $0x2f8] sm:$0xff] }
  0x40   :  { %1103 = vst [vmem:[%s5088_s3 + $0x1b8] sm:$0xff] %v847_v59  ;;  %v354_v59 = vmul.f32 %v1797_v1, %v94_v48  ;;  %v612_v4 = vadd.f32 %v1802_v2, %v352_v51  ;;  %v866_v11 = vmax.f32 %v610_v58, 0.0  ;;  %v112_v58 = vld [vmem:[%s5085_s0 + $0x300] sm:$0xff] }
  0x41   :  { %1104 = vst [vmem:[%s5088_s3 + $0x1c0] sm:$0xff] %v848_v63  ;;  %v355_v63 = vmul.f32 %v1797_v1, %v95_v52  ;;  %v613_v8 = vadd.f32 %v1802_v2, %v353_v55  ;;  %v867_v15 = vmax.f32 %v611_v62, 0.0  ;;  %v113_v62 = vld [vmem:[%s5085_s0 + $0x308] sm:$0xff] }
  0x42   :  { %1105 = vst [vmem:[%s5088_s3 + $0x1c8] sm:$0xff] %v849_v5  ;;  %v356_v5 = vmul.f32 %v1797_v1, %v96_v56  ;;  %v614_v12 = vadd.f32 %v1802_v2, %v354_v59  ;;  %v868_v19 = vmax.f32 %v612_v4, 0.0  ;;  %v114_v4 = vld [vmem:[%s5085_s0 + $0x310] sm:$0xff] }
  0x43   :  { %1106 = vst [vmem:[%s5088_s3 + $0x1d0] sm:$0xff] %v850_v9  ;;  %v357_v9 = vmul.f32 %v1797_v1, %v97_v60  ;;  %v615_v16 = vadd.f32 %v1802_v2, %v355_v63  ;;  %v869_v23 = vmax.f32 %v613_v8, 0.0  ;;  %v115_v8 = vld [vmem:[%s5085_s0 + $0x318] sm:$0xff] }
  0x44   :  { %1107 = vst [vmem:[%s5088_s3 + $0x1d8] sm:$0xff] %v851_v13  ;;  %v358_v13 = vmul.f32 %v1797_v1, %v98_v0  ;;  %v616_v20 = vadd.f32 %v1802_v2, %v356_v5  ;;  %v870_v27 = vmax.f32 %v614_v12, 0.0  ;;  %v116_v12 = vld [vmem:[%s5085_s0 + $0x320] sm:$0xff] }
  0x45   :  { %1108 = vst [vmem:[%s5088_s3 + $0x1e0] sm:$0xff] %v852_v17  ;;  %v359_v17 = vmul.f32 %v1797_v1, %v99_v6  ;;  %v617_v24 = vadd.f32 %v1802_v2, %v357_v9  ;;  %v871_v31 = vmax.f32 %v615_v16, 0.0  ;;  %v117_v16 = vld [vmem:[%s5085_s0 + $0x328] sm:$0xff] }
  0x46   :  { %1109 = vst [vmem:[%s5088_s3 + $0x1e8] sm:$0xff] %v853_v21  ;;  %v360_v21 = vmul.f32 %v1797_v1, %v100_v10  ;;  %v618_v28 = vadd.f32 %v1802_v2, %v358_v13  ;;  %v872_v35 = vmax.f32 %v616_v20, 0.0  ;;  %v118_v20 = vld [vmem:[%s5085_s0 + $0x330] sm:$0xff] }
  0x47   :  { %1110 = vst [vmem:[%s5088_s3 + $0x1f0] sm:$0xff] %v854_v25  ;;  %v361_v25 = vmul.f32 %v1797_v1, %v101_v14  ;;  %v619_v32 = vadd.f32 %v1802_v2, %v359_v17  ;;  %v873_v39 = vmax.f32 %v617_v24, 0.0  ;;  %v119_v24 = vld [vmem:[%s5085_s0 + $0x338] sm:$0xff] }
  0x48   :  { %1111 = vst [vmem:[%s5088_s3 + $0x1f8] sm:$0xff] %v855_v29  ;;  %v362_v29 = vmul.f32 %v1797_v1, %v102_v18  ;;  %v620_v36 = vadd.f32 %v1802_v2, %v360_v21  ;;  %v874_v43 = vmax.f32 %v618_v28, 0.0  ;;  %v120_v28 = vld [vmem:[%s5085_s0 + $0x340] sm:$0xff] }
  0x49   :  { %1112 = vst [vmem:[%s5088_s3 + $0x200] sm:$0xff] %v856_v33  ;;  %v363_v33 = vmul.f32 %v1797_v1, %v103_v22  ;;  %v621_v40 = vadd.f32 %v1802_v2, %v361_v25  ;;  %v875_v47 = vmax.f32 %v619_v32, 0.0  ;;  %v121_v32 = vld [vmem:[%s5085_s0 + $0x348] sm:$0xff] }
  0x4a   :  { %1113 = vst [vmem:[%s5088_s3 + $0x208] sm:$0xff] %v857_v37  ;;  %v364_v37 = vmul.f32 %v1797_v1, %v104_v26  ;;  %v622_v44 = vadd.f32 %v1802_v2, %v362_v29  ;;  %v876_v51 = vmax.f32 %v620_v36, 0.0  ;;  %v122_v36 = vld [vmem:[%s5085_s0 + $0x350] sm:$0xff] }
  0x4b   :  { %1114 = vst [vmem:[%s5088_s3 + $0x210] sm:$0xff] %v858_v41  ;;  %v365_v41 = vmul.f32 %v1797_v1, %v105_v30  ;;  %v623_v48 = vadd.f32 %v1802_v2, %v363_v33  ;;  %v877_v55 = vmax.f32 %v621_v40, 0.0  ;;  %v123_v40 = vld [vmem:[%s5085_s0 + $0x358] sm:$0xff] }
  0x4c   :  { %1115 = vst [vmem:[%s5088_s3 + $0x218] sm:$0xff] %v859_v45  ;;  %v366_v45 = vmul.f32 %v1797_v1, %v106_v34  ;;  %v624_v52 = vadd.f32 %v1802_v2, %v364_v37  ;;  %v878_v59 = vmax.f32 %v622_v44, 0.0 }
  0x4d   :  { %1116 = vst [vmem:[%s5088_s3 + $0x220] sm:$0xff] %v860_v49  ;;  %v367_v49 = vmul.f32 %v1797_v1, %v107_v38  ;;  %v625_v56 = vadd.f32 %v1802_v2, %v365_v41  ;;  %v879_v63 = vmax.f32 %v623_v48, 0.0  ;;  %v125_v48 = vld [vmem:[%s5085_s0 + $0x368] sm:$0xff] }
  0x4e   :  { %1117 = vst [vmem:[%s5088_s3 + $0x228] sm:$0xff] %v861_v53  ;;  %v368_v53 = vmul.f32 %v1797_v1, %v108_v42  ;;  %v626_v60 = vadd.f32 %v1802_v2, %v366_v45  ;;  %v880_v5 = vmax.f32 %v624_v52, 0.0  ;;  %v126_v52 = vld [vmem:[%s5085_s0 + $0x370] sm:$0xff] }
  0x4f   :  { %1118 = vst [vmem:[%s5088_s3 + $0x230] sm:$0xff] %v862_v57  ;;  %v369_v57 = vmul.f32 %v1797_v1, %v109_v46  ;;  %v627_v0 = vadd.f32 %v1802_v2, %v367_v49  ;;  %v881_v9 = vmax.f32 %v625_v56, 0.0  ;;  %v127_v56 = vld [vmem:[%s5085_s0 + $0x378] sm:$0xff] }
  0x50   :  { %1119 = vst [vmem:[%s5088_s3 + $0x238] sm:$0xff] %v863_v61  ;;  %v370_v61 = vmul.f32 %v1797_v1, %v110_v50  ;;  %v628_v6 = vadd.f32 %v1802_v2, %v368_v53  ;;  %v882_v13 = vmax.f32 %v626_v60, 0.0  ;;  %v128_v60 = vld [vmem:[%s5085_s0 + $0x380] sm:$0xff] }
  0x51   :  { %1120 = vst [vmem:[%s5088_s3 + $0x240] sm:$0xff] %v864_v3  ;;  %v371_v3 = vmul.f32 %v1797_v1, %v111_v54  ;;  %v629_v10 = vadd.f32 %v1802_v2, %v369_v57  ;;  %v883_v17 = vmax.f32 %v627_v0, 0.0  ;;  %v129_v0 = vld [vmem:[%s5085_s0 + $0x388] sm:$0xff] }
  0x52   :  { %1121 = vst [vmem:[%s5088_s3 + $0x248] sm:$0xff] %v865_v7  ;;  %v372_v7 = vmul.f32 %v1797_v1, %v112_v58  ;;  %v630_v14 = vadd.f32 %v1802_v2, %v370_v61  ;;  %v884_v21 = vmax.f32 %v628_v6, 0.0  ;;  %v130_v6 = vld [vmem:[%s5085_s0 + $0x390] sm:$0xff] }
  0x53   :  { %1122 = vst [vmem:[%s5088_s3 + $0x250] sm:$0xff] %v866_v11  ;;  %v373_v11 = vmul.f32 %v1797_v1, %v113_v62  ;;  %v631_v18 = vadd.f32 %v1802_v2, %v371_v3  ;;  %v885_v25 = vmax.f32 %v629_v10, 0.0  ;;  %v131_v10 = vld [vmem:[%s5085_s0 + $0x398] sm:$0xff] }
  0x54   :  { %1123 = vst [vmem:[%s5088_s3 + $0x258] sm:$0xff] %v867_v15  ;;  %v374_v15 = vmul.f32 %v1797_v1, %v114_v4  ;;  %v632_v22 = vadd.f32 %v1802_v2, %v372_v7  ;;  %v886_v29 = vmax.f32 %v630_v14, 0.0  ;;  %v132_v14 = vld [vmem:[%s5085_s0 + $0x3a0] sm:$0xff] }
  0x55   :  { %1124 = vst [vmem:[%s5088_s3 + $0x260] sm:$0xff] %v868_v19  ;;  %v375_v19 = vmul.f32 %v1797_v1, %v115_v8  ;;  %v633_v26 = vadd.f32 %v1802_v2, %v373_v11  ;;  %v887_v33 = vmax.f32 %v631_v18, 0.0  ;;  %v133_v18 = vld [vmem:[%s5085_s0 + $0x3a8] sm:$0xff] }
  0x56   :  { %1125 = vst [vmem:[%s5088_s3 + $0x268] sm:$0xff] %v869_v23  ;;  %v376_v23 = vmul.f32 %v1797_v1, %v116_v12  ;;  %v634_v30 = vadd.f32 %v1802_v2, %v374_v15  ;;  %v888_v37 = vmax.f32 %v632_v22, 0.0  ;;  %v134_v22 = vld [vmem:[%s5085_s0 + $0x3b0] sm:$0xff] }
  0x57   :  { %1126 = vst [vmem:[%s5088_s3 + $0x270] sm:$0xff] %v870_v27  ;;  %v377_v27 = vmul.f32 %v1797_v1, %v117_v16  ;;  %v635_v34 = vadd.f32 %v1802_v2, %v375_v19  ;;  %v889_v41 = vmax.f32 %v633_v26, 0.0  ;;  %v135_v26 = vld [vmem:[%s5085_s0 + $0x3b8] sm:$0xff] }
  0x58   :  { %1127 = vst [vmem:[%s5088_s3 + $0x278] sm:$0xff] %v871_v31  ;;  %v378_v31 = vmul.f32 %v1797_v1, %v118_v20  ;;  %v636_v38 = vadd.f32 %v1802_v2, %v376_v23  ;;  %v890_v45 = vmax.f32 %v634_v30, 0.0  ;;  %v136_v30 = vld [vmem:[%s5085_s0 + $0x3c0] sm:$0xff] }
  0x59   :  { %1128 = vst [vmem:[%s5088_s3 + $0x280] sm:$0xff] %v872_v35  ;;  %v379_v35 = vmul.f32 %v1797_v1, %v119_v24  ;;  %v637_v42 = vadd.f32 %v1802_v2, %v377_v27  ;;  %v2635_v2 = vld [vmem:[%s5087_s2] ss:$0 sm:$0xff]  ;;  %v891_v49 = vmax.f32 %v635_v34, 0.0  ;;  %v137_v34 = vld [vmem:[%s5085_s0 + $0x3c8] sm:$0xff] }
  0x5a   :  { %1129 = vst [vmem:[%s5088_s3 + $0x288] sm:$0xff] %v873_v39  ;;  %v380_v39 = vmul.f32 %v1797_v1, %v120_v28  ;;  %v124_v1 = vld [vmem:[%s5085_s0 + $0x360] sm:$0xff]  ;;  %v638_v46 = vadd.f32 %v2635_v2, %v378_v31  ;;  %v892_v53 = vmax.f32 %v636_v38, 0.0  ;;  %v138_v38 = vld [vmem:[%s5085_s0 + $0x3d0] sm:$0xff] }
  0x5b   :  { %1130 = vst [vmem:[%s5088_s3 + $0x290] sm:$0xff] %v874_v43  ;;  %v2623_v43 = vld [vmem:[%s5086_s1] ss:$0 sm:$0xff]  ;;  %v639_v50 = vadd.f32 %v2635_v2, %v379_v35  ;;  %v893_v57 = vmax.f32 %v637_v42, 0.0  ;;  %v139_v42 = vld [vmem:[%s5085_s0 + $0x3d8] sm:$0xff] }
  0x5c   :  { %1131 = vst [vmem:[%s5088_s3 + $0x298] sm:$0xff] %v875_v47  ;;  %v381_v44 = vmul.f32 %v2623_v43, %v121_v32  ;;  %v382_v47 = vmul.f32 %v2623_v43, %v122_v36  ;;  %v640_v54 = vadd.f32 %v2635_v2, %v380_v39  ;;  %v894_v61 = vmax.f32 %v638_v46, 0.0  ;;  %v140_v46 = vld [vmem:[%s5085_s0 + $0x3e0] sm:$0xff] }
  0x5d   :  { %1132 = vst [vmem:[%s5088_s3 + $0x2a0] sm:$0xff] %v876_v51  ;;  %v383_v51 = vmul.f32 %v2623_v43, %v123_v40  ;;  %v895_v3 = vmax.f32 %v639_v50, 0.0  ;;  %v141_v50 = vld [vmem:[%s5085_s0 + $0x3e8] sm:$0xff] }
  0x5e   :  { %1133 = vst [vmem:[%s5088_s3 + $0x2a8] sm:$0xff] %v877_v55  ;;  %v384_v55 = vmul.f32 %v2623_v43, %v124_v1  ;;  %v641_v58 = vadd.f32 %v2635_v2, %v381_v44  ;;  %v642_v62 = vadd.f32 %v2635_v2, %v382_v47  ;;  %v896_v7 = vmax.f32 %v640_v54, 0.0  ;;  %v142_v54 = vld [vmem:[%s5085_s0 + $0x3f0] sm:$0xff] }
  0x5f   :  { %1134 = vst [vmem:[%s5088_s3 + $0x2b0] sm:$0xff] %v878_v59  ;;  %v385_v59 = vmul.f32 %v2623_v43, %v125_v48  ;;  %v643_v4 = vadd.f32 %v2635_v2, %v383_v51 }
  0x60   :  { %1135 = vst [vmem:[%s5088_s3 + $0x2b8] sm:$0xff] %v879_v63  ;;  %v386_v63 = vmul.f32 %v2623_v43, %v126_v52  ;;  %v644_v8 = vadd.f32 %v2635_v2, %v384_v55  ;;  %v897_v11 = vmax.f32 %v641_v58, 0.0  ;;  %v898_v15 = vmax.f32 %v642_v62, 0.0  ;;  %v143_v58 = vld [vmem:[%s5085_s0 + $0x3f8] sm:$0xff]  ;;  %v144_v62 = vld [vmem:[%s5085_s0 + $0x400] sm:$0xff] }
  0x61   :  { %1136 = vst [vmem:[%s5088_s3 + $0x2c0] sm:$0xff] %v880_v5  ;;  %v387_v5 = vmul.f32 %v2623_v43, %v127_v56  ;;  %v645_v12 = vadd.f32 %v2635_v2, %v385_v59  ;;  %v899_v19 = vmax.f32 %v643_v4, 0.0  ;;  %v145_v4 = vld [vmem:[%s5085_s0 + $0x408] sm:$0xff] }
  0x62   :  { %1137 = vst [vmem:[%s5088_s3 + $0x2c8] sm:$0xff] %v881_v9  ;;  %v388_v9 = vmul.f32 %v2623_v43, %v128_v60  ;;  %v646_v16 = vadd.f32 %v2635_v2, %v386_v63  ;;  %v900_v23 = vmax.f32 %v644_v8, 0.0  ;;  %v146_v8 = vld [vmem:[%s5085_s0 + $0x410] sm:$0xff] }
  0x63   :  { %1138 = vst [vmem:[%s5088_s3 + $0x2d0] sm:$0xff] %v882_v13  ;;  %v389_v13 = vmul.f32 %v2623_v43, %v129_v0  ;;  %v647_v20 = vadd.f32 %v2635_v2, %v387_v5  ;;  %v901_v27 = vmax.f32 %v645_v12, 0.0  ;;  %v147_v12 = vld [vmem:[%s5085_s0 + $0x418] sm:$0xff] }
  0x64   :  { %1139 = vst [vmem:[%s5088_s3 + $0x2d8] sm:$0xff] %v883_v17  ;;  %v390_v17 = vmul.f32 %v2623_v43, %v130_v6  ;;  %v648_v24 = vadd.f32 %v2635_v2, %v388_v9  ;;  %v902_v31 = vmax.f32 %v646_v16, 0.0  ;;  %v148_v16 = vld [vmem:[%s5085_s0 + $0x420] sm:$0xff] }
  0x65   :  { %1140 = vst [vmem:[%s5088_s3 + $0x2e0] sm:$0xff] %v884_v21  ;;  %v391_v21 = vmul.f32 %v2623_v43, %v131_v10  ;;  %v649_v28 = vadd.f32 %v2635_v2, %v389_v13  ;;  %v903_v35 = vmax.f32 %v647_v20, 0.0  ;;  %v149_v20 = vld [vmem:[%s5085_s0 + $0x428] sm:$0xff] }
  0x66   :  { %1141 = vst [vmem:[%s5088_s3 + $0x2e8] sm:$0xff] %v885_v25  ;;  %v392_v25 = vmul.f32 %v2623_v43, %v132_v14  ;;  %v650_v32 = vadd.f32 %v2635_v2, %v390_v17  ;;  %v904_v39 = vmax.f32 %v648_v24, 0.0  ;;  %v150_v24 = vld [vmem:[%s5085_s0 + $0x430] sm:$0xff] }
  0x67   :  { %1142 = vst [vmem:[%s5088_s3 + $0x2f0] sm:$0xff] %v886_v29  ;;  %v393_v29 = vmul.f32 %v2623_v43, %v133_v18  ;;  %v651_v36 = vadd.f32 %v2635_v2, %v391_v21  ;;  %v905_v44 = vmax.f32 %v649_v28, 0.0  ;;  %v151_v28 = vld [vmem:[%s5085_s0 + $0x438] sm:$0xff] }
  0x68   :  { %1143 = vst [vmem:[%s5088_s3 + $0x2f8] sm:$0xff] %v887_v33  ;;  %v394_v33 = vmul.f32 %v2623_v43, %v134_v22  ;;  %v652_v40 = vadd.f32 %v2635_v2, %v392_v25  ;;  %v906_v47 = vmax.f32 %v650_v32, 0.0  ;;  %v152_v32 = vld [vmem:[%s5085_s0 + $0x440] sm:$0xff] }
  0x69   :  { %1144 = vst [vmem:[%s5088_s3 + $0x300] sm:$0xff] %v888_v37  ;;  %v395_v37 = vmul.f32 %v2623_v43, %v135_v26  ;;  %v653_v1 = vadd.f32 %v2635_v2, %v393_v29  ;;  %v907_v51 = vmax.f32 %v651_v36, 0.0  ;;  %v153_v36 = vld [vmem:[%s5085_s0 + $0x448] sm:$0xff] }
  0x6a   :  { %1145 = vst [vmem:[%s5088_s3 + $0x308] sm:$0xff] %v889_v41  ;;  %v396_v41 = vmul.f32 %v2623_v43, %v136_v30  ;;  %v654_v48 = vadd.f32 %v2635_v2, %v394_v33  ;;  %v908_v55 = vmax.f32 %v652_v40, 0.0  ;;  %v154_v40 = vld [vmem:[%s5085_s0 + $0x450] sm:$0xff] }
  0x6b   :  { %1146 = vst [vmem:[%s5088_s3 + $0x310] sm:$0xff] %v890_v45  ;;  %v397_v45 = vmul.f32 %v2623_v43, %v137_v34  ;;  %v655_v52 = vadd.f32 %v2635_v2, %v395_v37  ;;  %v909_v59 = vmax.f32 %v653_v1, 0.0  ;;  %v155_v1 = vld [vmem:[%s5085_s0 + $0x458] sm:$0xff] }
  0x6c   :  { %1147 = vst [vmem:[%s5088_s3 + $0x318] sm:$0xff] %v891_v49  ;;  %v398_v49 = vmul.f32 %v2623_v43, %v138_v38  ;;  %v656_v56 = vadd.f32 %v2635_v2, %v396_v41  ;;  %v910_v63 = vmax.f32 %v654_v48, 0.0  ;;  %v156_v48 = vld [vmem:[%s5085_s0 + $0x460] sm:$0xff] }
  0x6d   :  { %1148 = vst [vmem:[%s5088_s3 + $0x320] sm:$0xff] %v892_v53  ;;  %v399_v53 = vmul.f32 %v2623_v43, %v139_v42  ;;  %v657_v60 = vadd.f32 %v2635_v2, %v397_v45  ;;  %v911_v5 = vmax.f32 %v655_v52, 0.0  ;;  %v157_v52 = vld [vmem:[%s5085_s0 + $0x468] sm:$0xff] }
  0x6e   :  { %1149 = vst [vmem:[%s5088_s3 + $0x328] sm:$0xff] %v893_v57  ;;  %v400_v57 = vmul.f32 %v2623_v43, %v140_v46  ;;  %v658_v0 = vadd.f32 %v2635_v2, %v398_v49  ;;  %v912_v9 = vmax.f32 %v656_v56, 0.0  ;;  %v158_v56 = vld [vmem:[%s5085_s0 + $0x470] sm:$0xff] }
  0x6f   :  { %1150 = vst [vmem:[%s5088_s3 + $0x330] sm:$0xff] %v894_v61  ;;  %v401_v61 = vmul.f32 %v2623_v43, %v141_v50  ;;  %v659_v6 = vadd.f32 %v2635_v2, %v399_v53  ;;  %v913_v13 = vmax.f32 %v657_v60, 0.0  ;;  %v159_v60 = vld [vmem:[%s5085_s0 + $0x478] sm:$0xff] }
  0x70   :  { %1151 = vst [vmem:[%s5088_s3 + $0x338] sm:$0xff] %v895_v3  ;;  %v402_v3 = vmul.f32 %v2623_v43, %v142_v54  ;;  %v660_v10 = vadd.f32 %v2635_v2, %v400_v57  ;;  %v914_v17 = vmax.f32 %v658_v0, 0.0  ;;  %v160_v0 = vld [vmem:[%s5085_s0 + $0x480] sm:$0xff] }
  0x71   :  { %1152 = vst [vmem:[%s5088_s3 + $0x340] sm:$0xff] %v896_v7  ;;  %v403_v7 = vmul.f32 %v2623_v43, %v143_v58  ;;  %v661_v14 = vadd.f32 %v2635_v2, %v401_v61  ;;  %v915_v21 = vmax.f32 %v659_v6, 0.0  ;;  %v161_v6 = vld [vmem:[%s5085_s0 + $0x488] sm:$0xff] }
  0x72   :  { %1153 = vst [vmem:[%s5088_s3 + $0x348] sm:$0xff] %v897_v11  ;;  %v404_v11 = vmul.f32 %v2623_v43, %v144_v62  ;;  %v662_v18 = vadd.f32 %v2635_v2, %v402_v3  ;;  %v916_v25 = vmax.f32 %v660_v10, 0.0  ;;  %v162_v10 = vld [vmem:[%s5085_s0 + $0x490] sm:$0xff] }
  0x73   :  { %1154 = vst [vmem:[%s5088_s3 + $0x350] sm:$0xff] %v898_v15  ;;  %v405_v15 = vmul.f32 %v2623_v43, %v145_v4  ;;  %v663_v22 = vadd.f32 %v2635_v2, %v403_v7  ;;  %v917_v29 = vmax.f32 %v661_v14, 0.0  ;;  %v163_v14 = vld [vmem:[%s5085_s0 + $0x498] sm:$0xff] }
  0x74   :  { %1155 = vst [vmem:[%s5088_s3 + $0x358] sm:$0xff] %v899_v19  ;;  %v406_v19 = vmul.f32 %v2623_v43, %v146_v8  ;;  %v664_v26 = vadd.f32 %v2635_v2, %v404_v11  ;;  %v918_v33 = vmax.f32 %v662_v18, 0.0  ;;  %v164_v18 = vld [vmem:[%s5085_s0 + $0x4a0] sm:$0xff] }
  0x75   :  { %1156 = vst [vmem:[%s5088_s3 + $0x360] sm:$0xff] %v900_v23  ;;  %v407_v23 = vmul.f32 %v2623_v43, %v147_v12  ;;  %v665_v30 = vadd.f32 %v2635_v2, %v405_v15  ;;  %v919_v37 = vmax.f32 %v663_v22, 0.0  ;;  %v165_v22 = vld [vmem:[%s5085_s0 + $0x4a8] sm:$0xff] }
  0x76   :  { %1157 = vst [vmem:[%s5088_s3 + $0x368] sm:$0xff] %v901_v27  ;;  %v408_v27 = vmul.f32 %v2623_v43, %v148_v16  ;;  %v666_v34 = vadd.f32 %v2635_v2, %v406_v19  ;;  %v920_v41 = vmax.f32 %v664_v26, 0.0  ;;  %v166_v26 = vld [vmem:[%s5085_s0 + $0x4b0] sm:$0xff] }
  0x77   :  { %1158 = vst [vmem:[%s5088_s3 + $0x370] sm:$0xff] %v902_v31  ;;  %v409_v31 = vmul.f32 %v2623_v43, %v149_v20  ;;  %v667_v38 = vadd.f32 %v2635_v2, %v407_v23  ;;  %v921_v45 = vmax.f32 %v665_v30, 0.0  ;;  %v167_v30 = vld [vmem:[%s5085_s0 + $0x4b8] sm:$0xff] }
  0x78   :  { %1159 = vst [vmem:[%s5088_s3 + $0x378] sm:$0xff] %v903_v35  ;;  %v410_v35 = vmul.f32 %v2623_v43, %v150_v24  ;;  %v668_v42 = vadd.f32 %v2635_v2, %v408_v27  ;;  %v922_v49 = vmax.f32 %v666_v34, 0.0  ;;  %v168_v34 = vld [vmem:[%s5085_s0 + $0x4c0] sm:$0xff] }
  0x79   :  { %1160 = vst [vmem:[%s5088_s3 + $0x380] sm:$0xff] %v904_v39  ;;  %v411_v39 = vmul.f32 %v2623_v43, %v151_v28  ;;  %v669_v46 = vadd.f32 %v2635_v2, %v409_v31  ;;  %v923_v53 = vmax.f32 %v667_v38, 0.0  ;;  %v169_v38 = vld [vmem:[%s5085_s0 + $0x4c8] sm:$0xff] }
  0x7a   :  { %1161 = vst [vmem:[%s5088_s3 + $0x388] sm:$0xff] %v905_v44  ;;  %v412_v44 = vmul.f32 %v2623_v43, %v152_v32  ;;  %v670_v50 = vadd.f32 %v2635_v2, %v410_v35  ;;  %v924_v57 = vmax.f32 %v668_v42, 0.0  ;;  %v170_v42 = vld [vmem:[%s5085_s0 + $0x4d0] sm:$0xff] }
  0x7b   :  { %1162 = vst [vmem:[%s5088_s3 + $0x390] sm:$0xff] %v906_v47  ;;  %v413_v47 = vmul.f32 %v2623_v43, %v153_v36  ;;  %v671_v54 = vadd.f32 %v2635_v2, %v411_v39  ;;  %v925_v61 = vmax.f32 %v669_v46, 0.0  ;;  %v171_v46 = vld [vmem:[%s5085_s0 + $0x4d8] sm:$0xff] }
  0x7c   :  { %1163 = vst [vmem:[%s5088_s3 + $0x398] sm:$0xff] %v907_v51  ;;  %v414_v51 = vmul.f32 %v2623_v43, %v154_v40  ;;  %v672_v58 = vadd.f32 %v2635_v2, %v412_v44  ;;  %v926_v3 = vmax.f32 %v670_v50, 0.0  ;;  %v172_v50 = vld [vmem:[%s5085_s0 + $0x4e0] sm:$0xff] }
  0x7d   :  { %1164 = vst [vmem:[%s5088_s3 + $0x3a0] sm:$0xff] %v908_v55  ;;  %v415_v55 = vmul.f32 %v2623_v43, %v155_v1  ;;  %v673_v62 = vadd.f32 %v2635_v2, %v413_v47  ;;  %v927_v7 = vmax.f32 %v671_v54, 0.0  ;;  %v173_v54 = vld [vmem:[%s5085_s0 + $0x4e8] sm:$0xff] }
  0x7e   :  { %1165 = vst [vmem:[%s5088_s3 + $0x3a8] sm:$0xff] %v909_v59  ;;  %v416_v59 = vmul.f32 %v2623_v43, %v156_v48  ;;  %v674_v4 = vadd.f32 %v2635_v2, %v414_v51  ;;  %v928_v11 = vmax.f32 %v672_v58, 0.0  ;;  %v174_v58 = vld [vmem:[%s5085_s0 + $0x4f0] sm:$0xff] }
  0x7f   :  { %1166 = vst [vmem:[%s5088_s3 + $0x3b0] sm:$0xff] %v910_v63  ;;  %v417_v63 = vmul.f32 %v2623_v43, %v157_v52  ;;  %v675_v8 = vadd.f32 %v2635_v2, %v415_v55  ;;  %v929_v15 = vmax.f32 %v673_v62, 0.0  ;;  %v175_v62 = vld [vmem:[%s5085_s0 + $0x4f8] sm:$0xff] }
  0x80   :  { %1167 = vst [vmem:[%s5088_s3 + $0x3b8] sm:$0xff] %v911_v5  ;;  %v418_v5 = vmul.f32 %v2623_v43, %v158_v56  ;;  %v676_v12 = vadd.f32 %v2635_v2, %v416_v59  ;;  %v930_v19 = vmax.f32 %v674_v4, 0.0  ;;  %v176_v4 = vld [vmem:[%s5085_s0 + $0x500] sm:$0xff] }
  0x81   :  { %1168 = vst [vmem:[%s5088_s3 + $0x3c0] sm:$0xff] %v912_v9  ;;  %v419_v9 = vmul.f32 %v2623_v43, %v159_v60  ;;  %v677_v16 = vadd.f32 %v2635_v2, %v417_v63  ;;  %v931_v23 = vmax.f32 %v675_v8, 0.0  ;;  %v177_v8 = vld [vmem:[%s5085_s0 + $0x508] sm:$0xff] }
  0x82   :  { %1169 = vst [vmem:[%s5088_s3 + $0x3c8] sm:$0xff] %v913_v13  ;;  %v420_v13 = vmul.f32 %v2623_v43, %v160_v0  ;;  %v678_v20 = vadd.f32 %v2635_v2, %v418_v5  ;;  %v932_v27 = vmax.f32 %v676_v12, 0.0  ;;  %v178_v12 = vld [vmem:[%s5085_s0 + $0x510] sm:$0xff] }
  0x83   :  { %1170 = vst [vmem:[%s5088_s3 + $0x3d0] sm:$0xff] %v914_v17  ;;  %v421_v17 = vmul.f32 %v2623_v43, %v161_v6  ;;  %v679_v24 = vadd.f32 %v2635_v2, %v419_v9  ;;  %v933_v31 = vmax.f32 %v677_v16, 0.0  ;;  %v179_v16 = vld [vmem:[%s5085_s0 + $0x518] sm:$0xff] }
  0x84   :  { %1171 = vst [vmem:[%s5088_s3 + $0x3d8] sm:$0xff] %v915_v21  ;;  %v422_v21 = vmul.f32 %v2623_v43, %v162_v10  ;;  %v680_v28 = vadd.f32 %v2635_v2, %v420_v13  ;;  %v934_v35 = vmax.f32 %v678_v20, 0.0  ;;  %v180_v20 = vld [vmem:[%s5085_s0 + $0x520] sm:$0xff] }
  0x85   :  { %1172 = vst [vmem:[%s5088_s3 + $0x3e0] sm:$0xff] %v916_v25  ;;  %v423_v25 = vmul.f32 %v2623_v43, %v163_v14  ;;  %v681_v32 = vadd.f32 %v2635_v2, %v421_v17  ;;  %v935_v39 = vmax.f32 %v679_v24, 0.0  ;;  %v181_v24 = vld [vmem:[%s5085_s0 + $0x528] sm:$0xff] }
  0x86   :  { %1173 = vst [vmem:[%s5088_s3 + $0x3e8] sm:$0xff] %v917_v29  ;;  %v424_v29 = vmul.f32 %v2623_v43, %v164_v18  ;;  %v682_v36 = vadd.f32 %v2635_v2, %v422_v21  ;;  %v936_v44 = vmax.f32 %v680_v28, 0.0  ;;  %v182_v28 = vld [vmem:[%s5085_s0 + $0x530] sm:$0xff] }
  0x87   :  { %1174 = vst [vmem:[%s5088_s3 + $0x3f0] sm:$0xff] %v918_v33  ;;  %v425_v33 = vmul.f32 %v2623_v43, %v165_v22  ;;  %v683_v40 = vadd.f32 %v2635_v2, %v423_v25  ;;  %v937_v47 = vmax.f32 %v681_v32, 0.0  ;;  %v183_v32 = vld [vmem:[%s5085_s0 + $0x538] sm:$0xff] }
  0x88   :  { %1175 = vst [vmem:[%s5088_s3 + $0x3f8] sm:$0xff] %v919_v37  ;;  %v426_v37 = vmul.f32 %v2623_v43, %v166_v26  ;;  %v684_v1 = vadd.f32 %v2635_v2, %v424_v29  ;;  %v938_v51 = vmax.f32 %v682_v36, 0.0  ;;  %v184_v36 = vld [vmem:[%s5085_s0 + $0x540] sm:$0xff] }
  0x89   :  { %1176 = vst [vmem:[%s5088_s3 + $0x400] sm:$0xff] %v920_v41  ;;  %v427_v41 = vmul.f32 %v2623_v43, %v167_v30  ;;  %v685_v48 = vadd.f32 %v2635_v2, %v425_v33  ;;  %v939_v55 = vmax.f32 %v683_v40, 0.0  ;;  %v185_v40 = vld [vmem:[%s5085_s0 + $0x548] sm:$0xff] }
  0x8a   :  { %1177 = vst [vmem:[%s5088_s3 + $0x408] sm:$0xff] %v921_v45  ;;  %v428_v45 = vmul.f32 %v2623_v43, %v168_v34  ;;  %v686_v52 = vadd.f32 %v2635_v2, %v426_v37  ;;  %v940_v59 = vmax.f32 %v684_v1, 0.0  ;;  %v186_v1 = vld [vmem:[%s5085_s0 + $0x550] sm:$0xff] }
  0x8b   :  { %1178 = vst [vmem:[%s5088_s3 + $0x410] sm:$0xff] %v922_v49  ;;  %v429_v49 = vmul.f32 %v2623_v43, %v169_v38  ;;  %v687_v56 = vadd.f32 %v2635_v2, %v427_v41  ;;  %v941_v63 = vmax.f32 %v685_v48, 0.0  ;;  %v187_v48 = vld [vmem:[%s5085_s0 + $0x558] sm:$0xff] }
  0x8c   :  { %1179 = vst [vmem:[%s5088_s3 + $0x418] sm:$0xff] %v923_v53  ;;  %v430_v53 = vmul.f32 %v2623_v43, %v170_v42  ;;  %v688_v60 = vadd.f32 %v2635_v2, %v428_v45  ;;  %v942_v5 = vmax.f32 %v686_v52, 0.0  ;;  %v188_v52 = vld [vmem:[%s5085_s0 + $0x560] sm:$0xff] }
  0x8d   :  { %1180 = vst [vmem:[%s5088_s3 + $0x420] sm:$0xff] %v924_v57  ;;  %v431_v57 = vmul.f32 %v2623_v43, %v171_v46  ;;  %v689_v0 = vadd.f32 %v2635_v2, %v429_v49  ;;  %v943_v9 = vmax.f32 %v687_v56, 0.0  ;;  %v189_v56 = vld [vmem:[%s5085_s0 + $0x568] sm:$0xff] }
  0x8e   :  { %1181 = vst [vmem:[%s5088_s3 + $0x428] sm:$0xff] %v925_v61  ;;  %v432_v61 = vmul.f32 %v2623_v43, %v172_v50  ;;  %v690_v6 = vadd.f32 %v2635_v2, %v430_v53  ;;  %v944_v13 = vmax.f32 %v688_v60, 0.0  ;;  %v190_v60 = vld [vmem:[%s5085_s0 + $0x570] sm:$0xff] }
  0x8f   :  { %1182 = vst [vmem:[%s5088_s3 + $0x430] sm:$0xff] %v926_v3  ;;  %v433_v3 = vmul.f32 %v2623_v43, %v173_v54  ;;  %v691_v10 = vadd.f32 %v2635_v2, %v431_v57  ;;  %v945_v17 = vmax.f32 %v689_v0, 0.0  ;;  %v191_v0 = vld [vmem:[%s5085_s0 + $0x578] sm:$0xff] }
  0x90   :  { %1183 = vst [vmem:[%s5088_s3 + $0x438] sm:$0xff] %v927_v7  ;;  %v434_v7 = vmul.f32 %v2623_v43, %v174_v58  ;;  %v692_v14 = vadd.f32 %v2635_v2, %v432_v61  ;;  %v946_v21 = vmax.f32 %v690_v6, 0.0  ;;  %v192_v6 = vld [vmem:[%s5085_s0 + $0x580] sm:$0xff] }
  0x91   :  { %1184 = vst [vmem:[%s5088_s3 + $0x440] sm:$0xff] %v928_v11  ;;  %v435_v11 = vmul.f32 %v2623_v43, %v175_v62  ;;  %v693_v18 = vadd.f32 %v2635_v2, %v433_v3  ;;  %v947_v25 = vmax.f32 %v691_v10, 0.0  ;;  %v193_v10 = vld [vmem:[%s5085_s0 + $0x588] sm:$0xff] }
  0x92   :  { %1185 = vst [vmem:[%s5088_s3 + $0x448] sm:$0xff] %v929_v15  ;;  %v436_v15 = vmul.f32 %v2623_v43, %v176_v4  ;;  %v694_v22 = vadd.f32 %v2635_v2, %v434_v7  ;;  %v948_v29 = vmax.f32 %v692_v14, 0.0  ;;  %v194_v14 = vld [vmem:[%s5085_s0 + $0x590] sm:$0xff] }
  0x93   :  { %1186 = vst [vmem:[%s5088_s3 + $0x450] sm:$0xff] %v930_v19  ;;  %v437_v19 = vmul.f32 %v2623_v43, %v177_v8  ;;  %v695_v26 = vadd.f32 %v2635_v2, %v435_v11  ;;  %v949_v33 = vmax.f32 %v693_v18, 0.0  ;;  %v195_v18 = vld [vmem:[%s5085_s0 + $0x598] sm:$0xff] }
  0x94   :  { %1187 = vst [vmem:[%s5088_s3 + $0x458] sm:$0xff] %v931_v23  ;;  %v438_v23 = vmul.f32 %v2623_v43, %v178_v12  ;;  %v696_v30 = vadd.f32 %v2635_v2, %v436_v15  ;;  %v950_v37 = vmax.f32 %v694_v22, 0.0  ;;  %v196_v22 = vld [vmem:[%s5085_s0 + $0x5a0] sm:$0xff] }
  0x95   :  { %1188 = vst [vmem:[%s5088_s3 + $0x460] sm:$0xff] %v932_v27  ;;  %v439_v27 = vmul.f32 %v2623_v43, %v179_v16  ;;  %v697_v34 = vadd.f32 %v2635_v2, %v437_v19  ;;  %v951_v41 = vmax.f32 %v695_v26, 0.0  ;;  %v197_v26 = vld [vmem:[%s5085_s0 + $0x5a8] sm:$0xff] }
  0x96   :  { %1189 = vst [vmem:[%s5088_s3 + $0x468] sm:$0xff] %v933_v31  ;;  %v440_v31 = vmul.f32 %v2623_v43, %v180_v20  ;;  %v698_v38 = vadd.f32 %v2635_v2, %v438_v23  ;;  %v952_v45 = vmax.f32 %v696_v30, 0.0  ;;  %v198_v30 = vld [vmem:[%s5085_s0 + $0x5b0] sm:$0xff] }
  0x97   :  { %1190 = vst [vmem:[%s5088_s3 + $0x470] sm:$0xff] %v934_v35  ;;  %v441_v35 = vmul.f32 %v2623_v43, %v181_v24  ;;  %v699_v42 = vadd.f32 %v2635_v2, %v439_v27  ;;  %v953_v49 = vmax.f32 %v697_v34, 0.0  ;;  %v199_v34 = vld [vmem:[%s5085_s0 + $0x5b8] sm:$0xff] }
  0x98   :  { %1191 = vst [vmem:[%s5088_s3 + $0x478] sm:$0xff] %v935_v39  ;;  %v442_v39 = vmul.f32 %v2623_v43, %v182_v28  ;;  %v700_v46 = vadd.f32 %v2635_v2, %v440_v31  ;;  %v954_v53 = vmax.f32 %v698_v38, 0.0  ;;  %v200_v38 = vld [vmem:[%s5085_s0 + $0x5c0] sm:$0xff] }
  0x99   :  { %1192 = vst [vmem:[%s5088_s3 + $0x480] sm:$0xff] %v936_v44  ;;  %v443_v44 = vmul.f32 %v2623_v43, %v183_v32  ;;  %v701_v50 = vadd.f32 %v2635_v2, %v441_v35  ;;  %v955_v57 = vmax.f32 %v699_v42, 0.0  ;;  %v201_v42 = vld [vmem:[%s5085_s0 + $0x5c8] sm:$0xff] }
  0x9a   :  { %1193 = vst [vmem:[%s5088_s3 + $0x488] sm:$0xff] %v937_v47  ;;  %v444_v47 = vmul.f32 %v2623_v43, %v184_v36  ;;  %v702_v54 = vadd.f32 %v2635_v2, %v442_v39  ;;  %v956_v61 = vmax.f32 %v700_v46, 0.0  ;;  %v202_v46 = vld [vmem:[%s5085_s0 + $0x5d0] sm:$0xff] }
  0x9b   :  { %1194 = vst [vmem:[%s5088_s3 + $0x490] sm:$0xff] %v938_v51  ;;  %v445_v51 = vmul.f32 %v2623_v43, %v185_v40  ;;  %v703_v58 = vadd.f32 %v2635_v2, %v443_v44  ;;  %v957_v3 = vmax.f32 %v701_v50, 0.0  ;;  %v203_v50 = vld [vmem:[%s5085_s0 + $0x5d8] sm:$0xff] }
  0x9c   :  { %1195 = vst [vmem:[%s5088_s3 + $0x498] sm:$0xff] %v939_v55  ;;  %v446_v55 = vmul.f32 %v2623_v43, %v186_v1  ;;  %v704_v62 = vadd.f32 %v2635_v2, %v444_v47  ;;  %v958_v7 = vmax.f32 %v702_v54, 0.0  ;;  %v204_v54 = vld [vmem:[%s5085_s0 + $0x5e0] sm:$0xff] }
  0x9d   :  { %1196 = vst [vmem:[%s5088_s3 + $0x4a0] sm:$0xff] %v940_v59  ;;  %v447_v59 = vmul.f32 %v2623_v43, %v187_v48  ;;  %v705_v4 = vadd.f32 %v2635_v2, %v445_v51  ;;  %v959_v11 = vmax.f32 %v703_v58, 0.0  ;;  %v205_v58 = vld [vmem:[%s5085_s0 + $0x5e8] sm:$0xff] }
  0x9e   :  { %1197 = vst [vmem:[%s5088_s3 + $0x4a8] sm:$0xff] %v941_v63  ;;  %v448_v63 = vmul.f32 %v2623_v43, %v188_v52  ;;  %v706_v8 = vadd.f32 %v2635_v2, %v446_v55  ;;  %v960_v15 = vmax.f32 %v704_v62, 0.0  ;;  %v206_v62 = vld [vmem:[%s5085_s0 + $0x5f0] sm:$0xff] }
  0x9f   :  { %1198 = vst [vmem:[%s5088_s3 + $0x4b0] sm:$0xff] %v942_v5  ;;  %v449_v5 = vmul.f32 %v2623_v43, %v189_v56  ;;  %v707_v12 = vadd.f32 %v2635_v2, %v447_v59  ;;  %v961_v19 = vmax.f32 %v705_v4, 0.0  ;;  %v207_v4 = vld [vmem:[%s5085_s0 + $0x5f8] sm:$0xff] }
  0xa0   :  { %1199 = vst [vmem:[%s5088_s3 + $0x4b8] sm:$0xff] %v943_v9  ;;  %v450_v9 = vmul.f32 %v2623_v43, %v190_v60  ;;  %v708_v16 = vadd.f32 %v2635_v2, %v448_v63  ;;  %v962_v23 = vmax.f32 %v706_v8, 0.0  ;;  %v208_v8 = vld [vmem:[%s5085_s0 + $0x600] sm:$0xff] }
  0xa1   :  { %1200 = vst [vmem:[%s5088_s3 + $0x4c0] sm:$0xff] %v944_v13  ;;  %v451_v13 = vmul.f32 %v2623_v43, %v191_v0  ;;  %v709_v20 = vadd.f32 %v2635_v2, %v449_v5  ;;  %v963_v27 = vmax.f32 %v707_v12, 0.0  ;;  %v209_v12 = vld [vmem:[%s5085_s0 + $0x608] sm:$0xff] }
  0xa2   :  { %1201 = vst [vmem:[%s5088_s3 + $0x4c8] sm:$0xff] %v945_v17  ;;  %v452_v17 = vmul.f32 %v2623_v43, %v192_v6  ;;  %v710_v24 = vadd.f32 %v2635_v2, %v450_v9  ;;  %v964_v31 = vmax.f32 %v708_v16, 0.0  ;;  %v210_v16 = vld [vmem:[%s5085_s0 + $0x610] sm:$0xff] }
  0xa3   :  { %1202 = vst [vmem:[%s5088_s3 + $0x4d0] sm:$0xff] %v946_v21  ;;  %v453_v21 = vmul.f32 %v2623_v43, %v193_v10  ;;  %v711_v28 = vadd.f32 %v2635_v2, %v451_v13  ;;  %v965_v35 = vmax.f32 %v709_v20, 0.0  ;;  %v211_v20 = vld [vmem:[%s5085_s0 + $0x618] sm:$0xff] }
  0xa4   :  { %1203 = vst [vmem:[%s5088_s3 + $0x4d8] sm:$0xff] %v947_v25  ;;  %v454_v25 = vmul.f32 %v2623_v43, %v194_v14  ;;  %v712_v32 = vadd.f32 %v2635_v2, %v452_v17  ;;  %v966_v39 = vmax.f32 %v710_v24, 0.0  ;;  %v212_v24 = vld [vmem:[%s5085_s0 + $0x620] sm:$0xff] }
  0xa5   :  { %1204 = vst [vmem:[%s5088_s3 + $0x4e0] sm:$0xff] %v948_v29  ;;  %v455_v29 = vmul.f32 %v2623_v43, %v195_v18  ;;  %v713_v36 = vadd.f32 %v2635_v2, %v453_v21  ;;  %v967_v44 = vmax.f32 %v711_v28, 0.0  ;;  %v213_v28 = vld [vmem:[%s5085_s0 + $0x628] sm:$0xff] }
  0xa6   :  { %1205 = vst [vmem:[%s5088_s3 + $0x4e8] sm:$0xff] %v949_v33  ;;  %v456_v33 = vmul.f32 %v2623_v43, %v196_v22  ;;  %v714_v40 = vadd.f32 %v2635_v2, %v454_v25  ;;  %v968_v47 = vmax.f32 %v712_v32, 0.0  ;;  %v214_v32 = vld [vmem:[%s5085_s0 + $0x630] sm:$0xff] }
  0xa7   :  { %1206 = vst [vmem:[%s5088_s3 + $0x4f0] sm:$0xff] %v950_v37  ;;  %v457_v37 = vmul.f32 %v2623_v43, %v197_v26  ;;  %v715_v1 = vadd.f32 %v2635_v2, %v455_v29  ;;  %v969_v51 = vmax.f32 %v713_v36, 0.0  ;;  %v215_v36 = vld [vmem:[%s5085_s0 + $0x638] sm:$0xff] }
  0xa8   :  { %1207 = vst [vmem:[%s5088_s3 + $0x4f8] sm:$0xff] %v951_v41  ;;  %v458_v41 = vmul.f32 %v2623_v43, %v198_v30  ;;  %v716_v48 = vadd.f32 %v2635_v2, %v456_v33  ;;  %v970_v55 = vmax.f32 %v714_v40, 0.0  ;;  %v216_v40 = vld [vmem:[%s5085_s0 + $0x640] sm:$0xff] }
  0xa9   :  { %1208 = vst [vmem:[%s5088_s3 + $0x500] sm:$0xff] %v952_v45  ;;  %v459_v45 = vmul.f32 %v2623_v43, %v199_v34  ;;  %v717_v52 = vadd.f32 %v2635_v2, %v457_v37  ;;  %v971_v59 = vmax.f32 %v715_v1, 0.0  ;;  %v217_v1 = vld [vmem:[%s5085_s0 + $0x648] sm:$0xff] }
  0xaa   :  { %1209 = vst [vmem:[%s5088_s3 + $0x508] sm:$0xff] %v953_v49  ;;  %v460_v49 = vmul.f32 %v2623_v43, %v200_v38  ;;  %v718_v56 = vadd.f32 %v2635_v2, %v458_v41  ;;  %v972_v63 = vmax.f32 %v716_v48, 0.0  ;;  %v218_v48 = vld [vmem:[%s5085_s0 + $0x650] sm:$0xff] }
  0xab   :  { %1210 = vst [vmem:[%s5088_s3 + $0x510] sm:$0xff] %v954_v53  ;;  %v461_v53 = vmul.f32 %v2623_v43, %v201_v42  ;;  %v719_v60 = vadd.f32 %v2635_v2, %v459_v45  ;;  %v973_v5 = vmax.f32 %v717_v52, 0.0  ;;  %v219_v52 = vld [vmem:[%s5085_s0 + $0x658] sm:$0xff] }
  0xac   :  { %1211 = vst [vmem:[%s5088_s3 + $0x518] sm:$0xff] %v955_v57  ;;  %v462_v57 = vmul.f32 %v2623_v43, %v202_v46  ;;  %v720_v0 = vadd.f32 %v2635_v2, %v460_v49  ;;  %v974_v9 = vmax.f32 %v718_v56, 0.0  ;;  %v220_v56 = vld [vmem:[%s5085_s0 + $0x660] sm:$0xff] }
  0xad   :  { %1212 = vst [vmem:[%s5088_s3 + $0x520] sm:$0xff] %v956_v61  ;;  %v463_v61 = vmul.f32 %v2623_v43, %v203_v50  ;;  %v721_v6 = vadd.f32 %v2635_v2, %v461_v53  ;;  %v975_v13 = vmax.f32 %v719_v60, 0.0  ;;  %v221_v60 = vld [vmem:[%s5085_s0 + $0x668] sm:$0xff] }
  0xae   :  { %1213 = vst [vmem:[%s5088_s3 + $0x528] sm:$0xff] %v957_v3  ;;  %v464_v3 = vmul.f32 %v2623_v43, %v204_v54  ;;  %v722_v10 = vadd.f32 %v2635_v2, %v462_v57  ;;  %v976_v17 = vmax.f32 %v720_v0, 0.0  ;;  %v222_v0 = vld [vmem:[%s5085_s0 + $0x670] sm:$0xff] }
  0xaf   :  { %1214 = vst [vmem:[%s5088_s3 + $0x530] sm:$0xff] %v958_v7  ;;  %v465_v7 = vmul.f32 %v2623_v43, %v205_v58  ;;  %v723_v14 = vadd.f32 %v2635_v2, %v463_v61  ;;  %v977_v21 = vmax.f32 %v721_v6, 0.0  ;;  %v223_v6 = vld [vmem:[%s5085_s0 + $0x678] sm:$0xff] }
  0xb0   :  { %1215 = vst [vmem:[%s5088_s3 + $0x538] sm:$0xff] %v959_v11  ;;  %v466_v11 = vmul.f32 %v2623_v43, %v206_v62  ;;  %v724_v18 = vadd.f32 %v2635_v2, %v464_v3  ;;  %v978_v25 = vmax.f32 %v722_v10, 0.0  ;;  %v224_v10 = vld [vmem:[%s5085_s0 + $0x680] sm:$0xff] }
  0xb1   :  { %1216 = vst [vmem:[%s5088_s3 + $0x540] sm:$0xff] %v960_v15  ;;  %v467_v15 = vmul.f32 %v2623_v43, %v207_v4  ;;  %v725_v22 = vadd.f32 %v2635_v2, %v465_v7  ;;  %v979_v29 = vmax.f32 %v723_v14, 0.0  ;;  %v225_v14 = vld [vmem:[%s5085_s0 + $0x688] sm:$0xff] }
  0xb2   :  { %1217 = vst [vmem:[%s5088_s3 + $0x548] sm:$0xff] %v961_v19  ;;  %v468_v19 = vmul.f32 %v2623_v43, %v208_v8  ;;  %v726_v26 = vadd.f32 %v2635_v2, %v466_v11  ;;  %v980_v33 = vmax.f32 %v724_v18, 0.0  ;;  %v226_v18 = vld [vmem:[%s5085_s0 + $0x690] sm:$0xff] }
  0xb3   :  { %1218 = vst [vmem:[%s5088_s3 + $0x550] sm:$0xff] %v962_v23  ;;  %v469_v23 = vmul.f32 %v2623_v43, %v209_v12  ;;  %v727_v30 = vadd.f32 %v2635_v2, %v467_v15  ;;  %v981_v37 = vmax.f32 %v725_v22, 0.0  ;;  %v227_v22 = vld [vmem:[%s5085_s0 + $0x698] sm:$0xff] }
  0xb4   :  { %1219 = vst [vmem:[%s5088_s3 + $0x558] sm:$0xff] %v963_v27  ;;  %v470_v27 = vmul.f32 %v2623_v43, %v210_v16  ;;  %v3358_v34 = vadd.f32 %v2635_v2, %v468_v19  ;;  %v982_v41 = vmax.f32 %v726_v26, 0.0  ;;  %v228_v26 = vld [vmem:[%s5085_s0 + $0x6a0] sm:$0xff] }
  0xb5   :  { %1220 = vst [vmem:[%s5088_s3 + $0x560] sm:$0xff] %v964_v31  ;;  %v471_v31 = vmul.f32 %v2623_v43, %v211_v20  ;;  %v3368_v38 = vadd.f32 %v2635_v2, %v469_v23  ;;  %v983_v45 = vmax.f32 %v727_v30, 0.0  ;;  %v3521_v23 = vld [vmem:[%s5087_s2] ss:$0 sm:$0xff]  ;;  %v229_v30 = vld [vmem:[%s5085_s0 + $0x6a8] sm:$0xff] }
  0xb6   :  { %1221 = vst [vmem:[%s5088_s3 + $0x568] sm:$0xff] %v965_v35  ;;  %v472_v35 = vmul.f32 %v2623_v43, %v212_v24  ;;  %v3378_v42 = vadd.f32 %v2635_v2, %v470_v27  ;;  %v5131_v49 = vmax.f32 %v3358_v34, 0.0 }
  0xb7   :  { %1222 = vst [vmem:[%s5088_s3 + $0x570] sm:$0xff] %v966_v39  ;;  %v473_v39 = vmul.f32 %v2623_v43, %v213_v28  ;;  %v3388_v46 = vadd.f32 %v2635_v2, %v471_v31  ;;  %v5129_v53 = vmax.f32 %v3368_v38, 0.0 }
  0xb8   :  { %1223 = vst [vmem:[%s5088_s3 + $0x578] sm:$0xff] %v967_v44  ;;  %v474_v44 = vmul.f32 %v2623_v43, %v214_v32  ;;  %v3399_v50 = vadd.f32 %v2635_v2, %v472_v35  ;;  %v5127_v57 = vmax.f32 %v3378_v42, 0.0  ;;  %v230_v35 = vld [vmem:[%s5085_s0 + $0x6b0] sm:$0xff] }
  0xb9   :  { %1224 = vst [vmem:[%s5088_s3 + $0x580] sm:$0xff] %v968_v47  ;;  %v475_v47 = vmul.f32 %v2623_v43, %v215_v36  ;;  %v3410_v54 = vadd.f32 %v2635_v2, %v473_v39  ;;  %v5125_v61 = vmax.f32 %v3388_v46, 0.0 }
  0xba   :  { %1225 = vst [vmem:[%s5088_s3 + $0x588] sm:$0xff] %v969_v51  ;;  %v476_v51 = vmul.f32 %v2623_v43, %v216_v40  ;;  %v3423_v58 = vadd.f32 %v2635_v2, %v474_v44  ;;  %v5123_v3 = vmax.f32 %v3399_v50, 0.0  ;;  %v231_v40 = vld [vmem:[%s5085_s0 + $0x6b8] sm:$0xff] }
  0xbb   :  { %1226 = vst [vmem:[%s5088_s3 + $0x590] sm:$0xff] %v970_v55  ;;  %v477_v55 = vmul.f32 %v2623_v43, %v217_v1  ;;  %v3436_v62 = vadd.f32 %v2635_v2, %v475_v47  ;;  %v5121_v7 = vmax.f32 %v3410_v54, 0.0 }
  0xbc   :  { %1227 = vst [vmem:[%s5088_s3 + $0x598] sm:$0xff] %v971_v59  ;;  %v478_v59 = vmul.f32 %v2623_v43, %v218_v48  ;;  %v3449_v4 = vadd.f32 %v2635_v2, %v476_v51  ;;  %v5119_v11 = vmax.f32 %v3423_v58, 0.0 }
  0xbd   :  { %1228 = vst [vmem:[%s5088_s3 + $0x5a0] sm:$0xff] %v972_v63  ;;  %v479_v63 = vmul.f32 %v2623_v43, %v219_v52  ;;  %v3462_v8 = vadd.f32 %v2635_v2, %v477_v55  ;;  %v5117_v15 = vmax.f32 %v3436_v62, 0.0  ;;  %v233_v52 = vld [vmem:[%s5085_s0 + $0x6c8] sm:$0xff] }
  0xbe   :  { %1229 = vst [vmem:[%s5088_s3 + $0x5a8] sm:$0xff] %v973_v5  ;;  %v480_v5 = vmul.f32 %v2623_v43, %v220_v56  ;;  %v3475_v12 = vadd.f32 %v2635_v2, %v478_v59  ;;  %v5115_v19 = vmax.f32 %v3449_v4, 0.0 }
  0xbf   :  { %1230 = vst [vmem:[%s5088_s3 + $0x5b0] sm:$0xff] %v974_v9  ;;  %v481_v9 = vmul.f32 %v2623_v43, %v221_v60  ;;  %v3488_v16 = vadd.f32 %v2635_v2, %v479_v63  ;;  %v234_v60 = vld [vmem:[%s5085_s0 + $0x6d0] sm:$0xff] }
  0xc0   :  { %1231 = vst [vmem:[%s5088_s3 + $0x5b8] sm:$0xff] %v975_v13  ;;  %v482_v13 = vmul.f32 %v2623_v43, %v222_v0  ;;  %v3501_v20 = vadd.f32 %v2635_v2, %v480_v5  ;;  %v5113_v2 = vmax.f32 %v3462_v8, 0.0  ;;  %v5111_v27 = vmax.f32 %v3475_v12, 0.0 }
  0xc1   :  { %1232 = vst [vmem:[%s5088_s3 + $0x5c0] sm:$0xff] %v976_v17  ;;  %v483_v17 = vmul.f32 %v2623_v43, %v223_v6  ;;  %v3524_v24 = vadd.f32 %v3521_v23, %v481_v9  ;;  %v5109_v31 = vmax.f32 %v3488_v16, 0.0  ;;  %v235_v6 = vld [vmem:[%s5085_s0 + $0x6d8] sm:$0xff] }
  0xc2   :  { %1233 = vst [vmem:[%s5088_s3 + $0x5c8] sm:$0xff] %v977_v21  ;;  %v3506_v21 = vld [vmem:[%s5086_s1] ss:$0 sm:$0xff]  ;;  %v3537_v28 = vadd.f32 %v3521_v23, %v482_v13  ;;  %v5107_v36 = vmax.f32 %v3501_v20, 0.0 }
  0xc3   :  { %1234 = vst [vmem:[%s5088_s3 + $0x5d0] sm:$0xff] %v978_v25  ;;  %v484_v43 = vmul.f32 %v3506_v21, %v224_v10  ;;  %v485_v25 = vmul.f32 %v3506_v21, %v225_v14  ;;  %v3550_v32 = vadd.f32 %v3521_v23, %v483_v17  ;;  %v488_v39 = vmul.f32 %v3506_v21, %v228_v26  ;;  %v236_v14 = vld [vmem:[%s5085_s0 + $0x6e0] sm:$0xff] }
  0xc4   :  { %1235 = vst [vmem:[%s5088_s3 + $0x5d8] sm:$0xff] %v979_v29  ;;  %v486_v29 = vmul.f32 %v3506_v21, %v226_v18  ;;  %v489_v1 = vmul.f32 %v3506_v21, %v229_v30  ;;  %v5103_v47 = vmax.f32 %v3537_v28, 0.0  ;;  %v490_v51 = vmul.f32 %v3506_v21, %v230_v35  ;;  %v238_v30 = vld [vmem:[%s5085_s0 + $0x6f0] sm:$0xff] }
  0xc5   :  { %1236 = vst [vmem:[%s5088_s3 + $0x5e0] sm:$0xff] %v980_v33  ;;  %v487_v33 = vmul.f32 %v3506_v21, %v227_v22  ;;  %v3576_v44 = vadd.f32 %v3521_v23, %v485_v25  ;;  %v5101_v55 = vmax.f32 %v3550_v32, 0.0  ;;  %v491_v59 = vmul.f32 %v3506_v21, %v231_v40  ;;  %v237_v22 = vld [vmem:[%s5085_s0 + $0x6e8] sm:$0xff]  ;;  %v239_v40 = vld [vmem:[%s5085_s0 + $0x6f8] sm:$0xff] }
  0xc6   :  { %1237 = vst [vmem:[%s5088_s3 + $0x5e8] sm:$0xff] %v981_v37  ;;  %v3563_v37 = vadd.f32 %v3521_v23, %v484_v43  ;;  %v3589_v48 = vadd.f32 %v3521_v23, %v486_v29  ;;  %v3615_v0 = vadd.f32 %v3521_v23, %v488_v39  ;;  %v3628_v10 = vadd.f32 %v3521_v23, %v489_v1 }
  0xc7   :  { %1238 = vst [vmem:[%s5088_s3 + $0x5f0] sm:$0xff] %v982_v41  ;;  %v5105_v41 = vmax.f32 %v3524_v24, 0.0  ;;  %v3602_v56 = vadd.f32 %v3521_v23, %v487_v33  ;;  %v5097_v9 = vmax.f32 %v3576_v44, 0.0  ;;  %v493_v13 = vmul.f32 %v3506_v21, %v233_v52  ;;  %v240_v52 = vld [vmem:[%s5085_s0 + $0x700] sm:$0xff] }
  0xc8   :  { %1239 = vst [vmem:[%s5088_s3 + $0x5f8] sm:$0xff] %v983_v45  ;;  %v232_v45 = vld [vmem:[%s5085_s0 + $0x6c0] sm:$0xff]  ;;  %v5099_v63 = vmax.f32 %v3563_v37, 0.0  ;;  %v5095_v17 = vmax.f32 %v3589_v48, 0.0  ;;  %v3641_v18 = vadd.f32 %v3521_v23, %v490_v51  ;;  %v494_v43 = vmul.f32 %v3506_v21, %v234_v60 }
  0xc9   :  { %1240 = vst [vmem:[%s5088_s3 + $0x600] sm:$0xff] %v5131_v49  ;;  %v492_v5 = vmul.f32 %v3506_v21, %v232_v45  ;;  %v5093_v25 = vmax.f32 %v3602_v56, 0.0  ;;  %v3654_v26 = vadd.f32 %v3521_v23, %v491_v59  ;;  %v495_v29 = vmul.f32 %v3506_v21, %v235_v6  ;;  %v241_v6 = vld [vmem:[%s5085_s0 + $0x708] sm:$0xff] }
  0xca   :  { %1241 = vst [vmem:[%s5088_s3 + $0x608] sm:$0xff] %v5129_v53  ;;  %v5091_v33 = vmax.f32 %v3615_v0, 0.0  ;;  %v496_v39 = vmul.f32 %v3506_v21, %v236_v14  ;;  %v5090_v1 = vmax.f32 %v3628_v10, 0.0  ;;  %v3680_v45 = vadd.f32 %v3521_v23, %v493_v13 }
  0xcb   :  { %1242 = vst [vmem:[%s5088_s3 + $0x610] sm:$0xff] %v5127_v57  ;;  %v3667_v35 = vadd.f32 %v3521_v23, %v492_v5  ;;  %v497_v51 = vmul.f32 %v3506_v21, %v237_v22  ;;  %v5092_v59 = vmax.f32 %v3641_v18, 0.0  ;;  %v3693_v60 = vadd.f32 %v3521_v23, %v494_v43  ;;  %v242_v22 = vld [vmem:[%s5085_s0 + $0x710] sm:$0xff] }
  0xcc   :  { %1243 = vst [vmem:[%s5088_s3 + $0x618] sm:$0xff] %v5125_v61  ;;  %v498_v5 = vmul.f32 %v3506_v21, %v238_v30  ;;  %v5094_v13 = vmax.f32 %v3654_v26, 0.0  ;;  %v3706_v14 = vadd.f32 %v3521_v23, %v495_v29  ;;  %v499_v43 = vmul.f32 %v3506_v21, %v239_v40  ;;  %v243_v40 = vld [vmem:[%s5085_s0 + $0x718] sm:$0xff] }
  0xcd   :  { %1244 = vst [vmem:[%s5088_s3 + $0x620] sm:$0xff] %v5123_v3  ;;  %v5096_v30 = vmax.f32 %v3667_v35, 0.0  ;;  %v500_v29 = vmul.f32 %v3506_v21, %v240_v52  ;;  %v244_v52 = vld [vmem:[%s5085_s0 + $0x720] sm:$0xff] }
  0xce   :  { %1245 = vst [vmem:[%s5088_s3 + $0x628] sm:$0xff] %v5121_v7 }
  0xcf   :  { %1246 = vst [vmem:[%s5088_s3 + $0x630] sm:$0xff] %v5119_v11 }
  0xd0   :  { %1247 = vst [vmem:[%s5088_s3 + $0x638] sm:$0xff] %v5117_v15 }
  0xd1   :  { %1248 = vst [vmem:[%s5088_s3 + $0x640] sm:$0xff] %v5115_v19 }
  0xd2   :  { %1249 = vst [vmem:[%s5088_s3 + $0x648] sm:$0xff] %v5113_v2 }
  0xd3   :  { %1250 = vst [vmem:[%s5088_s3 + $0x650] sm:$0xff] %v5111_v27 }
  0xd4   :  { %1251 = vst [vmem:[%s5088_s3 + $0x658] sm:$0xff] %v5109_v31 }
  0xd5   :  { %1252 = vst [vmem:[%s5088_s3 + $0x660] sm:$0xff] %v5107_v36 }
  0xd6   :  { %1253 = vst [vmem:[%s5088_s3 + $0x668] sm:$0xff] %v5105_v41 }
  0xd7   :  { %1254 = vst [vmem:[%s5088_s3 + $0x670] sm:$0xff] %v5103_v47 }
  0xd8   :  { %1255 = vst [vmem:[%s5088_s3 + $0x678] sm:$0xff] %v5101_v55 }
  0xd9   :  { %1256 = vst [vmem:[%s5088_s3 + $0x680] sm:$0xff] %v5099_v63 }
  0xda   :  { %1257 = vst [vmem:[%s5088_s3 + $0x688] sm:$0xff] %v5097_v9 }
  0xdb   :  { %1258 = vst [vmem:[%s5088_s3 + $0x690] sm:$0xff] %v5095_v17  ;;  %v5102_v17 = vmax.f32 %v3706_v14, 0.0 }
  0xdc   :  { %1259 = vst [vmem:[%s5088_s3 + $0x698] sm:$0xff] %v5093_v25  ;;  %v5100_v25 = vmax.f32 %v3693_v60, 0.0 }
  0xdd   :  { %1260 = vst [vmem:[%s5088_s3 + $0x6a0] sm:$0xff] %v5091_v33  ;;  %v5098_v33 = vmax.f32 %v3680_v45, 0.0 }
  0xde   :  { %1261 = vst [vmem:[%s5088_s3 + $0x6a8] sm:$0xff] %v5090_v1  ;;  %v3719_v1 = vadd.f32 %v3521_v23, %v496_v39  ;;  %v501_v39 = vmul.f32 %v3506_v21, %v241_v6  ;;  %v245_v6 = vld [vmem:[%s5085_s0 + $0x728] sm:$0xff] }
  0xdf   :  { %1262 = vst [vmem:[%s5088_s3 + $0x6b0] sm:$0xff] %v5092_v59  ;;  %v3732_v59 = vadd.f32 %v3521_v23, %v497_v51  ;;  %v502_v51 = vmul.f32 %v3506_v21, %v242_v22  ;;  %v246_v22 = vld [vmem:[%s5085_s0 + $0x730] sm:$0xff] }
  0xe0   :  { %1263 = vst [vmem:[%s5088_s3 + $0x6b8] sm:$0xff] %v5094_v13  ;;  %v3745_v13 = vadd.f32 %v3521_v23, %v498_v5  ;;  %v503_v5 = vmul.f32 %v3506_v21, %v243_v40  ;;  %v5104_v9 = vmax.f32 %v3719_v1, 0.0  ;;  %v247_v40 = vld [vmem:[%s5085_s0 + $0x738] sm:$0xff] }
  0xe1   :  { %1264 = vst [vmem:[%s5088_s3 + $0x6c0] sm:$0xff] %v5096_v30  ;;  %v3758_v30 = vadd.f32 %v3521_v23, %v499_v43  ;;  %v504_v43 = vmul.f32 %v3506_v21, %v244_v52  ;;  %v5106_v63 = vmax.f32 %v3732_v59, 0.0  ;;  %v248_v52 = vld [vmem:[%s5085_s0 + $0x740] sm:$0xff] }
  0xe2   :  { %1265 = vst [vmem:[%s5088_s3 + $0x6c8] sm:$0xff] %v5098_v33  ;;  %v3771_v33 = vadd.f32 %v3521_v23, %v500_v29  ;;  %v505_v29 = vmul.f32 %v3506_v21, %v245_v6  ;;  %v5108_v55 = vmax.f32 %v3745_v13, 0.0  ;;  %v249_v6 = vld [vmem:[%s5085_s0 + $0x748] sm:$0xff] }
  0xe3   :  { %1266 = vst [vmem:[%s5088_s3 + $0x6d0] sm:$0xff] %v5100_v25  ;;  %v3784_v25 = vadd.f32 %v3521_v23, %v501_v39  ;;  %v506_v39 = vmul.f32 %v3506_v21, %v246_v22  ;;  %v5110_v47 = vmax.f32 %v3758_v30, 0.0  ;;  %v250_v22 = vld [vmem:[%s5085_s0 + $0x750] sm:$0xff] }
  0xe4   :  { %1267 = vst [vmem:[%s5088_s3 + $0x6d8] sm:$0xff] %v5102_v17  ;;  %v3797_v17 = vadd.f32 %v3521_v23, %v502_v51  ;;  %v507_v51 = vmul.f32 %v3506_v21, %v247_v40  ;;  %v5112_v41 = vmax.f32 %v3771_v33, 0.0  ;;  %v251_v40 = vld [vmem:[%s5085_s0 + $0x758] sm:$0xff] }
  0xe5   :  { %1268 = vst [vmem:[%s5088_s3 + $0x6e0] sm:$0xff] %v5104_v9  ;;  %v3810_v9 = vadd.f32 %v3521_v23, %v503_v5  ;;  %v508_v5 = vmul.f32 %v3506_v21, %v248_v52  ;;  %v5114_v36 = vmax.f32 %v3784_v25, 0.0  ;;  %v252_v52 = vld [vmem:[%s5085_s0 + $0x760] sm:$0xff] }
  0xe6   :  { %1269 = vst [vmem:[%s5088_s3 + $0x6e8] sm:$0xff] %v5106_v63  ;;  %v3823_v63 = vadd.f32 %v3521_v23, %v504_v43  ;;  %v509_v43 = vmul.f32 %v3506_v21, %v249_v6  ;;  %v5116_v31 = vmax.f32 %v3797_v17, 0.0  ;;  %v253_v6 = vld [vmem:[%s5085_s0 + $0x768] sm:$0xff] }
  0xe7   :  { %1270 = vst [vmem:[%s5088_s3 + $0x6f0] sm:$0xff] %v5108_v55  ;;  %v3836_v55 = vadd.f32 %v3521_v23, %v505_v29  ;;  %v510_v29 = vmul.f32 %v3506_v21, %v250_v22  ;;  %v5118_v27 = vmax.f32 %v3810_v9, 0.0  ;;  %v254_v22 = vld [vmem:[%s5085_s0 + $0x770] sm:$0xff] }
  0xe8   :  { %1271 = vst [vmem:[%s5088_s3 + $0x6f8] sm:$0xff] %v5110_v47  ;;  %v3849_v47 = vadd.f32 %v3521_v23, %v506_v39  ;;  %v511_v39 = vmul.f32 %v3506_v21, %v251_v40  ;;  %v5120_v2 = vmax.f32 %v3823_v63, 0.0  ;;  %v255_v40 = vld [vmem:[%s5085_s0 + $0x778] sm:$0xff] }
  0xe9   :  { %1272 = vst [vmem:[%s5088_s3 + $0x700] sm:$0xff] %v5112_v41  ;;  %v3862_v41 = vadd.f32 %v3521_v23, %v507_v51  ;;  %v512_v51 = vmul.f32 %v3506_v21, %v252_v52  ;;  %v5122_v19 = vmax.f32 %v3836_v55, 0.0  ;;  %v256_v52 = vld [vmem:[%s5085_s0 + $0x780] sm:$0xff] }
  0xea   :  { %1273 = vst [vmem:[%s5088_s3 + $0x708] sm:$0xff] %v5114_v36  ;;  %v3875_v36 = vadd.f32 %v3521_v23, %v508_v5  ;;  %v513_v5 = vmul.f32 %v3506_v21, %v253_v6  ;;  %v5124_v15 = vmax.f32 %v3849_v47, 0.0  ;;  %v257_v6 = vld [vmem:[%s5085_s0 + $0x788] sm:$0xff] }
  0xeb   :  { %1274 = vst [vmem:[%s5088_s3 + $0x710] sm:$0xff] %v5116_v31  ;;  %v3888_v31 = vadd.f32 %v3521_v23, %v509_v43  ;;  %v514_v43 = vmul.f32 %v3506_v21, %v254_v22  ;;  %v5126_v11 = vmax.f32 %v3862_v41, 0.0  ;;  %v258_v22 = vld [vmem:[%s5085_s0 + $0x790] sm:$0xff] }
  0xec   :  { %1275 = vst [vmem:[%s5088_s3 + $0x718] sm:$0xff] %v5118_v27  ;;  %v3901_v27 = vadd.f32 %v3521_v23, %v510_v29  ;;  %v515_v29 = vmul.f32 %v3506_v21, %v255_v40  ;;  %v5128_v7 = vmax.f32 %v3875_v36, 0.0  ;;  %v259_v40 = vld [vmem:[%s5085_s0 + $0x798] sm:$0xff] }
  0xed   :  { %1276 = vst [vmem:[%s5088_s3 + $0x720] sm:$0xff] %v5120_v2  ;;  %v3914_v2 = vadd.f32 %v3521_v23, %v511_v39  ;;  %v516_v39 = vmul.f32 %v3506_v21, %v256_v52  ;;  %v5130_v3 = vmax.f32 %v3888_v31, 0.0  ;;  %v260_v52 = vld [vmem:[%s5085_s0 + $0x7a0] sm:$0xff] }
  0xee   :  { %1277 = vst [vmem:[%s5088_s3 + $0x728] sm:$0xff] %v5122_v19  ;;  %v3927_v19 = vadd.f32 %v3521_v23, %v512_v51  ;;  %v517_v51 = vmul.f32 %v3506_v21, %v257_v6  ;;  %v5132_v61 = vmax.f32 %v3901_v27, 0.0  ;;  %v261_v6 = vld [vmem:[%s5085_s0 + $0x7a8] sm:$0xff] }
  0xef   :  { %5160 = vst [vmem:[#allocation2_spill] sm:$0xff] %v3914_v2  ;;  %v5134_v57 = vmax.f32 %v3914_v2, 0.0 }
  0xf0   :  { %1278 = vst [vmem:[%s5088_s3 + $0x730] sm:$0xff] %v5124_v15  ;;  %v3940_v15 = vadd.f32 %v3521_v23, %v513_v5  ;;  %v518_v5 = vmul.f32 %v3506_v21, %v258_v22  ;;  %v262_v22 = vld [vmem:[%s5085_s0 + $0x7b0] sm:$0xff]  ;;  %v5136_v53 = vmax.f32 %v3927_v19, 0.0 }
  0xf1   :  { %5161 = vst [vmem:[#allocation3_spill] sm:$0xff] %v3927_v19 }
  0xf2   :  { %1279 = vst [vmem:[%s5088_s3 + $0x738] sm:$0xff] %v5126_v11  ;;  %v3953_v11 = vadd.f32 %v3521_v23, %v514_v43  ;;  %v519_v43 = vmul.f32 %v3506_v21, %v259_v40  ;;  %v263_v40 = vld [vmem:[%s5085_s0 + $0x7b8] sm:$0xff]  ;;  %v5138_v49 = vmax.f32 %v3940_v15, 0.0 }
  0xf3   :  { %5162 = vst [vmem:[#allocation4_spill] sm:$0xff] %v3940_v15 }
  0xf4   :  { %1280 = vst [vmem:[%s5088_s3 + $0x740] sm:$0xff] %v5128_v7  ;;  %v3966_v7 = vadd.f32 %v3521_v23, %v515_v29  ;;  %v520_v29 = vmul.f32 %v3506_v21, %v260_v52  ;;  %v264_v52 = vld [vmem:[%s5085_s0 + $0x7c0] sm:$0xff]  ;;  %v5140_v2 = vmax.f32 %v3953_v11, 0.0 }
  0xf5   :  { %5163 = vst [vmem:[#allocation5_spill] sm:$0xff] %v3953_v11 }
  0xf6   :  { %1281 = vst [vmem:[%s5088_s3 + $0x748] sm:$0xff] %v5130_v3  ;;  %v3979_v3 = vadd.f32 %v3521_v23, %v516_v39  ;;  %v521_v39 = vmul.f32 %v3506_v21, %v261_v6  ;;  %v265_v6 = vld [vmem:[%s5085_s0 + $0x7c8] sm:$0xff]  ;;  %v5142_v19 = vmax.f32 %v3966_v7, 0.0 }
  0xf7   :  { %5164 = vst [vmem:[#allocation6_spill] sm:$0xff] %v3966_v7 }
  0xf8   :  { %1282 = vst [vmem:[%s5088_s3 + $0x750] sm:$0xff] %v5132_v61  ;;  %v3992_v61 = vadd.f32 %v3521_v23, %v517_v51  ;;  %v522_v51 = vmul.f32 %v3506_v21, %v262_v22  ;;  %v266_v22 = vld [vmem:[%s5085_s0 + $0x7d0] sm:$0xff]  ;;  %v5144_v15 = vmax.f32 %v3979_v3, 0.0 }
  0xf9   :  { %5165 = vst [vmem:[#allocation7_spill] sm:$0xff] %v3979_v3 }
  0xfa   :  { %1283 = vst [vmem:[%s5088_s3 + $0x758] sm:$0xff] %v5134_v57  ;;  %v4005_v57 = vadd.f32 %v3521_v23, %v518_v5  ;;  %v523_v5 = vmul.f32 %v3506_v21, %v263_v40  ;;  %v267_v40 = vld [vmem:[%s5085_s0 + $0x7d8] sm:$0xff]  ;;  %v5146_v11 = vmax.f32 %v3992_v61, 0.0 }
  0xfb   :  { %5166 = vst [vmem:[#allocation8_spill] sm:$0xff] %v3992_v61 }
  0xfc   :  { %1284 = vst [vmem:[%s5088_s3 + $0x760] sm:$0xff] %v5136_v53  ;;  %v4018_v53 = vadd.f32 %v3521_v23, %v519_v43  ;;  %v524_v43 = vmul.f32 %v3506_v21, %v264_v52  ;;  %v268_v52 = vld [vmem:[%s5085_s0 + $0x7e0] sm:$0xff]  ;;  %v5148_v7 = vmax.f32 %v4005_v57, 0.0 }
  0xfd   :  { %5167 = vst [vmem:[#allocation9_spill] sm:$0xff] %v4005_v57 }
  0xfe   :  { %1285 = vst [vmem:[%s5088_s3 + $0x768] sm:$0xff] %v5138_v49  ;;  %v4031_v49 = vadd.f32 %v3521_v23, %v520_v29  ;;  %v525_v29 = vmul.f32 %v3506_v21, %v265_v6  ;;  %v269_v6 = vld [vmem:[%s5085_s0 + $0x7e8] sm:$0xff]  ;;  %v5150_v3 = vmax.f32 %v4018_v53, 0.0 }
  0xff   :  { %5168 = vst [vmem:[#allocation10_spill] sm:$0xff] %v4018_v53 }
 0x100   :  { %1286 = vst [vmem:[%s5088_s3 + $0x770] sm:$0xff] %v5140_v2  ;;  %v4044_v2 = vadd.f32 %v3521_v23, %v521_v39  ;;  %v526_v39 = vmul.f32 %v3506_v21, %v266_v22  ;;  %v270_v22 = vld [vmem:[%s5085_s0 + $0x7f0] sm:$0xff]  ;;  %v5151_v61 = vmax.f32 %v4031_v49, 0.0 }
 0x101   :  { %1287 = vst [vmem:[%s5088_s3 + $0x778] sm:$0xff] %v5142_v19  ;;  %v4057_v19 = vadd.f32 %v3521_v23, %v522_v51  ;;  %v527_v51 = vmul.f32 %v3506_v21, %v267_v40  ;;  %v271_v40 = vld [vmem:[%s5085_s0 + $0x7f8] sm:$0xff] }
 0x102   :  { %1288 = vst [vmem:[%s5088_s3 + $0x780] sm:$0xff] %v5144_v15  ;;  %v4070_v15 = vadd.f32 %v3521_v23, %v523_v5  ;;  %v528_v5 = vmul.f32 %v3506_v21, %v268_v52  ;;  %v5154_v57 = vmax.f32 %v4044_v2, 0.0  ;;  %v4106_v53 = vadd.f32 %v3521_v23, %v526_v39 }
 0x103   :  { %1289 = vst [vmem:[%s5088_s3 + $0x788] sm:$0xff] %v5146_v11  ;;  %v4083_v11 = vadd.f32 %v3521_v23, %v524_v43  ;;  %v529_v43 = vmul.f32 %v3506_v21, %v269_v6  ;;  %v5153_v52 = vmax.f32 %v4057_v19, 0.0  ;;  %v4116_v6 = vadd.f32 %v3521_v23, %v527_v51 }
 0x104   :  { %1290 = vst [vmem:[%s5088_s3 + $0x790] sm:$0xff] %v5148_v7  ;;  %v4096_v7 = vadd.f32 %v3521_v23, %v525_v29  ;;  %v5152_v29 = vmax.f32 %v4070_v15, 0.0 }
 0x105   :  { %5169 = vst [vmem:[#allocation11_spill] sm:$0xff] %v4083_v11  ;;  %v5155_v39 = vmax.f32 %v4083_v11, 0.0 }
 0x106   :  { %1291 = vst [vmem:[%s5088_s3 + $0x798] sm:$0xff] %v5150_v3  ;;  %v530_v3 = vmul.f32 %v3506_v21, %v270_v22  ;;  %v4126_v22 = vadd.f32 %v3521_v23, %v528_v5  ;;  %v5174_v5 = vmax.f32 %v4096_v7, 0.0 }
 0x107   :  { %5170 = vst [vmem:[#allocation12_spill] sm:$0xff] %v4096_v7 }
 0x108   :  { %1292 = vst [vmem:[%s5088_s3 + $0x7a0] sm:$0xff] %v5151_v61  ;;  %v531_v61 = vmul.f32 %v3506_v21, %v271_v40  ;;  %v4135_v21 = vadd.f32 %v3521_v23, %v529_v43  ;;  %v4144_v40 = vadd.f32 %v3521_v23, %v530_v3  ;;  %v1575_v43 = vld [vmem:[%s5088_s3 + $0x200] sm:$0xff]  ;;  %v5176_v3 = vmax.f32 %v4106_v53, 0.0 }
 0x109   :  { %5171 = vst [vmem:[#allocation13_spill] sm:$0xff] %v4106_v53  ;;  %v1583_v53 = vld [vmem:[%s5088_s3 + $0x18] sm:$0xff] }
 0x10a   :  { %1293 = vst [vmem:[%s5088_s3 + $0x7a8] sm:$0xff] %v5154_v57  ;;  %v1576_v57 = vld [vmem:[%s5088_s3 + $0x400] sm:$0xff]  ;;  %v4164_v11 = vadd.f32 %v3521_v23, %v531_v61  ;;  %v1580_v23 = vld [vmem:[%s5088_s3 + $0x10] sm:$0xff] }
 0x10b   :  { %5172 = vst [vmem:[#allocation14_spill] sm:$0xff] %v4116_v6 }
 0x10c   :  { %1294 = vst [vmem:[%s5088_s3 + $0x7b0] sm:$0xff] %v5153_v52 }
 0x10d   :  { %1295 = vst [vmem:[%s5088_s3 + $0x7b8] sm:$0xff] %v5152_v29  ;;  %v1574_v29 = vld [vmem:[%s5088_s3] sm:$0xff] }
 0x10e   :  { %1296 = vst [vmem:[%s5088_s3 + $0x7c0] sm:$0xff] %v5155_v39  ;;  %v1304_v52 = vmax.f32 %v1574_v29, %v1575_v43  ;;  %v5173_v39 = vmax.f32 %v3358_v34, 0.0  ;;  %v1577_v29 = vld [vmem:[%s5088_s3 + $0x8] sm:$0xff] }
 0x10f   :  { %1297 = vst [vmem:[%s5088_s3 + $0x7c8] sm:$0xff] %v5174_v5  ;;  %v1578_v34 = vld [vmem:[%s5088_s3 + $0x208] sm:$0xff]  ;;  %v5175_v5 = vmax.f32 %v3368_v38, 0.0  ;;  %v1582_v38 = vld [vmem:[%s5088_s3 + $0x410] sm:$0xff] }
 0x110   :  { %v1368_v51 = vmax.f32 %v1576_v57, %v5173_v39  ;;  %v1305_v57 = vmax.f32 %v1577_v29, %v1578_v34  ;;  %v1579_v39 = vld [vmem:[%s5088_s3 + $0x408] sm:$0xff]  ;;  %1298 = vst [vmem:[%s5088_s3 + $0x7d0] sm:$0xff] %v5176_v3  ;;  %v1581_v29 = vld [vmem:[%s5088_s3 + $0x210] sm:$0xff]  ;;  %v5178_v3 = vmax.f32 %v4116_v6, 0.0 }
 0x111   :  { %v1369_v43 = vmax.f32 %v1579_v39, %v5175_v5  ;;  %v1306_v34 = vmax.f32 %v1580_v23, %v1581_v29  ;;  %v5177_v39 = vmax.f32 %v3378_v42, 0.0  ;;  %v1584_v23 = vld [vmem:[%s5088_s3 + $0x218] sm:$0xff] }
 0x112   :  { %1299 = vst [vmem:[%s5088_s3 + $0x7d8] sm:$0xff] %v5178_v3  ;;  %v1307_v29 = vmax.f32 %v1583_v53, %v1584_v23  ;;  %v1585_v42 = vld [vmem:[%s5088_s3 + $0x418] sm:$0xff]  ;;  %v5180_v3 = vmax.f32 %v4126_v22, 0.0  ;;  %v1432_v6 = vmax.f32 %v1304_v52, %v1368_v51  ;;  %v1586_v53 = vld [vmem:[%s5088_s3 + $0x20] sm:$0xff]  ;;  %v1047_v52 = vmax.f32 %v4164_v11, 0.0 }
 0x113   :  { %v1370_v5 = vmax.f32 %v1582_v38, %v5177_v39  ;;  %v5179_v38 = vmax.f32 %v3388_v46, 0.0  ;;  %v1587_v23 = vld [vmem:[%s5088_s3 + $0x220] sm:$0xff]  ;;  %v1433_v51 = vmax.f32 %v1305_v57, %v1369_v43  ;;  %v1592_v43 = vld [vmem:[%s5088_s3 + $0x30] sm:$0xff] }
 0x114   :  { %1300 = vst [vmem:[%s5088_s3 + $0x7e0] sm:$0xff] %v5180_v3  ;;  %v1308_v7 = vmax.f32 %v1586_v53, %v1587_v23  ;;  %v1588_v46 = vld [vmem:[%s5088_s3 + $0x420] sm:$0xff]  ;;  %v5182_v3 = vmax.f32 %v4135_v21, 0.0  ;;  %v1589_v53 = vld [vmem:[%s5088_s3 + $0x28] sm:$0xff] }
 0x115   :  { %v1371_v39 = vmax.f32 %v1585_v42, %v5179_v38  ;;  %v5181_v42 = vmax.f32 %v3399_v50, 0.0  ;;  %v1590_v23 = vld [vmem:[%s5088_s3 + $0x228] sm:$0xff]  ;;  %v1434_v57 = vmax.f32 %v1306_v34, %v1370_v5  ;;  %1303 = vst [vmem:[%s5088_s3 + $0x7f8] sm:$0xff] %v1047_v52  ;;  %v1595_v5 = vld [vmem:[%s5088_s3 + $0x38] sm:$0xff] }
 0x116   :  { %1301 = vst [vmem:[%s5088_s3 + $0x7e8] sm:$0xff] %v5182_v3  ;;  %v1309_v61 = vmax.f32 %v1589_v53, %v1590_v23  ;;  %v1591_v50 = vld [vmem:[%s5088_s3 + $0x428] sm:$0xff]  ;;  %v5184_v3 = vmax.f32 %v4144_v40, 0.0  ;;  %v1593_v53 = vld [vmem:[%s5088_s3 + $0x230] sm:$0xff] }
 0x117   :  { %v1372_v38 = vmax.f32 %v1588_v46, %v5181_v42  ;;  %v5183_v46 = vmax.f32 %v3410_v54, 0.0  ;;  %v1310_v23 = vmax.f32 %v1592_v43, %v1593_v53  ;;  %v1594_v54 = vld [vmem:[%s5088_s3 + $0x430] sm:$0xff]  ;;  %v1435_v34 = vmax.f32 %v1307_v29, %v1371_v39  ;;  %1496 = vst [vmem:[%s5089_s4] sm:$0xff] %v1432_v6  ;;  %v1598_v39 = vld [vmem:[%s5088_s3 + $0x40] sm:$0xff]  ;;  %v1601_v6 = vld [vmem:[%s5088_s3 + $0x48] sm:$0xff] }
 0x118   :  { %1302 = vst [vmem:[%s5088_s3 + $0x7f0] sm:$0xff] %v5184_v3  ;;  %v1596_v3 = vld [vmem:[%s5088_s3 + $0x238] sm:$0xff]  ;;  %v5186_v53 = vmax.f32 %v3436_v62, 0.0  ;;  %v5187_v62 = vmax.f32 %v3449_v4, 0.0  ;;  %v5188_v4 = vmax.f32 %v3462_v8, 0.0  ;;  %v5189_v8 = vmax.f32 %v3475_v12, 0.0 }
 0x119   :  { %v1373_v42 = vmax.f32 %v1591_v50, %v5183_v46  ;;  %v5185_v50 = vmax.f32 %v3423_v58, 0.0  ;;  %v1311_v43 = vmax.f32 %v1595_v5, %v1596_v3  ;;  %v1597_v58 = vld [vmem:[%s5088_s3 + $0x438] sm:$0xff]  ;;  %v1436_v29 = vmax.f32 %v1308_v7, %v1372_v38  ;;  %v1600_v3 = vld [vmem:[%s5088_s3 + $0x440] sm:$0xff]  ;;  %1497 = vst [vmem:[%s5089_s4 + $0x8] sm:$0xff] %v1433_v51  ;;  %v1602_v38 = vld [vmem:[%s5088_s3 + $0x248] sm:$0xff] }
 0x11a   :  { %1498 = vst [vmem:[%s5089_s4 + $0x10] sm:$0xff] %v1434_v57  ;;  %v1604_v51 = vld [vmem:[%s5088_s3 + $0x50] sm:$0xff]  ;;  %v5190_v12 = vmax.f32 %v3488_v16, 0.0  ;;  %v5191_v16 = vmax.f32 %v3501_v20, 0.0  ;;  %v5192_v20 = vmax.f32 %v3524_v24, 0.0  ;;  %v5193_v24 = vmax.f32 %v3537_v28, 0.0 }
 0x11b   :  { %v1374_v46 = vmax.f32 %v1594_v54, %v5185_v50  ;;  %v1375_v54 = vmax.f32 %v1597_v58, %v5186_v53  ;;  %v1599_v50 = vld [vmem:[%s5088_s3 + $0x240] sm:$0xff]  ;;  %v1376_v58 = vmax.f32 %v1600_v3, %v5187_v62  ;;  %v1437_v7 = vmax.f32 %v1309_v61, %v1373_v42  ;;  %v1605_v42 = vld [vmem:[%s5088_s3 + $0x250] sm:$0xff]  ;;  %1499 = vst [vmem:[%s5089_s4 + $0x18] sm:$0xff] %v1435_v34 }
 0x11c   :  { %v1312_v5 = vmax.f32 %v1598_v39, %v1599_v50  ;;  %v1313_v53 = vmax.f32 %v1601_v6, %v1602_v38  ;;  %v1603_v39 = vld [vmem:[%s5088_s3 + $0x448] sm:$0xff]  ;;  %v1314_v3 = vmax.f32 %v1604_v51, %v1605_v42  ;;  %v1606_v62 = vld [vmem:[%s5088_s3 + $0x450] sm:$0xff]  ;;  %1500 = vst [vmem:[%s5089_s4 + $0x20] sm:$0xff] %v1436_v29  ;;  %v1612_v42 = vld [vmem:[%s5088_s3 + $0x460] sm:$0xff]  ;;  %v5194_v28 = vmax.f32 %v3550_v32, 0.0 }
 0x11d   :  { %v1377_v50 = vmax.f32 %v1603_v39, %v5188_v4  ;;  %v1438_v61 = vmax.f32 %v1310_v23, %v1374_v46  ;;  %v1378_v6 = vmax.f32 %v1606_v62, %v5189_v8  ;;  %v1439_v57 = vmax.f32 %v1311_v43, %v1375_v54  ;;  %v1607_v23 = vld [vmem:[%s5088_s3 + $0x58] sm:$0xff]  ;;  %v1610_v43 = vld [vmem:[%s5088_s3 + $0x60] sm:$0xff]  ;;  %1501 = vst [vmem:[%s5089_s4 + $0x28] sm:$0xff] %v1437_v7 }
 0x11e   :  { %v1608_v46 = vld [vmem:[%s5088_s3 + $0x258] sm:$0xff]  ;;  %v1440_v34 = vmax.f32 %v1312_v5, %v1376_v58  ;;  %v1611_v54 = vld [vmem:[%s5088_s3 + $0x260] sm:$0xff]  ;;  %v1380_v62 = vmax.f32 %v1612_v42, %v5191_v16  ;;  %v1613_v5 = vld [vmem:[%s5088_s3 + $0x68] sm:$0xff]  ;;  %v5195_v32 = vmax.f32 %v3563_v37, 0.0  ;;  %v5196_v37 = vmax.f32 %v3576_v44, 0.0 }
 0x11f   :  { %v1315_v38 = vmax.f32 %v1607_v23, %v1608_v46  ;;  %v1609_v39 = vld [vmem:[%s5088_s3 + $0x458] sm:$0xff]  ;;  %v1316_v51 = vmax.f32 %v1610_v43, %v1611_v54  ;;  %v1441_v29 = vmax.f32 %v1313_v53, %v1377_v50  ;;  %v1614_v58 = vld [vmem:[%s5088_s3 + $0x268] sm:$0xff]  ;;  %1502 = vst [vmem:[%s5089_s4 + $0x30] sm:$0xff] %v1438_v61  ;;  %v1442_v7 = vmax.f32 %v1314_v3, %v1378_v6  ;;  %v1616_v53 = vld [vmem:[%s5088_s3 + $0x70] sm:$0xff] }
 0x120   :  { %v1379_v4 = vmax.f32 %v1609_v39, %v5190_v12  ;;  %v1317_v8 = vmax.f32 %v1613_v5, %v1614_v58  ;;  %v1615_v23 = vld [vmem:[%s5088_s3 + $0x468] sm:$0xff]  ;;  %v1617_v50 = vld [vmem:[%s5088_s3 + $0x270] sm:$0xff]  ;;  %1503 = vst [vmem:[%s5089_s4 + $0x38] sm:$0xff] %v1439_v57  ;;  %v1619_v3 = vld [vmem:[%s5088_s3 + $0x78] sm:$0xff]  ;;  %v5197_v44 = vmax.f32 %v3589_v48, 0.0  ;;  %v5198_v48 = vmax.f32 %v3602_v56, 0.0 }
 0x121   :  { %v1381_v46 = vmax.f32 %v1615_v23, %v5192_v20  ;;  %v1318_v39 = vmax.f32 %v1616_v53, %v1617_v50  ;;  %v1618_v12 = vld [vmem:[%s5088_s3 + $0x470] sm:$0xff]  ;;  %v1620_v6 = vld [vmem:[%s5088_s3 + $0x278] sm:$0xff]  ;;  %1504 = vst [vmem:[%s5089_s4 + $0x40] sm:$0xff] %v1440_v34  ;;  %v1444_v57 = vmax.f32 %v1316_v51, %v1380_v62  ;;  %v1624_v58 = vld [vmem:[%s5088_s3 + $0x480] sm:$0xff]  ;;  %v5199_v56 = vmax.f32 %v3615_v0, 0.0 }
 0x122   :  { %v1382_v43 = vmax.f32 %v1618_v12, %v5193_v24  ;;  %v1443_v61 = vmax.f32 %v1315_v38, %v1379_v4  ;;  %v1319_v54 = vmax.f32 %v1619_v3, %v1620_v6  ;;  %v1621_v42 = vld [vmem:[%s5088_s3 + $0x478] sm:$0xff]  ;;  %v1622_v38 = vld [vmem:[%s5088_s3 + $0x80] sm:$0xff]  ;;  %v1384_v23 = vmax.f32 %v1624_v58, %v5195_v32  ;;  %1505 = vst [vmem:[%s5089_s4 + $0x48] sm:$0xff] %v1441_v29  ;;  %v1625_v51 = vld [vmem:[%s5088_s3 + $0x88] sm:$0xff] }
 0x123   :  { %v1383_v16 = vmax.f32 %v1621_v42, %v5194_v28  ;;  %v1623_v4 = vld [vmem:[%s5088_s3 + $0x280] sm:$0xff]  ;;  %v1445_v34 = vmax.f32 %v1317_v8, %v1381_v46  ;;  %v1626_v62 = vld [vmem:[%s5088_s3 + $0x288] sm:$0xff]  ;;  %1506 = vst [vmem:[%s5089_s4 + $0x50] sm:$0xff] %v1442_v7  ;;  %v1628_v8 = vld [vmem:[%s5088_s3 + $0x90] sm:$0xff]  ;;  %v5200_v0 = vmax.f32 %v3628_v10, 0.0  ;;  %v5201_v10 = vmax.f32 %v3641_v18, 0.0 }
 0x124   :  { %v1320_v5 = vmax.f32 %v1622_v38, %v1623_v4  ;;  %v1321_v20 = vmax.f32 %v1625_v51, %v1626_v62  ;;  %v1627_v53 = vld [vmem:[%s5088_s3 + $0x488] sm:$0xff]  ;;  %v1446_v29 = vmax.f32 %v1318_v39, %v1382_v43  ;;  %v1629_v46 = vld [vmem:[%s5088_s3 + $0x290] sm:$0xff]  ;;  %1507 = vst [vmem:[%s5089_s4 + $0x58] sm:$0xff] %v1443_v61  ;;  %v1631_v39 = vld [vmem:[%s5088_s3 + $0x98] sm:$0xff]  ;;  %v5202_v18 = vmax.f32 %v3654_v26, 0.0 }
 0x125   :  { %v1385_v50 = vmax.f32 %v1627_v53, %v5196_v37  ;;  %v1322_v12 = vmax.f32 %v1628_v8, %v1629_v46  ;;  %v1630_v24 = vld [vmem:[%s5088_s3 + $0x490] sm:$0xff]  ;;  %v1447_v7 = vmax.f32 %v1319_v54, %v1383_v16  ;;  %v1632_v43 = vld [vmem:[%s5088_s3 + $0x298] sm:$0xff]  ;;  %1508 = vst [vmem:[%s5089_s4 + $0x60] sm:$0xff] %v1444_v57  ;;  %v1634_v54 = vld [vmem:[%s5088_s3 + $0xa0] sm:$0xff]  ;;  %v5203_v26 = vmax.f32 %v3667_v35, 0.0 }
 0x126   :  { %v1386_v3 = vmax.f32 %v1630_v24, %v5197_v44  ;;  %v1323_v6 = vmax.f32 %v1631_v39, %v1632_v43  ;;  %v1633_v42 = vld [vmem:[%s5088_s3 + $0x498] sm:$0xff]  ;;  %v1448_v61 = vmax.f32 %v1320_v5, %v1384_v23  ;;  %v1635_v16 = vld [vmem:[%s5088_s3 + $0x2a0] sm:$0xff]  ;;  %1509 = vst [vmem:[%s5089_s4 + $0x68] sm:$0xff] %v1445_v34  ;;  %v1637_v5 = vld [vmem:[%s5088_s3 + $0xa8] sm:$0xff]  ;;  %v5204_v35 = vmax.f32 %v3680_v45, 0.0 }
 0x127   :  { %v1387_v28 = vmax.f32 %v1633_v42, %v5198_v48  ;;  %v1324_v38 = vmax.f32 %v1634_v54, %v1635_v16  ;;  %v1636_v4 = vld [vmem:[%s5088_s3 + $0x4a0] sm:$0xff]  ;;  %v1449_v57 = vmax.f32 %v1321_v20, %v1385_v50  ;;  %v1638_v32 = vld [vmem:[%s5088_s3 + $0x2a8] sm:$0xff]  ;;  %1510 = vst [vmem:[%s5089_s4 + $0x70] sm:$0xff] %v1446_v29  ;;  %v1640_v20 = vld [vmem:[%s5088_s3 + $0xb0] sm:$0xff]  ;;  %v5205_v45 = vmax.f32 %v3693_v60, 0.0 }
 0x128   :  { %v1388_v58 = vmax.f32 %v1636_v4, %v5199_v56  ;;  %v1325_v23 = vmax.f32 %v1637_v5, %v1638_v32  ;;  %v1639_v51 = vld [vmem:[%s5088_s3 + $0x4a8] sm:$0xff]  ;;  %v1450_v34 = vmax.f32 %v1322_v12, %v1386_v3  ;;  %v1641_v53 = vld [vmem:[%s5088_s3 + $0x2b0] sm:$0xff]  ;;  %1511 = vst [vmem:[%s5089_s4 + $0x78] sm:$0xff] %v1447_v7  ;;  %v1643_v46 = vld [vmem:[%s5088_s3 + $0xb8] sm:$0xff]  ;;  %v5206_v60 = vmax.f32 %v3706_v14, 0.0 }
 0x129   :  { %v1389_v62 = vmax.f32 %v1639_v51, %v5200_v0  ;;  %v1326_v37 = vmax.f32 %v1640_v20, %v1641_v53  ;;  %v1642_v50 = vld [vmem:[%s5088_s3 + $0x4b0] sm:$0xff]  ;;  %v1451_v29 = vmax.f32 %v1323_v6, %v1387_v28  ;;  %v1644_v12 = vld [vmem:[%s5088_s3 + $0x2b8] sm:$0xff]  ;;  %1512 = vst [vmem:[%s5089_s4 + $0x80] sm:$0xff] %v1448_v61  ;;  %v1646_v39 = vld [vmem:[%s5088_s3 + $0xc0] sm:$0xff]  ;;  %v5207_v14 = vmax.f32 %v3719_v1, 0.0 }
 0x12a   :  { %v1390_v8 = vmax.f32 %v1642_v50, %v5201_v10  ;;  %v1327_v24 = vmax.f32 %v1643_v46, %v1644_v12  ;;  %v1645_v44 = vld [vmem:[%s5088_s3 + $0x4b8] sm:$0xff]  ;;  %v1452_v7 = vmax.f32 %v1324_v38, %v1388_v58  ;;  %v1647_v43 = vld [vmem:[%s5088_s3 + $0x2c0] sm:$0xff]  ;;  %1513 = vst [vmem:[%s5089_s4 + $0x88] sm:$0xff] %v1449_v57  ;;  %v1649_v61 = vld [vmem:[%s5088_s3 + $0xc8] sm:$0xff]  ;;  %v5208_v1 = vmax.f32 %v3732_v59, 0.0 }
 0x12b   :  { %v1391_v3 = vmax.f32 %v1645_v44, %v5202_v18  ;;  %v1328_v6 = vmax.f32 %v1646_v39, %v1647_v43  ;;  %v1648_v42 = vld [vmem:[%s5088_s3 + $0x4c0] sm:$0xff]  ;;  %v1453_v28 = vmax.f32 %v1325_v23, %v1389_v62  ;;  %v1650_v54 = vld [vmem:[%s5088_s3 + $0x2c8] sm:$0xff]  ;;  %1514 = vst [vmem:[%s5089_s4 + $0x90] sm:$0xff] %v1450_v34  ;;  %v1652_v58 = vld [vmem:[%s5088_s3 + $0xd0] sm:$0xff]  ;;  %v5209_v59 = vmax.f32 %v3745_v13, 0.0 }
 0x12c   :  { %v1392_v48 = vmax.f32 %v1648_v42, %v5203_v26  ;;  %v1329_v16 = vmax.f32 %v1649_v61, %v1650_v54  ;;  %v1651_v38 = vld [vmem:[%s5088_s3 + $0x4c8] sm:$0xff]  ;;  %v1454_v56 = vmax.f32 %v1326_v37, %v1390_v8  ;;  %v1653_v57 = vld [vmem:[%s5088_s3 + $0x2d0] sm:$0xff]  ;;  %1515 = vst [vmem:[%s5089_s4 + $0x98] sm:$0xff] %v1451_v29  ;;  %v1655_v0 = vld [vmem:[%s5088_s3 + $0xd8] sm:$0xff]  ;;  %v5210_v13 = vmax.f32 %v3758_v30, 0.0 }
 0x12d   :  { %v1393_v4 = vmax.f32 %v1651_v38, %v5204_v35  ;;  %v1330_v5 = vmax.f32 %v1652_v58, %v1653_v57  ;;  %v1654_v32 = vld [vmem:[%s5088_s3 + $0x4d0] sm:$0xff]  ;;  %v1455_v51 = vmax.f32 %v1327_v24, %v1391_v3  ;;  %v1656_v62 = vld [vmem:[%s5088_s3 + $0x2d8] sm:$0xff]  ;;  %1516 = vst [vmem:[%s5089_s4 + $0xa0] sm:$0xff] %v1452_v7  ;;  %v1658_v50 = vld [vmem:[%s5088_s3 + $0xe0] sm:$0xff]  ;;  %v5211_v30 = vmax.f32 %v3771_v33, 0.0 }
 0x12e   :  { %v1394_v23 = vmax.f32 %v1654_v32, %v5205_v45  ;;  %v1331_v34 = vmax.f32 %v1655_v0, %v1656_v62  ;;  %v1657_v20 = vld [vmem:[%s5088_s3 + $0x4d8] sm:$0xff]  ;;  %v1456_v37 = vmax.f32 %v1328_v6, %v1392_v48  ;;  %v1659_v10 = vld [vmem:[%s5088_s3 + $0x2e0] sm:$0xff]  ;;  %1517 = vst [vmem:[%s5089_s4 + $0xa8] sm:$0xff] %v1453_v28  ;;  %v1661_v24 = vld [vmem:[%s5088_s3 + $0xe8] sm:$0xff]  ;;  %v5212_v33 = vmax.f32 %v3784_v25, 0.0 }
 0x12f   :  { %v1395_v53 = vmax.f32 %v1657_v20, %v5206_v60  ;;  %v1332_v8 = vmax.f32 %v1658_v50, %v1659_v10  ;;  %v1660_v29 = vld [vmem:[%s5088_s3 + $0x4e0] sm:$0xff]  ;;  %v1457_v12 = vmax.f32 %v1329_v16, %v1393_v4  ;;  %v1662_v44 = vld [vmem:[%s5088_s3 + $0x2e8] sm:$0xff]  ;;  %1518 = vst [vmem:[%s5089_s4 + $0xb0] sm:$0xff] %v1454_v56  ;;  %v1664_v43 = vld [vmem:[%s5088_s3 + $0xf0] sm:$0xff]  ;;  %v5213_v25 = vmax.f32 %v3797_v17, 0.0 }
 0x130   :  { %v1396_v46 = vmax.f32 %v1660_v29, %v5207_v14  ;;  %v1333_v18 = vmax.f32 %v1661_v24, %v1662_v44  ;;  %v1663_v3 = vld [vmem:[%s5088_s3 + $0x4e8] sm:$0xff]  ;;  %v1458_v39 = vmax.f32 %v1330_v5, %v1394_v23  ;;  %v1665_v6 = vld [vmem:[%s5088_s3 + $0x2f0] sm:$0xff]  ;;  %1519 = vst [vmem:[%s5089_s4 + $0xb8] sm:$0xff] %v1455_v51  ;;  %v1667_v61 = vld [vmem:[%s5088_s3 + $0xf8] sm:$0xff]  ;;  %v5214_v17 = vmax.f32 %v3810_v9, 0.0 }
 0x131   :  { %v1397_v7 = vmax.f32 %v1663_v3, %v5208_v1  ;;  %v1334_v42 = vmax.f32 %v1664_v43, %v1665_v6  ;;  %v1666_v26 = vld [vmem:[%s5088_s3 + $0x4f0] sm:$0xff]  ;;  %v1459_v28 = vmax.f32 %v1331_v34, %v1395_v53  ;;  %v1668_v54 = vld [vmem:[%s5088_s3 + $0x2f8] sm:$0xff]  ;;  %1520 = vst [vmem:[%s5089_s4 + $0xc0] sm:$0xff] %v1456_v37  ;;  %v1670_v56 = vld [vmem:[%s5088_s3 + $0x100] sm:$0xff]  ;;  %v5215_v9 = vmax.f32 %v3823_v63, 0.0 }
 0x132   :  { %v1398_v48 = vmax.f32 %v1666_v26, %v5209_v59  ;;  %v1335_v16 = vmax.f32 %v1667_v61, %v1668_v54  ;;  %v1669_v38 = vld [vmem:[%s5088_s3 + $0x4f8] sm:$0xff]  ;;  %v1460_v4 = vmax.f32 %v1332_v8, %v1396_v46  ;;  %v1671_v58 = vld [vmem:[%s5088_s3 + $0x300] sm:$0xff]  ;;  %1521 = vst [vmem:[%s5089_s4 + $0xc8] sm:$0xff] %v1457_v12  ;;  %v1673_v23 = vld [vmem:[%s5088_s3 + $0x108] sm:$0xff]  ;;  %v5216_v63 = vmax.f32 %v3836_v55, 0.0 }
 0x133   :  { %v1399_v35 = vmax.f32 %v1669_v38, %v5210_v13  ;;  %v1336_v57 = vmax.f32 %v1670_v56, %v1671_v58  ;;  %v1672_v5 = vld [vmem:[%s5088_s3 + $0x500] sm:$0xff]  ;;  %v1461_v45 = vmax.f32 %v1333_v18, %v1397_v7  ;;  %v1674_v51 = vld [vmem:[%s5088_s3 + $0x308] sm:$0xff]  ;;  %1522 = vst [vmem:[%s5089_s4 + $0xd0] sm:$0xff] %v1458_v39  ;;  %v1676_v60 = vld [vmem:[%s5088_s3 + $0x110] sm:$0xff]  ;;  %v5217_v55 = vmax.f32 %v3849_v47, 0.0 }
 0x134   :  { %v1400_v32 = vmax.f32 %v1672_v5, %v5211_v30  ;;  %v1337_v0 = vmax.f32 %v1673_v23, %v1674_v51  ;;  %v1675_v62 = vld [vmem:[%s5088_s3 + $0x508] sm:$0xff]  ;;  %v1462_v20 = vmax.f32 %v1334_v42, %v1398_v48  ;;  %v1677_v53 = vld [vmem:[%s5088_s3 + $0x310] sm:$0xff]  ;;  %1523 = vst [vmem:[%s5089_s4 + $0xd8] sm:$0xff] %v1459_v28  ;;  %v1679_v29 = vld [vmem:[%s5088_s3 + $0x118] sm:$0xff]  ;;  %v5218_v47 = vmax.f32 %v3862_v41, 0.0 }
 0x135   :  { %v1401_v34 = vmax.f32 %v1675_v62, %v5212_v33  ;;  %v1338_v37 = vmax.f32 %v1676_v60, %v1677_v53  ;;  %v1678_v50 = vld [vmem:[%s5088_s3 + $0x510] sm:$0xff]  ;;  %v1463_v8 = vmax.f32 %v1335_v16, %v1399_v35  ;;  %v1680_v14 = vld [vmem:[%s5088_s3 + $0x318] sm:$0xff]  ;;  %1524 = vst [vmem:[%s5089_s4 + $0xe0] sm:$0xff] %v1460_v4  ;;  %v1682_v18 = vld [vmem:[%s5088_s3 + $0x120] sm:$0xff]  ;;  %v5219_v41 = vmax.f32 %v3875_v36, 0.0 }
 0x136   :  { %v1402_v10 = vmax.f32 %v1678_v50, %v5213_v25  ;;  %v1339_v46 = vmax.f32 %v1679_v29, %v1680_v14  ;;  %v1681_v12 = vld [vmem:[%s5088_s3 + $0x518] sm:$0xff]  ;;  %v1464_v44 = vmax.f32 %v1336_v57, %v1400_v32  ;;  %v1683_v3 = vld [vmem:[%s5088_s3 + $0x320] sm:$0xff]  ;;  %1525 = vst [vmem:[%s5089_s4 + $0xe8] sm:$0xff] %v1461_v45  ;;  %v1685_v6 = vld [vmem:[%s5088_s3 + $0x128] sm:$0xff]  ;;  %v5220_v36 = vmax.f32 %v3888_v31, 0.0 }
 0x137   :  { %v1403_v24 = vmax.f32 %v1681_v12, %v5214_v17  ;;  %v1340_v1 = vmax.f32 %v1682_v18, %v1683_v3  ;;  %v1684_v7 = vld [vmem:[%s5088_s3 + $0x520] sm:$0xff]  ;;  %v1465_v43 = vmax.f32 %v1337_v0, %v1401_v34  ;;  %v1686_v42 = vld [vmem:[%s5088_s3 + $0x328] sm:$0xff]  ;;  %1526 = vst [vmem:[%s5089_s4 + $0xf0] sm:$0xff] %v1462_v20  ;;  %v1688_v61 = vld [vmem:[%s5088_s3 + $0x130] sm:$0xff]  ;;  %v5221_v31 = vmax.f32 %v3901_v27, 0.0 }
 0x138   :  { %v1404_v39 = vmax.f32 %v1684_v7, %v5215_v9  ;;  %v1341_v26 = vmax.f32 %v1685_v6, %v1686_v42  ;;  %v1687_v59 = vld [vmem:[%s5088_s3 + $0x528] sm:$0xff]  ;;  %v1466_v28 = vmax.f32 %v1338_v37, %v1402_v10  ;;  %v1689_v54 = vld [vmem:[%s5088_s3 + $0x330] sm:$0xff]  ;;  %1527 = vst [vmem:[%s5089_s4 + $0xf8] sm:$0xff] %v1463_v8  ;;  %v1691_v4 = vld [vmem:[%s5088_s3 + $0x138] sm:$0xff] }
 0x139   :  { %v1405_v48 = vmax.f32 %v1687_v59, %v5216_v63  ;;  %v1342_v16 = vmax.f32 %v1688_v61, %v1689_v54  ;;  %v1690_v38 = vld [vmem:[%s5088_s3 + $0x530] sm:$0xff]  ;;  %v1467_v35 = vmax.f32 %v1339_v46, %v1403_v24  ;;  %v1692_v56 = vld [vmem:[%s5088_s3 + $0x338] sm:$0xff]  ;;  %1528 = vst [vmem:[%s5089_s4 + $0x100] sm:$0xff] %v1464_v44  ;;  %v1694_v32 = vld [vmem:[%s5088_s3 + $0x140] sm:$0xff] }
 0x13a   :  { %v1406_v13 = vmax.f32 %v1690_v38, %v5217_v55  ;;  %v1343_v58 = vmax.f32 %v1691_v4, %v1692_v56  ;;  %v1693_v57 = vld [vmem:[%s5088_s3 + $0x538] sm:$0xff]  ;;  %v1468_v30 = vmax.f32 %v1340_v1, %v1404_v39  ;;  %v1695_v45 = vld [vmem:[%s5088_s3 + $0x340] sm:$0xff]  ;;  %1529 = vst [vmem:[%s5089_s4 + $0x108] sm:$0xff] %v1465_v43  ;;  %v1697_v33 = vld [vmem:[%s5088_s3 + $0x148] sm:$0xff] }
 0x13b   :  { %v1407_v5 = vmax.f32 %v1693_v57, %v5218_v47  ;;  %v1344_v23 = vmax.f32 %v1694_v32, %v1695_v45  ;;  %v1696_v51 = vld [vmem:[%s5088_s3 + $0x540] sm:$0xff]  ;;  %v1469_v62 = vmax.f32 %v1341_v26, %v1405_v48  ;;  %v1698_v34 = vld [vmem:[%s5088_s3 + $0x348] sm:$0xff]  ;;  %1530 = vst [vmem:[%s5089_s4 + $0x110] sm:$0xff] %v1466_v28  ;;  %v1700_v50 = vld [vmem:[%s5088_s3 + $0x150] sm:$0xff] }
 0x13c   :  { %v1408_v0 = vmax.f32 %v1696_v51, %v5219_v41  ;;  %v1345_v20 = vmax.f32 %v1697_v33, %v1698_v34  ;;  %v1699_v60 = vld [vmem:[%s5088_s3 + $0x548] sm:$0xff]  ;;  %v1470_v37 = vmax.f32 %v1342_v16, %v1406_v13  ;;  %v1701_v25 = vld [vmem:[%s5088_s3 + $0x350] sm:$0xff]  ;;  %1531 = vst [vmem:[%s5089_s4 + $0x118] sm:$0xff] %v1467_v35  ;;  %v1703_v46 = vld [vmem:[%s5088_s3 + $0x158] sm:$0xff] }
 0x13d   :  { %v1409_v53 = vmax.f32 %v1699_v60, %v5220_v36  ;;  %v1346_v10 = vmax.f32 %v1700_v50, %v1701_v25  ;;  %v1702_v8 = vld [vmem:[%s5088_s3 + $0x550] sm:$0xff]  ;;  %v1471_v14 = vmax.f32 %v1343_v58, %v1407_v5  ;;  %v1704_v12 = vld [vmem:[%s5088_s3 + $0x358] sm:$0xff]  ;;  %v5222_v27 = vld [vmem:[#allocation2_spill] sm:$0xff]  ;;  %1532 = vst [vmem:[%s5089_s4 + $0x120] sm:$0xff] %v1468_v30 }
 0x13e   :  { %v1410_v29 = vmax.f32 %v1702_v8, %v5221_v31  ;;  %v1347_v17 = vmax.f32 %v1703_v46, %v1704_v12  ;;  %v1705_v24 = vld [vmem:[%s5088_s3 + $0x558] sm:$0xff]  ;;  %v5223_v44 = vmax.f32 %v5222_v27, 0.0  ;;  %v1472_v3 = vmax.f32 %v1344_v23, %v1408_v0  ;;  %v1706_v1 = vld [vmem:[%s5088_s3 + $0x160] sm:$0xff]  ;;  %v5224_v43 = vld [vmem:[#allocation3_spill] sm:$0xff]  ;;  %1533 = vst [vmem:[%s5089_s4 + $0x128] sm:$0xff] %v1469_v62 }
 0x13f   :  { %v1707_v7 = vld [vmem:[%s5088_s3 + $0x360] sm:$0xff]  ;;  %v5225_v6 = vmax.f32 %v5224_v43, 0.0  ;;  %v1473_v26 = vmax.f32 %v1345_v20, %v1409_v53  ;;  %v1709_v59 = vld [vmem:[%s5088_s3 + $0x168] sm:$0xff]  ;;  %v5226_v61 = vld [vmem:[#allocation4_spill] sm:$0xff]  ;;  %1534 = vst [vmem:[%s5089_s4 + $0x130] sm:$0xff] %v1470_v37 }
 0x140   :  { %v1411_v18 = vmax.f32 %v1705_v24, %v5223_v44  ;;  %v1348_v9 = vmax.f32 %v1706_v1, %v1707_v7  ;;  %v1708_v39 = vld [vmem:[%s5088_s3 + $0x560] sm:$0xff]  ;;  %v1710_v63 = vld [vmem:[%s5088_s3 + $0x368] sm:$0xff]  ;;  %v5227_v54 = vmax.f32 %v5226_v61, 0.0  ;;  %v1474_v38 = vmax.f32 %v1346_v10, %v1410_v29  ;;  %v1712_v55 = vld [vmem:[%s5088_s3 + $0x170] sm:$0xff]  ;;  %1535 = vst [vmem:[%s5089_s4 + $0x138] sm:$0xff] %v1471_v14 }
 0x141   :  { %v1412_v42 = vmax.f32 %v1708_v39, %v5225_v6  ;;  %v1349_v48 = vmax.f32 %v1709_v59, %v1710_v63  ;;  %v1711_v28 = vld [vmem:[%s5088_s3 + $0x568] sm:$0xff]  ;;  %v1713_v13 = vld [vmem:[%s5088_s3 + $0x370] sm:$0xff]  ;;  %v5228_v56 = vld [vmem:[#allocation5_spill] sm:$0xff]  ;;  %1536 = vst [vmem:[%s5089_s4 + $0x140] sm:$0xff] %v1472_v3 }
 0x142   :  { %v1413_v16 = vmax.f32 %v1711_v28, %v5227_v54  ;;  %v1350_v35 = vmax.f32 %v1712_v55, %v1713_v13  ;;  %v1714_v4 = vld [vmem:[%s5088_s3 + $0x570] sm:$0xff]  ;;  %v5229_v58 = vmax.f32 %v5228_v56, 0.0  ;;  %v1475_v47 = vmax.f32 %v1347_v17, %v1411_v18  ;;  %v1715_v5 = vld [vmem:[%s5088_s3 + $0x178] sm:$0xff]  ;;  %v5230_v23 = vld [vmem:[#allocation6_spill] sm:$0xff]  ;;  %1537 = vst [vmem:[%s5089_s4 + $0x148] sm:$0xff] %v1473_v26 }
 0x143   :  { %v1716_v30 = vld [vmem:[%s5088_s3 + $0x378] sm:$0xff]  ;;  %v5231_v51 = vmax.f32 %v5230_v23, 0.0  ;;  %v1476_v0 = vmax.f32 %v1348_v9, %v1412_v42  ;;  %v1718_v62 = vld [vmem:[%s5088_s3 + $0x180] sm:$0xff]  ;;  %v5232_v60 = vld [vmem:[#allocation7_spill] sm:$0xff]  ;;  %1538 = vst [vmem:[%s5089_s4 + $0x150] sm:$0xff] %v1474_v38  ;;  %v5240_v54 = vmax.f32 %v4031_v49, 0.0 }
 0x144   :  { %v1414_v57 = vmax.f32 %v1714_v4, %v5229_v58  ;;  %v1351_v32 = vmax.f32 %v1715_v5, %v1716_v30  ;;  %v1717_v45 = vld [vmem:[%s5088_s3 + $0x578] sm:$0xff]  ;;  %v1719_v33 = vld [vmem:[%s5088_s3 + $0x380] sm:$0xff]  ;;  %v5233_v36 = vmax.f32 %v5232_v60, 0.0  ;;  %v1477_v37 = vmax.f32 %v1349_v48, %v1413_v16  ;;  %v1721_v50 = vld [vmem:[%s5088_s3 + $0x188] sm:$0xff]  ;;  %1539 = vst [vmem:[%s5089_s4 + $0x158] sm:$0xff] %v1475_v47 }
 0x145   :  { %v1415_v41 = vmax.f32 %v1717_v45, %v5231_v51  ;;  %v1352_v34 = vmax.f32 %v1718_v62, %v1719_v33  ;;  %v1720_v20 = vld [vmem:[%s5088_s3 + $0x580] sm:$0xff]  ;;  %v1722_v25 = vld [vmem:[%s5088_s3 + $0x388] sm:$0xff]  ;;  %v5234_v31 = vld [vmem:[#allocation8_spill] sm:$0xff]  ;;  %1540 = vst [vmem:[%s5089_s4 + $0x160] sm:$0xff] %v1476_v0  ;;  %v5241_v49 = vmax.f32 %v4044_v2, 0.0  ;;  %v5242_v2 = vmax.f32 %v4057_v19, 0.0 }
 0x146   :  { %v1416_v53 = vmax.f32 %v1720_v20, %v5233_v36  ;;  %v1353_v10 = vmax.f32 %v1721_v50, %v1722_v25  ;;  %v1723_v8 = vld [vmem:[%s5088_s3 + $0x588] sm:$0xff]  ;;  %v5235_v29 = vmax.f32 %v5234_v31, 0.0  ;;  %v1478_v46 = vmax.f32 %v1350_v35, %v1414_v57  ;;  %v1724_v12 = vld [vmem:[%s5088_s3 + $0x190] sm:$0xff]  ;;  %v5236_v44 = vld [vmem:[#allocation9_spill] sm:$0xff]  ;;  %1541 = vst [vmem:[%s5089_s4 + $0x168] sm:$0xff] %v1477_v37 }
 0x147   :  { %v1725_v17 = vld [vmem:[%s5088_s3 + $0x390] sm:$0xff]  ;;  %v5237_v18 = vmax.f32 %v5236_v44, 0.0  ;;  %v1479_v1 = vmax.f32 %v1351_v32, %v1415_v41  ;;  %v1727_v7 = vld [vmem:[%s5088_s3 + $0x198] sm:$0xff]  ;;  %v5238_v6 = vld [vmem:[#allocation10_spill] sm:$0xff]  ;;  %v5243_v19 = vmax.f32 %v4070_v15, 0.0 }
 0x148   :  { %v1417_v14 = vmax.f32 %v1723_v8, %v5235_v29  ;;  %v1354_v24 = vmax.f32 %v1724_v12, %v1725_v17  ;;  %v1726_v27 = vld [vmem:[%s5088_s3 + $0x590] sm:$0xff]  ;;  %v1728_v9 = vld [vmem:[%s5088_s3 + $0x398] sm:$0xff]  ;;  %v5239_v42 = vmax.f32 %v5238_v6, 0.0  ;;  %v1480_v59 = vmax.f32 %v1352_v34, %v1416_v53  ;;  %v1730_v63 = vld [vmem:[%s5088_s3 + $0x1a0] sm:$0xff]  ;;  %1542 = vst [vmem:[%s5089_s4 + $0x170] sm:$0xff] %v1478_v46 }
 0x149   :  { %v1418_v3 = vmax.f32 %v1726_v27, %v5237_v18  ;;  %v1355_v39 = vmax.f32 %v1727_v7, %v1728_v9  ;;  %v1729_v43 = vld [vmem:[%s5088_s3 + $0x598] sm:$0xff]  ;;  %v1731_v48 = vld [vmem:[%s5088_s3 + $0x3a0] sm:$0xff]  ;;  %v1733_v55 = vld [vmem:[%s5088_s3 + $0x1a8] sm:$0xff]  ;;  %1543 = vst [vmem:[%s5089_s4 + $0x178] sm:$0xff] %v1479_v1 }
 0x14a   :  { %v1419_v26 = vmax.f32 %v1729_v43, %v5239_v42  ;;  %v1356_v28 = vmax.f32 %v1730_v63, %v1731_v48  ;;  %v1732_v61 = vld [vmem:[%s5088_s3 + $0x5a0] sm:$0xff]  ;;  %v1481_v38 = vmax.f32 %v1353_v10, %v1417_v14  ;;  %v1734_v13 = vld [vmem:[%s5088_s3 + $0x3a8] sm:$0xff]  ;;  %v1736_v57 = vld [vmem:[%s5088_s3 + $0x1b0] sm:$0xff]  ;;  %1544 = vst [vmem:[%s5089_s4 + $0x180] sm:$0xff] %v1480_v59 }
 0x14b   :  { %v1420_v16 = vmax.f32 %v1732_v61, %v5240_v54  ;;  %v1357_v35 = vmax.f32 %v1733_v55, %v1734_v13  ;;  %v1735_v4 = vld [vmem:[%s5088_s3 + $0x5a8] sm:$0xff]  ;;  %v1482_v58 = vmax.f32 %v1354_v24, %v1418_v3  ;;  %v1737_v47 = vld [vmem:[%s5088_s3 + $0x3b0] sm:$0xff]  ;;  %v1739_v23 = vld [vmem:[%s5088_s3 + $0x1b8] sm:$0xff] }
 0x14c   :  { %v1421_v56 = vmax.f32 %v1735_v4, %v5241_v49  ;;  %v1358_v5 = vmax.f32 %v1736_v57, %v1737_v47  ;;  %v1738_v30 = vld [vmem:[%s5088_s3 + $0x5b0] sm:$0xff]  ;;  %v1483_v45 = vmax.f32 %v1355_v39, %v1419_v26  ;;  %v1740_v51 = vld [vmem:[%s5088_s3 + $0x3b8] sm:$0xff]  ;;  %v1742_v34 = vld [vmem:[%s5088_s3 + $0x1c0] sm:$0xff]  ;;  %1545 = vst [vmem:[%s5089_s4 + $0x188] sm:$0xff] %v1481_v38 }
 0x14d   :  { %v1422_v32 = vmax.f32 %v1738_v30, %v5242_v2  ;;  %v1359_v41 = vmax.f32 %v1739_v23, %v1740_v51  ;;  %v1741_v0 = vld [vmem:[%s5088_s3 + $0x5b8] sm:$0xff]  ;;  %v1484_v33 = vmax.f32 %v1356_v28, %v1420_v16  ;;  %v1743_v20 = vld [vmem:[%s5088_s3 + $0x3c0] sm:$0xff]  ;;  %v5244_v15 = vld [vmem:[#allocation11_spill] sm:$0xff]  ;;  %1546 = vst [vmem:[%s5089_s4 + $0x190] sm:$0xff] %v1482_v58  ;;  %v5252_v16 = vmax.f32 %v4126_v22, 0.0 }
 0x14e   :  { %v1423_v62 = vmax.f32 %v1741_v0, %v5243_v19  ;;  %v1360_v60 = vmax.f32 %v1742_v34, %v1743_v20  ;;  %v1744_v36 = vld [vmem:[%s5088_s3 + $0x5c0] sm:$0xff]  ;;  %v5245_v53 = vmax.f32 %v5244_v15, 0.0  ;;  %v1485_v50 = vmax.f32 %v1357_v35, %v1421_v56  ;;  %v1745_v25 = vld [vmem:[%s5088_s3 + $0x1c8] sm:$0xff]  ;;  %v5246_v29 = vld [vmem:[#allocation12_spill] sm:$0xff]  ;;  %1547 = vst [vmem:[%s5089_s4 + $0x198] sm:$0xff] %v1483_v45 }
 0x14f   :  { %v1746_v10 = vld [vmem:[%s5088_s3 + $0x3c8] sm:$0xff]  ;;  %v5247_v14 = vmax.f32 %v5246_v29, 0.0  ;;  %v1486_v12 = vmax.f32 %v1358_v5, %v1422_v32  ;;  %v1748_v17 = vld [vmem:[%s5088_s3 + $0x1d0] sm:$0xff]  ;;  %v5248_v18 = vld [vmem:[#allocation13_spill] sm:$0xff]  ;;  %1548 = vst [vmem:[%s5089_s4 + $0x1a0] sm:$0xff] %v1484_v33  ;;  %v5253_v22 = vmax.f32 %v4135_v21, 0.0 }
 0x150   :  { %v1424_v37 = vmax.f32 %v1744_v36, %v5245_v53  ;;  %v1361_v8 = vmax.f32 %v1745_v25, %v1746_v10  ;;  %v1747_v31 = vld [vmem:[%s5088_s3 + $0x5c8] sm:$0xff]  ;;  %v1749_v24 = vld [vmem:[%s5088_s3 + $0x3d0] sm:$0xff]  ;;  %v5249_v3 = vmax.f32 %v5248_v18, 0.0  ;;  %v1487_v7 = vmax.f32 %v1359_v41, %v1423_v62  ;;  %v1751_v9 = vld [vmem:[%s5088_s3 + $0x1d8] sm:$0xff]  ;;  %1549 = vst [vmem:[%s5089_s4 + $0x1a8] sm:$0xff] %v1485_v50 }
 0x151   :  { %v1425_v46 = vmax.f32 %v1747_v31, %v5247_v14  ;;  %v1362_v27 = vmax.f32 %v1748_v17, %v1749_v24  ;;  %v1750_v44 = vld [vmem:[%s5088_s3 + $0x5d0] sm:$0xff]  ;;  %v1752_v39 = vld [vmem:[%s5088_s3 + $0x3d8] sm:$0xff]  ;;  %v5250_v42 = vld [vmem:[#allocation14_spill] sm:$0xff]  ;;  %1550 = vst [vmem:[%s5089_s4 + $0x1b0] sm:$0xff] %v1486_v12  ;;  %v5254_v21 = vmax.f32 %v4144_v40, 0.0 }
 0x152   :  { %v1426_v1 = vmax.f32 %v1750_v44, %v5249_v3  ;;  %v1363_v43 = vmax.f32 %v1751_v9, %v1752_v39  ;;  %v1753_v6 = vld [vmem:[%s5088_s3 + $0x5d8] sm:$0xff]  ;;  %v5251_v26 = vmax.f32 %v5250_v42, 0.0  ;;  %v1488_v63 = vmax.f32 %v1360_v60, %v1424_v37  ;;  %v1754_v48 = vld [vmem:[%s5088_s3 + $0x1e0] sm:$0xff]  ;;  %v1757_v13 = vld [vmem:[%s5088_s3 + $0x1e8] sm:$0xff]  ;;  %1551 = vst [vmem:[%s5089_s4 + $0x1b8] sm:$0xff] %v1487_v7 }
 0x153   :  { %v1755_v28 = vld [vmem:[%s5088_s3 + $0x3e0] sm:$0xff]  ;;  %v1489_v55 = vmax.f32 %v1361_v8, %v1425_v46  ;;  %v1758_v35 = vld [vmem:[%s5088_s3 + $0x3e8] sm:$0xff]  ;;  %v1760_v57 = vld [vmem:[%s5088_s3 + $0x1f0] sm:$0xff] }
 0x154   :  { %v1427_v59 = vmax.f32 %v1753_v6, %v5251_v26  ;;  %v1364_v61 = vmax.f32 %v1754_v48, %v1755_v28  ;;  %v1756_v54 = vld [vmem:[%s5088_s3 + $0x5e0] sm:$0xff]  ;;  %v1365_v4 = vmax.f32 %v1757_v13, %v1758_v35  ;;  %v1759_v49 = vld [vmem:[%s5088_s3 + $0x5e8] sm:$0xff]  ;;  %v1490_v58 = vmax.f32 %v1362_v27, %v1426_v1  ;;  %v1761_v47 = vld [vmem:[%s5088_s3 + $0x3f0] sm:$0xff]  ;;  %1552 = vst [vmem:[%s5089_s4 + $0x1c0] sm:$0xff] %v1488_v63 }
 0x155   :  { %v1428_v38 = vmax.f32 %v1756_v54, %v5252_v16  ;;  %v1429_v56 = vmax.f32 %v1759_v49, %v5253_v22  ;;  %v1366_v5 = vmax.f32 %v1760_v57, %v1761_v47  ;;  %v1762_v30 = vld [vmem:[%s5088_s3 + $0x5f0] sm:$0xff]  ;;  %v1763_v45 = vld [vmem:[%s5088_s3 + $0x1f8] sm:$0xff]  ;;  %1553 = vst [vmem:[%s5089_s4 + $0x1c8] sm:$0xff] %v1489_v55 }
 0x156   :  { %v1430_v2 = vmax.f32 %v1762_v30, %v5254_v21  ;;  %v1491_v32 = vmax.f32 %v1363_v43, %v1427_v59  ;;  %v1764_v23 = vld [vmem:[%s5088_s3 + $0x3f8] sm:$0xff]  ;;  %1554 = vst [vmem:[%s5089_s4 + $0x1d0] sm:$0xff] %v1490_v58 }
 0x157   :  { %v1367_v51 = vmax.f32 %v1763_v45, %v1764_v23  ;;  %v1765_v41 = vld [vmem:[%s5088_s3 + $0x5f8] sm:$0xff]  ;;  %v1492_v0 = vmax.f32 %v1364_v61, %v1428_v38  ;;  %v1493_v19 = vmax.f32 %v1365_v4, %v1429_v56 }
 0x158   :  { %v1431_v40 = vmax.f32 %v1765_v41, %v1047_v52  ;;  %v1494_v62 = vmax.f32 %v1366_v5, %v1430_v2  ;;  %1555 = vst [vmem:[%s5089_s4 + $0x1d8] sm:$0xff] %v1491_v32 }
 0x159   :  { %1556 = vst [vmem:[%s5089_s4 + $0x1e0] sm:$0xff] %v1492_v0 }
 0x15a   :  { %v1495_v11 = vmax.f32 %v1367_v51, %v1431_v40  ;;  %1557 = vst [vmem:[%s5089_s4 + $0x1e8] sm:$0xff] %v1493_v19 }
 0x15b   :  { %1558 = vst [vmem:[%s5089_s4 + $0x1f0] sm:$0xff] %v1494_v62 }
 0x15c   :  { %1559 = vst [vmem:[%s5089_s4 + $0x1f8] sm:$0xff] %v1495_v11 }

</bundles_post_ra>
